<compile_context>
chip_gen: v7x
topology: tpu7x:2x2x1
jax: 0.10.0
libtpu: 0.0.40
codegen_flags: <defaults>
</compile_context>

<pallas_src>
import functools

import numpy as np
import jax
import jax.numpy as jnp
from jax import lax
from jax.experimental import pallas as pl
from jax.experimental.pallas import tpu as pltpu


_TN_SCATTER = 512      # points per tile in the scatter-mean phase
_TN_EMIT = 2048        # points per tile in the feature-emit phase
_PILLAR_ALIGN = 8      # sublane alignment of the per-tile pillar window
_TPW = _TN_SCATTER + _PILLAR_ALIGN   # pillar-window width per tile


def _scatter_mean_kernel(base_ref, xyz1_ref, inv_ref, out_ref, *, tpw):
    """Accumulate per-pillar xyz sums and counts over sorted point tiles.

    base_ref : [T]        i32 SMEM (scalar prefetch): 8-aligned first pillar id of tile i
    xyz1_ref : [4, TN]    f32 VMEM: rows = (x, y, z, 1), points sorted by pillar id
    inv_ref  : [1, TN]    i32 VMEM: pillar id per sorted point (-1 for padding)
    out_ref  : [P_pad, 4] f32 VMEM: resident accumulator, cols = (sx, sy, sz, n);
                                     cols 0:3 become the means on the last step.
    """
    i = pl.program_id(0)

    @pl.when(i == 0)
    def _init():
        out_ref[...] = jnp.zeros_like(out_ref)

    base = pl.multiple_of(base_ref[i], _PILLAR_ALIGN)
    xyz1 = xyz1_ref[...]                                     # [4, TN]
    inv = inv_ref[...]                                       # [1, TN]
    tn = xyz1.shape[1]

    # Narrow local one-hot over the pillar window [base, base + tpw).
    win_id = lax.broadcasted_iota(jnp.int32, (tpw, tn), 0) + base
    one_hot = (win_id == inv).astype(jnp.float32)            # [TPW, TN]

    # Fused sums + counts: single contraction over the point (lane) axis.
    partial = lax.dot_general(
        one_hot, xyz1,
        dimension_numbers=(((1,), (1,)), ((), ())),
        preferred_element_type=jnp.float32)                  # [TPW, 4]

    out_ref[pl.ds(base, tpw), :] = out_ref[pl.ds(base, tpw), :] + partial

    @pl.when(i == pl.num_programs(0) - 1)
    def _finalize():
        cnt = out_ref[:, 3:4]
        out_ref[:, 0:3] = out_ref[:, 0:3] / jnp.maximum(cnt, 1.0)


def _emit_features_kernel(pts_ref, mean_ref, coords_ref, feat_ref,
                          *, nf, vx, vy, ox, oy):
    """Emit lane-dense [F, TN] feature rows for one tile of original-order points.

    pts_ref    : [nf, TN]   f32  rows = points[:, 1:]  (x, y, z, extra...)
    mean_ref   : [3,  TN]   f32  per-point cluster mean (gathered outside)
    coords_ref : [2,  TN]   f32  host-computed integer pillar coords (cx, cy)
    feat_ref   : [nf+5, TN] f32  rows = [points[:,1:], f_cluster, f_center]
    """
    p = pts_ref[...]
    m = mean_ref[...]
    c = coords_ref[...]
    feat_ref[0:nf, :] = p                                    # raw point features
    feat_ref[nf:nf + 3, :] = p[0:3, :] - m                   # f_cluster
    feat_ref[nf + 3:nf + 4, :] = p[0:1, :] - (c[0:1, :] * vx + ox)   # f_center x
    feat_ref[nf + 4:nf + 5, :] = p[1:2, :] - (c[1:2, :] * vy + oy)   # f_center y


def _scatter_mean_pallas(xyz1_sorted, inv_sorted, tile_base, p_pad):
    num_tiles = xyz1_sorted.shape[1] // _TN_SCATTER
    kernel = functools.partial(_scatter_mean_kernel, tpw=_TPW)
    return pl.pallas_call(
        kernel,
        out_shape=jax.ShapeDtypeStruct((p_pad, 4), jnp.float32),
        grid_spec=pltpu.PrefetchScalarGridSpec(
            num_scalar_prefetch=1,
            grid=(num_tiles,),
            in_specs=[
                pl.BlockSpec((4, _TN_SCATTER), lambda i, base: (0, i)),
                pl.BlockSpec((1, _TN_SCATTER), lambda i, base: (0, i)),
            ],
            out_specs=pl.BlockSpec((p_pad, 4), lambda i, base: (0, 0)),
        ),
        compiler_params=pltpu.CompilerParams(
            dimension_semantics=("arbitrary",)),
    )(tile_base, xyz1_sorted, inv_sorted)


def _emit_features_pallas(ptsT, meanT, coordsT, vx, vy, ox, oy):
    nf, n_pad = ptsT.shape
    f = nf + 5
    num_tiles = n_pad // _TN_EMIT
    kernel = functools.partial(_emit_features_kernel, nf=nf,
                               vx=float(vx), vy=float(vy),
                               ox=float(ox), oy=float(oy))
    return pl.pallas_call(
        kernel,
        out_shape=jax.ShapeDtypeStruct((f, n_pad), jnp.float32),
        grid=(num_tiles,),
        in_specs=[
            pl.BlockSpec((nf, _TN_EMIT), lambda i: (0, i)),
            pl.BlockSpec((3, _TN_EMIT), lambda i: (0, i)),
            pl.BlockSpec((2, _TN_EMIT), lambda i: (0, i)),
        ],
        out_specs=pl.BlockSpec((f, _TN_EMIT), lambda i: (0, i)),
        compiler_params=pltpu.CompilerParams(
            dimension_semantics=("parallel",)),
    )(ptsT, meanT, coordsT)


def pillar_net_forward(points, voxel_size, pc_range):
    """JAX/Pallas equivalent of PillarNet.forward.

    points: [N, 1 + num_input_features] float32, column 0 = batch index.
    Returns (features, unq[:, [0, 2, 1]], unq_inv, grid_size[[1, 0]]).
    """
    voxel_size = np.asarray(voxel_size, dtype=np.float32)
    pc_range = np.asarray(pc_range, dtype=np.float32)
    grid_size = np.round((pc_range[3:] - pc_range[:3]) / voxel_size).astype(np.int64)

    pts = np.asarray(points, dtype=np.float32)
    d = pts.shape[1]                                    # 1 + num_input_features

    # ---- host glue: dynamic-shape mask filter + unique + sort ----
    # TODO(synk): mask filtering, torch.unique and the stable sort by pillar id
    # produce data-dependent shapes; they run on the host.
    coords_f = (pts[:, 1:4] - pc_range[:3]) / voxel_size
    mask = ((coords_f[:, 0] >= 0) & (coords_f[:, 0] < grid_size[0]) &
            (coords_f[:, 1] >= 0) & (coords_f[:, 1] < grid_size[1]))
    pts = pts[mask]
    coords = coords_f[mask].astype(np.int64)            # trunc toward zero (== .long())
    batch_idx = pts[:, 0].astype(np.int64)

    gx, gy = int(grid_size[0]), int(grid_size[1])
    keys = batch_idx * (gx * gy) + coords[:, 0] * gy + coords[:, 1]
    unq_keys, unq_inv = np.unique(keys, return_inverse=True)   # sorted, like torch.unique
    unq_inv = np.asarray(unq_inv).reshape(-1).astype(np.int32)
    b = unq_keys // (gx * gy)
    rem = unq_keys % (gx * gy)
    unq = np.stack([b, rem // gy, rem % gy], axis=1).astype(np.int32)   # (batch, x, y)

    n = pts.shape[0]
    n_pad = int(max(_TN_EMIT, -(-n // _TN_EMIT) * _TN_EMIT))   # multiple of both tile sizes

    # Sorted-by-pillar copies for the scatter-mean phase.
    perm = np.argsort(keys, kind="stable")
    inv_sorted = unq_inv[perm]
    xyz1_sorted = np.zeros((4, n_pad), np.float32)
    xyz1_sorted[0:3, :n] = pts[perm, 1:4].T
    xyz1_sorted[3, :n] = 1.0
    inv_sorted_pad = np.full((1, n_pad), -1, np.int32)          # -1 => padding, hits no column
    inv_sorted_pad[0, :n] = inv_sorted

    num_tiles1 = n_pad // _TN_SCATTER
    starts = np.arange(num_tiles1) * _TN_SCATTER
    tile_base = np.zeros((num_tiles1,), np.int32)
    valid = starts < n
    if n > 0:
        tile_base[valid] = (inv_sorted[starts[valid]] // _PILLAR_ALIGN) * _PILLAR_ALIGN
    p_pad = int(tile_base.max()) + _TPW                         # covers every window, 8-aligned

    # Original-order, transposed ([feature, point] lane-dense) arrays for phase 2.
    ptsT = np.zeros((d - 1, n_pad), np.float32)
    ptsT[:, :n] = pts[:, 1:].T
    coordsT = np.zeros((2, n_pad), np.float32)
    coordsT[:, :n] = coords[:, :2].T.astype(np.float32)
    inv_full = np.zeros((n_pad,), np.int32)
    inv_full[:n] = unq_inv

    # ---- Pallas phase 1: per-pillar mean via windowed one-hot scatter ----
    means = _scatter_mean_pallas(
        jnp.asarray(xyz1_sorted), jnp.asarray(inv_sorted_pad),
        jnp.asarray(tile_base), p_pad)                          # [p_pad, 4]

    # Broadcast means back to points (XLA gather between the two kernels).
    mean_per_point = jnp.take(means[:, 0:3], jnp.asarray(inv_full), axis=0)   # [n_pad, 3]
    meanT = jnp.transpose(mean_per_point)                                     # [3, n_pad]

    # ---- Pallas phase 2: lane-dense feature emission in original order ----
    featT = _emit_features_pallas(
        jnp.asarray(ptsT), meanT, jnp.asarray(coordsT),
        voxel_size[0], voxel_size[1],
        voxel_size[0] * 0.5 + pc_range[0],
        voxel_size[1] * 0.5 + pc_range[1])                      # [d-1+5, n_pad]

    features = jnp.transpose(featT[:, :n])                      # [n, d-1+5]

    # TODO(synk): PFNLayer stack (linear/BN/PReLU + scatter_max/mean) and
    # ME.SparseTensor construction of PillarFeatureNet are not implemented here;
    # this covers the PillarNet voxelization hot path.
    return (features,
            jnp.asarray(unq[:, [0, 2, 1]]),
            jnp.asarray(unq_inv),
            jnp.asarray(grid_size[[1, 0]].astype(np.int32)))


def _numpy_reference(points, voxel_size, pc_range):
    """Pure-NumPy transcription of the torch PillarNet.forward for verification."""
    voxel_size = np.asarray(voxel_size, dtype=np.float32)
    pc_range = np.asarray(pc_range, dtype=np.float32)
    grid_size = np.round((pc_range[3:] - pc_range[:3]) / voxel_size).astype(np.int64)
    pts = np.asarray(points, dtype=np.float32)
    coords_f = (pts[:, 1:4] - pc_range[:3]) / voxel_size
    mask = ((coords_f[:, 0] >= 0) & (coords_f[:, 0] < grid_size[0]) &
            (coords_f[:, 1] >= 0) & (coords_f[:, 1] < grid_size[1]))
    pts = pts[mask]
    coords = coords_f[mask].astype(np.int64)
    batch_idx = pts[:, 0:1].astype(np.int64)
    idx = np.concatenate([batch_idx, coords[:, :2]], axis=1)
    unq, unq_inv = np.unique(idx, axis=0, return_inverse=True)
    unq_inv = np.asarray(unq_inv).reshape(-1)
    p = unq.shape[0]
    sums = np.zeros((p, 3), np.float64)
    cnts = np.zeros((p, 1), np.float64)
    np.add.at(sums, unq_inv, pts[:, 1:4].astype(np.float64))
    np.add.at(cnts, unq_inv, 1.0)
    mean = (sums / cnts).astype(np.float32)
    f_cluster = pts[:, 1:4] - mean[unq_inv]
    pillar_center = (coords[:, :2].astype(np.float32) * voxel_size[:2]
                     + voxel_size[:2] / 2 + pc_range[:2])
    f_center = pts[:, 1:3] - pillar_center
    features = np.concatenate([pts[:, 1:], f_cluster, f_center], axis=-1)
    return features, unq[:, [0, 2, 1]].astype(np.int32), unq_inv, grid_size[[1, 0]]


if __name__ == "__main__":
    key = jax.random.PRNGKey(0)
    num_input_features = 4                      # x, y, z, intensity
    voxel_size = [0.2, 0.2, 8.0]
    pc_range = [-1.6, -1.6, -3.0, 1.6, 1.6, 5.0]   # -> 16 x 16 x 1 grid

    batch = 2
    n_pts = 64
    k1, k2, k3 = jax.random.split(key, 3)
    xy = jax.random.uniform(k1, (n_pts, 2), minval=-1.5, maxval=1.5)
    z = jax.random.uniform(k2, (n_pts, 1), minval=-2.0, maxval=4.0)
    intensity = jax.random.uniform(k3, (n_pts, 1))
    batch_col = jnp.repeat(jnp.arange(batch, dtype=jnp.float32),
                           n_pts // batch)[:, None]
    points = jnp.concatenate([batch_col, xy, z, intensity], axis=1)   # [64, 5]

    feats, unq, unq_inv, grid_hw = pillar_net_forward(points, voxel_size, pc_range)
    jax.block_until_ready(feats)

    # verify against NumPy reference
    ref_feats, ref_unq, ref_inv, ref_grid = _numpy_reference(
        np.asarray(points), voxel_size, pc_range)
    assert feats.shape == ref_feats.shape, "feature shape mismatch"
    assert np.allclose(np.asarray(feats), ref_feats, atol=1e-4), "feature mismatch"
    assert np.array_equal(np.asarray(unq), ref_unq), "unq mismatch"
    assert np.array_equal(np.asarray(unq_inv), ref_inv.astype(np.int32)), "unq_inv mismatch"
    assert np.array_equal(np.asarray(grid_hw), ref_grid.astype(np.int32)), "grid mismatch"

    print("KERNEL_OK")
</pallas_src>

<mosaic_0001>
module attributes {stable_mosaic.version = 11 : i64} {
  func.func @_scatter_mean_kernel(%arg0: i32, %arg1: memref<4xi32, #tpu.memory_space<smem>>, %arg2: memref<4x512xf32, #tpu.memory_space<vmem>>, %arg3: memref<1x512xi32, #tpu.memory_space<vmem>>, %arg4: memref<520x4xf32, #tpu.memory_space<vmem>>) attributes {dimension_semantics = [#tpu.dimension_semantics<arbitrary>], iteration_bounds = array<i64: 4>, scalar_prefetch = 1 : i64, scratch_operands = 0 : i64, tpu.core_type = #tpu.core_type<tc>, window_params = [{transform_indices = @transform_0, window_bounds = array<i64: 4, 512>}, {transform_indices = @transform_1, window_bounds = array<i64: 1, 512>}, {pipeline_mode = #tpu.pipeline_mode<synchronous>, transform_indices = @transform_2, window_bounds = array<i64: 520, 4>}]} {
    %c0_i32 = arith.constant 0 : i32
    %0 = arith.cmpi eq, %arg0, %c0_i32 : i32
    %1 = arith.extui %0 : i1 to i32
    %c0_i32_0 = arith.constant 0 : i32
    %2 = arith.cmpi ne, %1, %c0_i32_0 : i32
    scf.if %2 {
      %cst_7 = arith.constant 0.000000e+00 : f32
      %24 = vector.broadcast %cst_7 : f32 to vector<520x4xf32>
      %c0_8 = arith.constant 0 : index
      %c0_9 = arith.constant 0 : index
      %25 = vector.load %arg4[%c0_8, %c0_9] : memref<520x4xf32, #tpu.memory_space<vmem>>, vector<520x4xf32>
      tpu.vector_store %arg4[%c0_8, %c0_9], %24 {strides = array<i32>} : memref<520x4xf32, #tpu.memory_space<vmem>>, vector<520x4xf32>,
    } else {
    }
    %3 = arith.index_cast %arg0 : i32 to index
    %4 = memref.load %arg1[%3] : memref<4xi32, #tpu.memory_space<smem>>
    %5 = tpu.assume_multiple %4, 8 : i32
    %c0 = arith.constant 0 : index
    %c0_1 = arith.constant 0 : index
    %6 = vector.load %arg2[%c0, %c0_1] : memref<4x512xf32, #tpu.memory_space<vmem>>, vector<4x512xf32>
    %c0_2 = arith.constant 0 : index
    %c0_3 = arith.constant 0 : index
    %7 = vector.load %arg3[%c0_2, %c0_3] : memref<1x512xi32, #tpu.memory_space<vmem>>, vector<1x512xi32>
    %8 = tpu.iota {dimensions = array<i32: 0>} : vector<520x512xi32>
    %9 = vector.broadcast %5 : i32 to vector<520x512xi32>
    %10 = arith.addi %8, %9 : vector<520x512xi32>
    %11 = vector.broadcast %7 : vector<1x512xi32> to vector<520x512xi32>
    %12 = arith.cmpi eq, %10, %11 : vector<520x512xi32>
    %13 = arith.extui %12 : vector<520x512xi1> to vector<520x512xi32>
    %14 = arith.sitofp %13 : vector<520x512xi32> to vector<520x512xf32>
    %cst = arith.constant dense<0.000000e+00> : vector<520x4xf32>
    %15 = tpu.matmul %14, %6, %cst {dimension_numbers = #tpu.dot_dimension_numbers<[1], [1], [0], [0], [0, 0, 1, 0], [], []>} : vector<520x512xf32>, vector<4x512xf32>, vector<520x4xf32> -> vector<520x4xf32>
    %16 = arith.index_cast %5 : i32 to index
    %c0_4 = arith.constant 0 : index
    %17 = vector.load %arg4[%16, %c0_4] : memref<520x4xf32, #tpu.memory_space<vmem>>, vector<520x4xf32>
    %18 = arith.addf %17, %15 : vector<520x4xf32>
    %19 = arith.index_cast %5 : i32 to index
    %c0_5 = arith.constant 0 : index
    %20 = vector.load %arg4[%19, %c0_5] : memref<520x4xf32, #tpu.memory_space<vmem>>, vector<520x4xf32>
    tpu.vector_store %arg4[%19, %c0_5], %18 {strides = array<i32>} : memref<520x4xf32, #tpu.memory_space<vmem>>, vector<520x4xf32>,
    %c3_i32 = arith.constant 3 : i32
    %21 = arith.cmpi eq, %arg0, %c3_i32 : i32
    %22 = arith.extui %21 : i1 to i32
    %c0_i32_6 = arith.constant 0 : i32
    %23 = arith.cmpi ne, %22, %c0_i32_6 : i32
    scf.if %23 {
      %c0_7 = arith.constant 0 : index
      %c3 = arith.constant 3 : index
      %24 = vector.load %arg4[%c0_7, %c3] : memref<520x4xf32, #tpu.memory_space<vmem>>, vector<520x1xf32>
      %c0_8 = arith.constant 0 : index
      %c0_9 = arith.constant 0 : index
      %25 = vector.load %arg4[%c0_8, %c0_9] : memref<520x4xf32, #tpu.memory_space<vmem>>, vector<520x3xf32>
      %cst_10 = arith.constant 1.000000e+00 : f32
      %26 = vector.broadcast %cst_10 : f32 to vector<520x1xf32>
      %27 = arith.maximumf %24, %26 : vector<520x1xf32>
      %28 = vector.broadcast %27 : vector<520x1xf32> to vector<520x3xf32>
      %29 = arith.divf %25, %28 : vector<520x3xf32>
      %c0_11 = arith.constant 0 : index
      %c0_12 = arith.constant 0 : index
      %30 = vector.load %arg4[%c0_11, %c0_12] : memref<520x4xf32, #tpu.memory_space<vmem>>, vector<520x3xf32>
      tpu.vector_store %arg4[%c0_11, %c0_12], %29 {strides = array<i32>} : memref<520x4xf32, #tpu.memory_space<vmem>>, vector<520x3xf32>,
    } else {
    }
    return
  }
  func.func @transform_0(%arg0: i32, %arg1: memref<4xi32, #tpu.memory_space<smem>>) -> (i32, i32) {
    %c0_i32 = arith.constant 0 : i32
    %c0_i32_0 = arith.constant 0 : i32
    return %c0_i32, %arg0 : i32, i32
  }
  func.func @transform_1(%arg0: i32, %arg1: memref<4xi32, #tpu.memory_space<smem>>) -> (i32, i32) {
    %c0_i32 = arith.constant 0 : i32
    %c0_i32_0 = arith.constant 0 : i32
    return %c0_i32, %arg0 : i32, i32
  }
  func.func @transform_2(%arg0: i32, %arg1: memref<4xi32, #tpu.memory_space<smem>>) -> (i32, i32) {
    %c0_i32 = arith.constant 0 : i32
    %c0_i32_0 = arith.constant 0 : i32
    %c0_i32_1 = arith.constant 0 : i32
    return %c0_i32, %c0_i32_0 : i32, i32
  }
}

</mosaic_0001>

<bundles_post_ra>
// kernel: tpu_custom_call.1
= control target key start
LH: loop header
LB: loop body
LE: loop exit
PB: predicated region body
PF: predicated region fallthrough
CT: control target
= control target key end

     0   :  { %s5828_s0 = inlined_call_operand.hbm [shape: s32[4], index: 0, kind: input, shape index: {}]   ;;  %s5829_s1 = inlined_call_operand.hbm [shape: f32[4,2048], index: 1, kind: input, shape index: {}]   ;;  %s5830_s2 = inlined_call_operand.hbm [shape: s32[1,2048], index: 2, kind: input, shape index: {}]   ;;  %s5831_s3 = inlined_call_operand.vmem [shape: f32[520,4], index: 3, kind: output, shape index: {}]  }
   0x1   :  { %s3615_s14 = scalar_lea.hbm %s5828_s0, 16 }
   0x2   :  { %p3616_p0 = scmp.ne.s32.totalorder %s5828_s0, %s3615_s14  ;;  %p3619_p1 = scmp.lt.u32.totalorder %s3615_s14, %s5828_s0 }
   0x4   :  { %p3621_p2 = pnand %p3619_p1, %p3616_p0 }
   0x6   :  { %3624 = shalt.err (!%p3621_p2)  }
   0x7   :  { %s3727_s19 = smov [#allocation3]  }
   0x8   :  { %9 = dma.hbm_to_smem %s5828_s0, 16, %s3727_s19, [#allocation2] }
   0x9   :  { %3701 = dma.done.wait [#allocation2], 16 }
   0xa   :  { %3702 = vsyncadd [#allocation2], 4294967280 }
   0xb   :  { %11 = sfence }
   0xc   :  { %12 = vsyncpa [#allocation5], 0 }
   0xd   :  { %14 = vsyncpa [#allocation5 + $0x1], 0 }
   0xe   :  { %15 = vsyncpa [#allocation7], 0 }
   0xf   :  { %17 = vsyncpa [#allocation7 + $0x1], 0  ;;  %s3765_s22 = smov 0   ;;  %s3767_s23 = smov 0  }
  0x10   :  { %s3769_s24 = smov 0   ;;  %s3771_s25 = smov 0  }
  0x11 LB: > { %s3784_s0 = sadd.s32 4294967295, %s3725_s25   ;;  %s3787_s26 = sadd.s32 1, %s3725_s25   ;;  %s3725_s25 = sphi %s3771_s25, %s5885_s25   ;;  %s3721_s24 = sphi %s3769_s24, %s5884_s24   ;;  %s3717_s23 = sphi %s3767_s23, %s5883_s23   ;;  %s3713_s22 = sphi %s3765_s22, %s5882_s22  }
  0x12   : > { %s27_s27 = ssub.s32 %s3725_s25, %s3787_s26  ;;  %s30_s28 = sadd.s32 1, %s3721_s24 }
  0x13   : > { %p28_p3 = scmp.eq.s32.totalorder %s27_s27, 0  ;;  %p37_p4 = scmp.ne.s32.totalorder %s3721_s24, %s3717_s23 }
  0x14   : > { %p38_p5 = scmp.eq.s32.totalorder %s3725_s25, 0  ;;  %p43_p6 = scmp.ne.s32.totalorder %s3717_s23, %s3713_s22 }
  0x15   : > { %s3797_s29 = scalar_select %p28_p3, %s3721_s24, %s30_s28  }
  0x16   : > { %p39_p7 = por %p38_p5, %p37_p4  ;;  %p44_p8 = scmp.eq.s32.totalorder %s3784_s0, 0 }
  0x17   : > { %p3444_p9 = scmp.lt.s32.totalorder %s3725_s25, 4  ;;  %s3806_s4 = sand.u32 1, %s3721_s24  }
  0x18   : > { %p3801_p10 = por %p44_p8, %p43_p6  ;;  %s2898_s5 = sshll.u32 %s3806_s4, 4 }
  0x19   : > { %s3431_s6 = sshll.u32 %s3725_s25, 8  ;;  %s118_s10 = scalar_lea.vmem [#allocation4], %s2898_s5 }
  0x1a   : > { %s5847_s30 = scalar_select %p3801_p10, 1, 0 }
  0x1b   : > { %s3813_s9 = scalar_lea.hbm %s5829_s1, %s3431_s6  ;;  %s126_s11 = sshll.u32 %s118_s10, 4  ;;  %s3815_s11 = int_to_ptr.vmem [resolvable:$true] %s126_s11 }
  0x1c   : > { %p3817_p11 = pnand %p3444_p9, %p39_p7  ;;  %s115_s13 = scalar_lea.sflag [#allocation5], %s3806_s4 }
  0x1d   : > { %s3625_s14 = scalar_lea.hbm %s3813_s9, 256  ;;  %s3630_s17 = scalar_lea.hbm %s5829_s1, 1024 }
  0x1e   : > { %p3626_p0 = scmp.ne.s32.totalorder %s3813_s9, %s3625_s14  ;;  %p3627_p1 = pneg %p3817_p11 }
  0x1f   : > { %p3631_p4 = scmp.lt.u32.totalorder %s3813_s9, %s5829_s1  ;;  %p3632_p5 = scmp.lt.u32.totalorder %s3630_s17, %s3625_s14 }
  0x20   : > { %p3628_p2 = pnand %p3627_p1, %p3626_p0  ;;  %p3634_p7 = scmp.lt.u32.totalorder %s3625_s14, %s3813_s9 }
  0x21   : > { %p3633_p6 = por %p3632_p5, %p3631_p4 }
  0x22   : > { %p3629_p3 = pneg %p3628_p2 }
  0x23   : > { %p3635_p8 = por %p3634_p7, %p3633_p6 }
  0x25   : > { %p3636_p9 = pnand %p3635_p8, %p3629_p3 }
  0x27   : > { %3639 = shalt.err (!%p3636_p9)
}
  0x28   : > { %s3640_s20 = scalar_lea.vmem %s3815_s11, 256  ;;  %s3728_s21 = smov [#allocation4]  }
  0x29   : > { %p3641_p0 = scmp.ne.s32.totalorder %s3815_s11, %s3640_s20  ;;  %s3645_s22 = sshll.u32 %s3728_s21, 4  ;;  %s3646_s22 = int_to_ptr.vmem [resolvable:$false] %s3645_s22 }
  0x2a   : > { %s3647_s27 = scalar_lea.vmem %s3646_s22, 512  ;;  %p3648_p13 = scmp.lt.s32.totalorder %s3815_s11, %s3646_s22 }
  0x2b   : > { %p3643_p2 = pnand %p3641_p0, %p3627_p1  ;;  %p3649_p4 = scmp.lt.s32.totalorder %s3647_s27, %s3640_s20 }
  0x2d   : > { %p3644_p12 = pneg %p3643_p2  ;;  %p3650_p5 = por %p3649_p4, %p3648_p13 }
  0x2f   : > { %p3651_p6 = pnand %p3650_p5, %p3644_p12 }
  0x31   : > { %3654 = shalt.err (!%p3651_p6)
}
  0x32   : > { %3440 = dma.hbm_to_vmem [thread:$0]  (!%p3817_p11), %s3813_s9, 256, %s3815_s11, %s115_s13  }
  0x33   : > { %p5849_p3 = scmp.lt.s32.totalorder %s3725_s25, 5  ;;  %p5850_p7 = scmp.ge.s32.totalorder %s3725_s25, 1 }
  0x34   : > { %s2901_s5 = sshll.u32 %s3806_s4, 2  ;;  %s3432_s6 = sshll.u32 %s3725_s25, 6 }
  0x35   : > { %p3853_p8 = pnand %p5850_p7, %p5849_p3  ;;  %s3862_s10 = scalar_lea.hbm %s5830_s2, %s3432_s6 }
  0x36   : > { %s137_s14 = scalar_lea.vmem [#allocation6], %s2901_s5  ;;  %s134_s9 = scalar_lea.sflag [#allocation7], %s3806_s4 }
  0x37   : > { %s5851_s28 = scalar_select %p3853_p8, 1, 0 }
  0x38   : > { %s145_s15 = sshll.u32 %s137_s14, 4  ;;  %s3655_s11 = scalar_lea.hbm %s3862_s10, 64  ;;  %s146_s15 = int_to_ptr.vmem [resolvable:$true] %s145_s15 }
  0x39   : > { %p3656_p12 = scmp.ne.s32.totalorder %s3862_s10, %s3655_s11  ;;  %s3660_s16 = scalar_lea.hbm %s5830_s2, 256 }
  0x3a   : > { %p3661_p0 = scmp.lt.u32.totalorder %s3862_s10, %s5830_s2  ;;  %p3662_p2 = scmp.lt.u32.totalorder %s3660_s16, %s3655_s11 }
  0x3b   : > { %p3658_p13 = pnand %p3656_p12, %p3627_p1  ;;  %p3664_p5 = scmp.lt.u32.totalorder %s3655_s11, %s3862_s10 }
  0x3c   : > { %p3663_p4 = por %p3662_p2, %p3661_p0 }
  0x3d   : > { %p3659_p9 = pneg %p3658_p13 }
  0x3e   : > { %p3665_p6 = por %p3664_p5, %p3663_p4 }
  0x40   : > { %p3666_p3 = pnand %p3665_p6, %p3659_p9 }
  0x42   : > { %3669 = shalt.err (!%p3666_p3)
}
  0x43   : > { %s3670_s4 = scalar_lea.vmem %s146_s15, 64  ;;  %s3729_s19 = smov [#allocation6]  }
  0x44   : > { %p3671_p7 = scmp.ne.s32.totalorder %s146_s15, %s3670_s4  ;;  %s3675_s20 = sshll.u32 %s3729_s19, 4  ;;  %s3676_s20 = int_to_ptr.vmem [resolvable:$false] %s3675_s20 }
  0x45   : > { %s3677_s21 = scalar_lea.vmem %s3676_s20, 128  ;;  %p3678_p10 = scmp.lt.s32.totalorder %s146_s15, %s3676_s20 }
  0x46   : > { %p3673_p12 = pnand %p3671_p7, %p3627_p1  ;;  %p3679_p8 = scmp.lt.s32.totalorder %s3677_s21, %s3670_s4 }
  0x48   : > { %p3674_p13 = pneg %p3673_p12  ;;  %p3680_p0 = por %p3679_p8, %p3678_p10 }
  0x4a   : > { %p3681_p2 = pnand %p3680_p0, %p3674_p13 }
  0x4c   : > { %3684 = shalt.err (!%p3681_p2)
}
  0x4d   : > { %3443 = dma.hbm_to_vmem [thread:$0]  (!%p3817_p11), %s3862_s10, 64, %s146_s15, %s134_s9  }
  0x4e   : > { %p5852_p9 = scmp.ne.s32.totalorder %s5851_s28, 0 }
  0x4f   : > { %s156_s22 = sand.u32 (!%p5852_p9), 1, %s3717_s23   ;;  %p5853_p1 = scmp.ne.s32.totalorder (!%p5852_p9), %s5847_s30, 0 }
  0x50   : > { %154 = sbr.rel (%p5852_p9) target bundleno = 890 (0x37a), region = 28  ;;  %s2905_s27 = sshll.u32 (!%p5852_p9), %s156_s22, 4 }
  0x51   : > { %s157_s5 = scalar_lea.sflag (!%p5852_p9), [#allocation5], %s156_s22  ;;  %s3887_s6 = scalar_lea.vmem (!%p5852_p9), [#allocation4], %s2905_s27 }
  0x57   : > { %3704 = dma.done.wait (%p5853_p1), %s157_s5, 256  }
  0x58   : > { %3706 = vsyncadd (%p5853_p1), %s157_s5, 4294967040  ;;  %s2906_s7 = sshll.u32 %s156_s22, 2  ;;  %s166_s12 = scalar_lea.sflag [#allocation7], %s156_s22 }
  0x59   : > { %s3893_s8 = scalar_lea.vmem [#allocation6], %s2906_s7 }
  0x5a   : > { %3708 = dma.done.wait (%p5853_p1), %s166_s12, 64  }
  0x5b   : > { %3710 = vsyncadd (%p5853_p1), %s166_s12, 4294967232  ;;  %p2907_p10 = scmp.ne.s32.totalorder %s3784_s0, 0 }
  0x5c   : > { %vm196_vm0 = vcmask (!%p2907_p10), 31744   ;;  %v3730_v0 = vmov (!%p2907_p10), 0.0  }
  0x5d   : > { %195 = sbr.rel (%p2907_p10) target bundleno = 126 (0x7e), region = 40  ;;  %197 = vst.msk [vmem:[%s5831_s3] sm:$0xff] (!%p2907_p10), %vm196_vm0, %v3730_v0  ;;  %198 = vst.msk [vmem:[%s5831_s3 + $0x8] sm:$0xff] (!%p2907_p10), %vm196_vm0, %v3730_v0 }
  0x5e   : > { %199 = vst.msk [vmem:[%s5831_s3 + $0x10] sm:$0xff] (!%p2907_p10), %vm196_vm0, %v3730_v0  ;;  %200 = vst.msk [vmem:[%s5831_s3 + $0x18] sm:$0xff] (!%p2907_p10), %vm196_vm0, %v3730_v0 }
  0x5f   : > { %201 = vst.msk [vmem:[%s5831_s3 + $0x20] sm:$0xff] (!%p2907_p10), %vm196_vm0, %v3730_v0  ;;  %202 = vst.msk [vmem:[%s5831_s3 + $0x28] sm:$0xff] (!%p2907_p10), %vm196_vm0, %v3730_v0 }
  0x60   : > { %203 = vst.msk [vmem:[%s5831_s3 + $0x30] sm:$0xff] (!%p2907_p10), %vm196_vm0, %v3730_v0  ;;  %204 = vst.msk [vmem:[%s5831_s3 + $0x38] sm:$0xff] (!%p2907_p10), %vm196_vm0, %v3730_v0 }
  0x61   : > { %205 = vst.msk [vmem:[%s5831_s3 + $0x40] sm:$0xff] (!%p2907_p10), %vm196_vm0, %v3730_v0  ;;  %206 = vst.msk [vmem:[%s5831_s3 + $0x48] sm:$0xff] (!%p2907_p10), %vm196_vm0, %v3730_v0 }
  0x62   : > { %207 = vst.msk [vmem:[%s5831_s3 + $0x50] sm:$0xff] (!%p2907_p10), %vm196_vm0, %v3730_v0  ;;  %208 = vst.msk [vmem:[%s5831_s3 + $0x58] sm:$0xff] (!%p2907_p10), %vm196_vm0, %v3730_v0 }
  0x63   : > { %209 = vst.msk [vmem:[%s5831_s3 + $0x60] sm:$0xff] (!%p2907_p10), %vm196_vm0, %v3730_v0  ;;  %210 = vst.msk [vmem:[%s5831_s3 + $0x68] sm:$0xff] (!%p2907_p10), %vm196_vm0, %v3730_v0 }
  0x64   : > { %211 = vst.msk [vmem:[%s5831_s3 + $0x70] sm:$0xff] %vm196_vm0, %v3730_v0  ;;  %212 = vst.msk [vmem:[%s5831_s3 + $0x78] sm:$0xff] %vm196_vm0, %v3730_v0 }
  0x65   : > { %213 = vst.msk [vmem:[%s5831_s3 + $0x80] sm:$0xff] %vm196_vm0, %v3730_v0  ;;  %214 = vst.msk [vmem:[%s5831_s3 + $0x88] sm:$0xff] %vm196_vm0, %v3730_v0 }
  0x66   : > { %215 = vst.msk [vmem:[%s5831_s3 + $0x90] sm:$0xff] %vm196_vm0, %v3730_v0  ;;  %216 = vst.msk [vmem:[%s5831_s3 + $0x98] sm:$0xff] %vm196_vm0, %v3730_v0 }
  0x67   : > { %217 = vst.msk [vmem:[%s5831_s3 + $0xa0] sm:$0xff] %vm196_vm0, %v3730_v0  ;;  %218 = vst.msk [vmem:[%s5831_s3 + $0xa8] sm:$0xff] %vm196_vm0, %v3730_v0 }
  0x68   : > { %219 = vst.msk [vmem:[%s5831_s3 + $0xb0] sm:$0xff] %vm196_vm0, %v3730_v0  ;;  %220 = vst.msk [vmem:[%s5831_s3 + $0xb8] sm:$0xff] %vm196_vm0, %v3730_v0 }
  0x69   : > { %221 = vst.msk [vmem:[%s5831_s3 + $0xc0] sm:$0xff] %vm196_vm0, %v3730_v0  ;;  %222 = vst.msk [vmem:[%s5831_s3 + $0xc8] sm:$0xff] %vm196_vm0, %v3730_v0 }
  0x6a   : > { %223 = vst.msk [vmem:[%s5831_s3 + $0xd0] sm:$0xff] %vm196_vm0, %v3730_v0  ;;  %224 = vst.msk [vmem:[%s5831_s3 + $0xd8] sm:$0xff] %vm196_vm0, %v3730_v0 }
  0x6b   : > { %225 = vst.msk [vmem:[%s5831_s3 + $0xe0] sm:$0xff] %vm196_vm0, %v3730_v0  ;;  %226 = vst.msk [vmem:[%s5831_s3 + $0xe8] sm:$0xff] %vm196_vm0, %v3730_v0 }
  0x6c   : > { %227 = vst.msk [vmem:[%s5831_s3 + $0xf0] sm:$0xff] %vm196_vm0, %v3730_v0  ;;  %228 = vst.msk [vmem:[%s5831_s3 + $0xf8] sm:$0xff] %vm196_vm0, %v3730_v0 }
  0x6d   : > { %229 = vst.msk [vmem:[%s5831_s3 + $0x100] sm:$0xff] %vm196_vm0, %v3730_v0  ;;  %230 = vst.msk [vmem:[%s5831_s3 + $0x108] sm:$0xff] %vm196_vm0, %v3730_v0 }
  0x6e   : > { %231 = vst.msk [vmem:[%s5831_s3 + $0x110] sm:$0xff] %vm196_vm0, %v3730_v0  ;;  %232 = vst.msk [vmem:[%s5831_s3 + $0x118] sm:$0xff] %vm196_vm0, %v3730_v0 }
  0x6f   : > { %233 = vst.msk [vmem:[%s5831_s3 + $0x120] sm:$0xff] %vm196_vm0, %v3730_v0  ;;  %234 = vst.msk [vmem:[%s5831_s3 + $0x128] sm:$0xff] %vm196_vm0, %v3730_v0 }
  0x70   : > { %235 = vst.msk [vmem:[%s5831_s3 + $0x130] sm:$0xff] %vm196_vm0, %v3730_v0  ;;  %236 = vst.msk [vmem:[%s5831_s3 + $0x138] sm:$0xff] %vm196_vm0, %v3730_v0 }
  0x71   : > { %237 = vst.msk [vmem:[%s5831_s3 + $0x140] sm:$0xff] %vm196_vm0, %v3730_v0  ;;  %238 = vst.msk [vmem:[%s5831_s3 + $0x148] sm:$0xff] %vm196_vm0, %v3730_v0 }
  0x72   : > { %239 = vst.msk [vmem:[%s5831_s3 + $0x150] sm:$0xff] %vm196_vm0, %v3730_v0  ;;  %240 = vst.msk [vmem:[%s5831_s3 + $0x158] sm:$0xff] %vm196_vm0, %v3730_v0 }
  0x73   : > { %241 = vst.msk [vmem:[%s5831_s3 + $0x160] sm:$0xff] %vm196_vm0, %v3730_v0  ;;  %242 = vst.msk [vmem:[%s5831_s3 + $0x168] sm:$0xff] %vm196_vm0, %v3730_v0 }
  0x74   : > { %243 = vst.msk [vmem:[%s5831_s3 + $0x170] sm:$0xff] %vm196_vm0, %v3730_v0  ;;  %244 = vst.msk [vmem:[%s5831_s3 + $0x178] sm:$0xff] %vm196_vm0, %v3730_v0 }
  0x75   : > { %245 = vst.msk [vmem:[%s5831_s3 + $0x180] sm:$0xff] %vm196_vm0, %v3730_v0  ;;  %246 = vst.msk [vmem:[%s5831_s3 + $0x188] sm:$0xff] %vm196_vm0, %v3730_v0 }
  0x76   : > { %247 = vst.msk [vmem:[%s5831_s3 + $0x190] sm:$0xff] %vm196_vm0, %v3730_v0  ;;  %248 = vst.msk [vmem:[%s5831_s3 + $0x198] sm:$0xff] %vm196_vm0, %v3730_v0 }
  0x77   : > { %249 = vst.msk [vmem:[%s5831_s3 + $0x1a0] sm:$0xff] %vm196_vm0, %v3730_v0  ;;  %250 = vst.msk [vmem:[%s5831_s3 + $0x1a8] sm:$0xff] %vm196_vm0, %v3730_v0 }
  0x78   : > { %251 = vst.msk [vmem:[%s5831_s3 + $0x1b0] sm:$0xff] %vm196_vm0, %v3730_v0  ;;  %252 = vst.msk [vmem:[%s5831_s3 + $0x1b8] sm:$0xff] %vm196_vm0, %v3730_v0 }
  0x79   : > { %253 = vst.msk [vmem:[%s5831_s3 + $0x1c0] sm:$0xff] %vm196_vm0, %v3730_v0  ;;  %254 = vst.msk [vmem:[%s5831_s3 + $0x1c8] sm:$0xff] %vm196_vm0, %v3730_v0 }
  0x7a   : > { %255 = vst.msk [vmem:[%s5831_s3 + $0x1d0] sm:$0xff] %vm196_vm0, %v3730_v0  ;;  %256 = vst.msk [vmem:[%s5831_s3 + $0x1d8] sm:$0xff] %vm196_vm0, %v3730_v0 }
  0x7b   : > { %257 = vst.msk [vmem:[%s5831_s3 + $0x1e0] sm:$0xff] %vm196_vm0, %v3730_v0  ;;  %258 = vst.msk [vmem:[%s5831_s3 + $0x1e8] sm:$0xff] %vm196_vm0, %v3730_v0 }
  0x7c   : > { %259 = vst.msk [vmem:[%s5831_s3 + $0x1f0] sm:$0xff] %vm196_vm0, %v3730_v0  ;;  %260 = vst.msk [vmem:[%s5831_s3 + $0x1f8] sm:$0xff] %vm196_vm0, %v3730_v0 }
  0x7d   : > { %261 = vst.msk [vmem:[%s5831_s3 + $0x200] sm:$0xff] %vm196_vm0, %v3730_v0 }
  0x7e PF: > { %v263_v1 = vld [vmem:[%s3887_s6] sm:$0xff]  ;;  %v264_v2 = vld [vmem:[%s3887_s6 + $0x8] sm:$0xff]  ;;  %s4228_s30 = sld [smem:[#allocation3 + %s3784_s0]]  ;;  %v266_v3 = vlaneseq  ;;  %v3731_v23 = vmov 1.0   ;;  %p3428_p11 = scmp.ne.s32.totalorder %s3784_s0, 3 }
  0x7f   : > { %v1196_v4 = vcombine.high %v263_v1, %v263_v1  ;;  %v1197_v5 = vcombine.high %v264_v2, %v264_v2  ;;  %v265_v7 = vld [vmem:[%s3893_s8] sm:$0xf] }
  0x80   : > { %v4230_v6 = vshrl.u32 %v266_v3, 7 }
  0x81   : > { %1200 = vmatprep.subr.mxu0 %v1196_v4  ;;  %1590 = vmatprep.subr.mxu1 %v1197_v5 }
  0x82   : > { %1201 = vmatpush1.xpose.msra.mxu0 %v263_v1  ;;  %1591 = vmatpush1.xpose.msra.mxu1 %v264_v2  ;;  %v404_v8 = vsub.s32 1, %v4230_v6  ;;  %v412_v9 = vsub.s32 3, %v4230_v6  ;;  %v400_v10 = vsub.s32 0, %v4230_v6  ;;  %v408_v11 = vsub.s32 2, %v4230_v6 }
  0x83   : > { %v268_v12 = vadd.s32 8, %v4230_v6  ;;  %v269_v13 = vadd.s32 16, %v4230_v6  ;;  %v270_v22 = vadd.s32 24, %v4230_v6  ;;  %v271_v25 = vadd.s32 32, %v4230_v6 }
  0x84   : > { %v4240_v14 = vstv %s4228_s30  ;;  %v4242_v15 = vrot.slane %v265_v7, %v404_v8  ;;  %v4244_v16 = vrot.slane %v265_v7, %v412_v9  ;;  %v4246_v17 = vrot.slane %v265_v7, %v400_v10  ;;  %s4789_s9 = scalar_lea.vmem %s5831_s3, %s4228_s30 }
  0x85   : > { %v333_v18 = vadd.s32 %v4240_v14, %v4230_v6  ;;  %v4250_v19 = vrot.slane %v265_v7, %v408_v11  ;;  %v334_v20 = vadd.s32 %v4240_v14, %v268_v12  ;;  %v335_v21 = vadd.s32 %v4240_v14, %v269_v13 }
  0x86   : > { %v336_v24 = vadd.s32 %v4240_v14, %v270_v22  ;;  %v337_v26 = vadd.s32 %v4240_v14, %v271_v25  ;;  %v272_v27 = vadd.s32 40, %v4230_v6  ;;  %v273_v29 = vadd.s32 48, %v4230_v6 }
  0x87   : > { %vm415_vm1 = vcmp.eq.s32.totalorder %v333_v18, %v4242_v15  ;;  %vm417_vm2 = vcmp.eq.s32.totalorder %v333_v18, %v4244_v16  ;;  %vm414_vm3 = vcmp.eq.s32.totalorder %v333_v18, %v4246_v17  ;;  %vm416_vm4 = vcmp.eq.s32.totalorder %v333_v18, %v4250_v19 }
  0x88   : > { %3168 = vmatprep.mubr.msk.f32.mxu0 %vm415_vm1, %v3731_v23  ;;  %3298 = vmatprep.mubr.msk.f32.mxu1 %vm417_vm2, %v3731_v23  ;;  %vm419_vm5 = vcmp.eq.s32.totalorder %v334_v20, %v4242_v15  ;;  %vm421_vm6 = vcmp.eq.s32.totalorder %v334_v20, %v4244_v16  ;;  %vm418_vm7 = vcmp.eq.s32.totalorder %v334_v20, %v4246_v17  ;;  %v274_v31 = vadd.s32 56, %v4230_v6 }
  0x89   : > { %3169 = vmatmul.mubr.msk.f32.vlgmr.msra.gmra.mrb[0].mxu0 %vm414_vm3, %v3731_v23  ;;  %3299 = vmatmul.mubr.msk.f32.vlgmr.msra.gmra.mrb[0].mxu1 %vm416_vm4, %v3731_v23  ;;  %vm420_vm8 = vcmp.eq.s32.totalorder %v334_v20, %v4250_v19  ;;  %vm423_vm9 = vcmp.eq.s32.totalorder %v335_v21, %v4242_v15  ;;  %vm425_vm10 = vcmp.eq.s32.totalorder %v335_v21, %v4244_v16  ;;  %v275_v33 = vadd.s32 64, %v4230_v6 }
  0x8a   : > { %3170 = vmatprep.mubr.msk.f32.mxu0 %vm419_vm5, %v3731_v23  ;;  %3300 = vmatprep.mubr.msk.f32.mxu1 %vm421_vm6, %v3731_v23  ;;  %vm422_vm11 = vcmp.eq.s32.totalorder %v335_v21, %v4246_v17  ;;  %vm424_vm12 = vcmp.eq.s32.totalorder %v335_v21, %v4250_v19  ;;  %vm427_vm13 = vcmp.eq.s32.totalorder %v336_v24, %v4242_v15  ;;  %v276_v35 = vadd.s32 72, %v4230_v6 }
  0x8b   : > { %vm429_vm14 = vcmp.eq.s32.totalorder %v336_v24, %v4244_v16  ;;  %vm426_vm15 = vcmp.eq.s32.totalorder %v336_v24, %v4246_v17  ;;  %vm428_vm0 = vcmp.eq.s32.totalorder %v336_v24, %v4250_v19  ;;  %vm431_vm1 = vcmp.eq.s32.totalorder %v337_v26, %v4242_v15 }
  0x8c   : > { %vm433_vm2 = vcmp.eq.s32.totalorder %v337_v26, %v4244_v16  ;;  %v338_v28 = vadd.s32 %v4240_v14, %v272_v27  ;;  %vm430_vm3 = vcmp.eq.s32.totalorder %v337_v26, %v4246_v17  ;;  %vm432_vm4 = vcmp.eq.s32.totalorder %v337_v26, %v4250_v19 }
  0x8d   : > { %3171 = vmatmul.mubr.msk.f32.gmra.mrb[2].mxu0 %vm418_vm7, %v3731_v23  ;;  %3301 = vmatmul.mubr.msk.f32.gmra.mrb[2].mxu1 %vm420_vm8, %v3731_v23  ;;  %v339_v30 = vadd.s32 %v4240_v14, %v273_v29  ;;  %v340_v32 = vadd.s32 %v4240_v14, %v274_v31  ;;  %v341_v34 = vadd.s32 %v4240_v14, %v275_v33  ;;  %v277_v37 = vadd.s32 80, %v4230_v6 }
  0x8e   : > { %3172 = vmatprep.mubr.msk.f32.mxu0 %vm423_vm9, %v3731_v23  ;;  %3302 = vmatprep.mubr.msk.f32.mxu1 %vm425_vm10, %v3731_v23  ;;  %vm435_vm5 = vcmp.eq.s32.totalorder %v338_v28, %v4242_v15  ;;  %vm437_vm6 = vcmp.eq.s32.totalorder %v338_v28, %v4244_v16  ;;  %vm434_vm7 = vcmp.eq.s32.totalorder %v338_v28, %v4246_v17  ;;  %v278_v39 = vadd.s32 88, %v4230_v6 }
  0x8f   : > { %vm436_vm8 = vcmp.eq.s32.totalorder %v338_v28, %v4250_v19  ;;  %vm439_vm9 = vcmp.eq.s32.totalorder %v339_v30, %v4242_v15  ;;  %vm441_vm10 = vcmp.eq.s32.totalorder %v339_v30, %v4244_v16  ;;  %v342_v36 = vadd.s32 %v4240_v14, %v276_v35 }
  0x90   : > { %v343_v38 = vadd.s32 %v4240_v14, %v277_v37  ;;  %v344_v40 = vadd.s32 %v4240_v14, %v278_v39  ;;  %v279_v41 = vadd.s32 96, %v4230_v6  ;;  %v280_v43 = vadd.s32 104, %v4230_v6 }
  0x91   : > { %3173 = vmatmul.mubr.msk.f32.gmra.mrb[4].mxu0 %vm422_vm11, %v3731_v23  ;;  %3303 = vmatmul.mubr.msk.f32.gmra.mrb[4].mxu1 %vm424_vm12, %v3731_v23  ;;  %vm438_vm11 = vcmp.eq.s32.totalorder %v339_v30, %v4246_v17  ;;  %vm440_vm12 = vcmp.eq.s32.totalorder %v339_v30, %v4250_v19  ;;  %v281_v45 = vadd.s32 112, %v4230_v6  ;;  %v282_v47 = vadd.s32 120, %v4230_v6 }
  0x92   : > { %3174 = vmatprep.mubr.msk.f32.mxu0 %vm427_vm13, %v3731_v23  ;;  %3304 = vmatprep.mubr.msk.f32.mxu1 %vm429_vm14, %v3731_v23  ;;  %vm443_vm13 = vcmp.eq.s32.totalorder %v340_v32, %v4242_v15  ;;  %vm445_vm14 = vcmp.eq.s32.totalorder %v340_v32, %v4244_v16  ;;  %v345_v42 = vadd.s32 %v4240_v14, %v279_v41  ;;  %v283_v49 = vadd.s32 128, %v4230_v6 }
  0x93   : > { %v346_v44 = vadd.s32 %v4240_v14, %v280_v43  ;;  %v347_v46 = vadd.s32 %v4240_v14, %v281_v45  ;;  %v348_v48 = vadd.s32 %v4240_v14, %v282_v47  ;;  %v284_v51 = vadd.s32 136, %v4230_v6 }
  0x94   : > { %v349_v50 = vadd.s32 %v4240_v14, %v283_v49  ;;  %v285_v53 = vadd.s32 144, %v4230_v6  ;;  %v286_v55 = vadd.s32 152, %v4230_v6  ;;  %v287_v57 = vadd.s32 160, %v4230_v6 }
  0x95   : > { %3175 = vmatmul.mubr.msk.f32.gmra.mrb[6].mxu0 %vm426_vm15, %v3731_v23  ;;  %3305 = vmatmul.mubr.msk.f32.gmra.mrb[6].mxu1 %vm428_vm0, %v3731_v23  ;;  %vm442_vm15 = vcmp.eq.s32.totalorder %v340_v32, %v4246_v17  ;;  %vm444_vm0 = vcmp.eq.s32.totalorder %v340_v32, %v4250_v19  ;;  %v350_v52 = vadd.s32 %v4240_v14, %v284_v51  ;;  %v288_v59 = vadd.s32 168, %v4230_v6 }
  0x96   : > { %3176 = vmatprep.mubr.msk.f32.mxu0 %vm431_vm1, %v3731_v23  ;;  %3306 = vmatprep.mubr.msk.f32.mxu1 %vm433_vm2, %v3731_v23  ;;  %vm447_vm1 = vcmp.eq.s32.totalorder %v341_v34, %v4242_v15  ;;  %vm449_vm2 = vcmp.eq.s32.totalorder %v341_v34, %v4244_v16  ;;  %v351_v54 = vadd.s32 %v4240_v14, %v285_v53  ;;  %v289_v61 = vadd.s32 176, %v4230_v6 }
  0x97   : > { %v352_v56 = vadd.s32 %v4240_v14, %v286_v55  ;;  %v353_v58 = vadd.s32 %v4240_v14, %v287_v57  ;;  %v354_v60 = vadd.s32 %v4240_v14, %v288_v59  ;;  %v290_v63 = vadd.s32 184, %v4230_v6 }
  0x98   : > { %v355_v62 = vadd.s32 %v4240_v14, %v289_v61  ;;  %v291_v1 = vadd.s32 192, %v4230_v6  ;;  %v292_v3 = vadd.s32 200, %v4230_v6  ;;  %v293_v5 = vadd.s32 208, %v4230_v6 }
  0x99   : > { %3177 = vmatmul.mubr.msk.f32.gmra.mrb[8].mxu0 %vm430_vm3, %v3731_v23  ;;  %3307 = vmatmul.mubr.msk.f32.gmra.mrb[8].mxu1 %vm432_vm4, %v3731_v23  ;;  %vm446_vm3 = vcmp.eq.s32.totalorder %v341_v34, %v4246_v17  ;;  %vm448_vm4 = vcmp.eq.s32.totalorder %v341_v34, %v4250_v19  ;;  %v356_v0 = vadd.s32 %v4240_v14, %v290_v63  ;;  %v294_v8 = vadd.s32 216, %v4230_v6 }
  0x9a   : > { %3178 = vmatprep.mubr.msk.f32.mxu0 %vm435_vm5, %v3731_v23  ;;  %3308 = vmatprep.mubr.msk.f32.mxu1 %vm437_vm6, %v3731_v23  ;;  %vm451_vm5 = vcmp.eq.s32.totalorder %v342_v36, %v4242_v15  ;;  %vm453_vm6 = vcmp.eq.s32.totalorder %v342_v36, %v4244_v16  ;;  %v357_v2 = vadd.s32 %v4240_v14, %v291_v1  ;;  %v295_v10 = vadd.s32 224, %v4230_v6 }
  0x9b   : > { %v358_v4 = vadd.s32 %v4240_v14, %v292_v3  ;;  %v359_v7 = vadd.s32 %v4240_v14, %v293_v5  ;;  %v360_v9 = vadd.s32 %v4240_v14, %v294_v8  ;;  %v296_v12 = vadd.s32 232, %v4230_v6 }
  0x9c   : > { %v361_v11 = vadd.s32 %v4240_v14, %v295_v10  ;;  %v297_v18 = vadd.s32 240, %v4230_v6  ;;  %v298_v21 = vadd.s32 248, %v4230_v6  ;;  %v299_v24 = vadd.s32 256, %v4230_v6 }
  0x9d   : > { %3179 = vmatmul.mubr.msk.f32.gmra.mrb[10].mxu0 %vm434_vm7, %v3731_v23  ;;  %3309 = vmatmul.mubr.msk.f32.gmra.mrb[10].mxu1 %vm436_vm8, %v3731_v23  ;;  %vm450_vm7 = vcmp.eq.s32.totalorder %v342_v36, %v4246_v17  ;;  %vm452_vm8 = vcmp.eq.s32.totalorder %v342_v36, %v4250_v19  ;;  %v362_v13 = vadd.s32 %v4240_v14, %v296_v12  ;;  %v300_v26 = vadd.s32 264, %v4230_v6  ;;  %v1981_v12 = vld [vmem:[%s4789_s9] sm:$0xff] }
  0x9e   : > { %3180 = vmatprep.mubr.msk.f32.mxu0 %vm439_vm9, %v3731_v23  ;;  %3310 = vmatprep.mubr.msk.f32.mxu1 %vm441_vm10, %v3731_v23  ;;  %vm455_vm9 = vcmp.eq.s32.totalorder %v343_v38, %v4242_v15  ;;  %vm457_vm10 = vcmp.eq.s32.totalorder %v343_v38, %v4244_v16  ;;  %v363_v20 = vadd.s32 %v4240_v14, %v297_v18  ;;  %v301_v28 = vadd.s32 272, %v4230_v6 }
  0x9f   : > { %v364_v22 = vadd.s32 %v4240_v14, %v298_v21  ;;  %v365_v25 = vadd.s32 %v4240_v14, %v299_v24  ;;  %v366_v27 = vadd.s32 %v4240_v14, %v300_v26  ;;  %v302_v30 = vadd.s32 280, %v4230_v6 }
  0xa0   : > { %v367_v29 = vadd.s32 %v4240_v14, %v301_v28  ;;  %v303_v32 = vadd.s32 288, %v4230_v6  ;;  %v304_v34 = vadd.s32 296, %v4230_v6  ;;  %v305_v36 = vadd.s32 304, %v4230_v6 }
  0xa1   : > { %3181 = vmatmul.mubr.msk.f32.gmra.mrb[12].mxu0 %vm438_vm11, %v3731_v23  ;;  %3311 = vmatmul.mubr.msk.f32.gmra.mrb[12].mxu1 %vm440_vm12, %v3731_v23  ;;  %vm454_vm11 = vcmp.eq.s32.totalorder %v343_v38, %v4246_v17  ;;  %vm456_vm12 = vcmp.eq.s32.totalorder %v343_v38, %v4250_v19  ;;  %v368_v31 = vadd.s32 %v4240_v14, %v302_v30  ;;  %v306_v38 = vadd.s32 312, %v4230_v6 }
  0xa2   : > { %3182 = vmatprep.mubr.msk.f32.mxu0 %vm443_vm13, %v3731_v23  ;;  %3312 = vmatprep.mubr.msk.f32.mxu1 %vm445_vm14, %v3731_v23  ;;  %vm459_vm13 = vcmp.eq.s32.totalorder %v344_v40, %v4242_v15  ;;  %vm461_vm14 = vcmp.eq.s32.totalorder %v344_v40, %v4244_v16  ;;  %v369_v33 = vadd.s32 %v4240_v14, %v303_v32  ;;  %v323_v8 = vadd.s32 448, %v4230_v6 }
  0xa3   : > { %v370_v35 = vadd.s32 %v4240_v14, %v304_v34  ;;  %v371_v37 = vadd.s32 %v4240_v14, %v305_v36  ;;  %v372_v39 = vadd.s32 %v4240_v14, %v306_v38  ;;  %v324_v24 = vadd.s32 456, %v4230_v6  ;;  %v1983_v36 = vld [vmem:[%s4789_s9 + $0x10] sm:$0xff] }
  0xa4   : > { %v389_v21 = vadd.s32 %v4240_v14, %v323_v8 }
  0xa5   : > { %3183 = vmatmul.mubr.msk.f32.gmra.mrb[14].mxu0 %vm442_vm15, %v3731_v23  ;;  %3313 = vmatmul.mubr.msk.f32.gmra.mrb[14].mxu1 %vm444_vm0, %v3731_v23  ;;  %vm458_vm15 = vcmp.eq.s32.totalorder %v344_v40, %v4246_v17  ;;  %vm460_vm0 = vcmp.eq.s32.totalorder %v344_v40, %v4250_v19  ;;  %v307_v40 = vadd.s32 320, %v4230_v6  ;;  %v390_v32 = vadd.s32 %v4240_v14, %v324_v24  ;;  %v1988_v24 = vld [vmem:[%s4789_s9 + $0x38] sm:$0xff] }
  0xa6   : > { %3184 = vmatprep.mubr.msk.f32.mxu0 %vm447_vm1, %v3731_v23  ;;  %3314 = vmatprep.mubr.msk.f32.mxu1 %vm449_vm2, %v3731_v23  ;;  %vm463_vm1 = vcmp.eq.s32.totalorder %v345_v42, %v4242_v15  ;;  %vm465_vm2 = vcmp.eq.s32.totalorder %v345_v42, %v4244_v16 }
  0xa7   : > { %v373_v41 = vadd.s32 %v4240_v14, %v307_v40  ;;  %v326_v40 = vadd.s32 472, %v4230_v6 }
  0xa9   : > { %3185 = vmatmul.mubr.msk.f32.gmra.mrb[16].mxu0 %vm446_vm3, %v3731_v23  ;;  %3315 = vmatmul.mubr.msk.f32.gmra.mrb[16].mxu1 %vm448_vm4, %v3731_v23  ;;  %vm462_vm3 = vcmp.eq.s32.totalorder %v345_v42, %v4246_v17  ;;  %vm464_vm4 = vcmp.eq.s32.totalorder %v345_v42, %v4250_v19  ;;  %v308_v42 = vadd.s32 328, %v4230_v6 }
  0xaa   : > { %3186 = vmatprep.mubr.msk.f32.mxu0 %vm451_vm5, %v3731_v23  ;;  %3316 = vmatprep.mubr.msk.f32.mxu1 %vm453_vm6, %v3731_v23  ;;  %vm467_vm5 = vcmp.eq.s32.totalorder %v346_v44, %v4242_v15  ;;  %vm469_vm6 = vcmp.eq.s32.totalorder %v346_v44, %v4244_v16 }
  0xab   : > { %v374_v43 = vadd.s32 %v4240_v14, %v308_v42 }
  0xad   : > { %3187 = vmatmul.mubr.msk.f32.gmra.mrb[18].mxu0 %vm450_vm7, %v3731_v23  ;;  %3317 = vmatmul.mubr.msk.f32.gmra.mrb[18].mxu1 %vm452_vm8, %v3731_v23  ;;  %vm466_vm7 = vcmp.eq.s32.totalorder %v346_v44, %v4246_v17  ;;  %vm468_vm8 = vcmp.eq.s32.totalorder %v346_v44, %v4250_v19  ;;  %v309_v44 = vadd.s32 336, %v4230_v6 }
  0xae   : > { %3188 = vmatprep.mubr.msk.f32.mxu0 %vm455_vm9, %v3731_v23  ;;  %3318 = vmatprep.mubr.msk.f32.mxu1 %vm457_vm10, %v3731_v23  ;;  %vm471_vm9 = vcmp.eq.s32.totalorder %v347_v46, %v4242_v15  ;;  %vm473_vm10 = vcmp.eq.s32.totalorder %v347_v46, %v4244_v16 }
  0xaf   : > { %v375_v45 = vadd.s32 %v4240_v14, %v309_v44 }
  0xb1   : > { %3189 = vmatmul.mubr.msk.f32.gmra.mrb[20].mxu0 %vm454_vm11, %v3731_v23  ;;  %3319 = vmatmul.mubr.msk.f32.gmra.mrb[20].mxu1 %vm456_vm12, %v3731_v23  ;;  %vm470_vm11 = vcmp.eq.s32.totalorder %v347_v46, %v4246_v17  ;;  %vm472_vm12 = vcmp.eq.s32.totalorder %v347_v46, %v4250_v19  ;;  %v310_v46 = vadd.s32 344, %v4230_v6 }
  0xb2   : > { %3190 = vmatprep.mubr.msk.f32.mxu0 %vm459_vm13, %v3731_v23  ;;  %3320 = vmatprep.mubr.msk.f32.mxu1 %vm461_vm14, %v3731_v23  ;;  %vm475_vm13 = vcmp.eq.s32.totalorder %v348_v48, %v4242_v15  ;;  %vm477_vm14 = vcmp.eq.s32.totalorder %v348_v48, %v4244_v16 }
  0xb3   : > { %v376_v47 = vadd.s32 %v4240_v14, %v310_v46 }
  0xb5   : > { %3191 = vmatmul.mubr.msk.f32.gmra.mrb[22].mxu0 %vm458_vm15, %v3731_v23  ;;  %3321 = vmatmul.mubr.msk.f32.gmra.mrb[22].mxu1 %vm460_vm0, %v3731_v23  ;;  %vm474_vm15 = vcmp.eq.s32.totalorder %v348_v48, %v4246_v17  ;;  %vm476_vm0 = vcmp.eq.s32.totalorder %v348_v48, %v4250_v19  ;;  %v311_v48 = vadd.s32 352, %v4230_v6 }
  0xb6   : > { %3192 = vmatprep.mubr.msk.f32.mxu0 %vm463_vm1, %v3731_v23  ;;  %3322 = vmatprep.mubr.msk.f32.mxu1 %vm465_vm2, %v3731_v23  ;;  %vm479_vm1 = vcmp.eq.s32.totalorder %v349_v50, %v4242_v15  ;;  %vm481_vm2 = vcmp.eq.s32.totalorder %v349_v50, %v4244_v16 }
  0xb7   : > { %v377_v49 = vadd.s32 %v4240_v14, %v311_v48 }
  0xb9   : > { %3193 = vmatmul.mubr.msk.f32.gmra.mrb[24].mxu0 %vm462_vm3, %v3731_v23  ;;  %3323 = vmatmul.mubr.msk.f32.gmra.mrb[24].mxu1 %vm464_vm4, %v3731_v23  ;;  %vm478_vm3 = vcmp.eq.s32.totalorder %v349_v50, %v4246_v17  ;;  %vm480_vm4 = vcmp.eq.s32.totalorder %v349_v50, %v4250_v19  ;;  %v312_v50 = vadd.s32 360, %v4230_v6 }
  0xba   : > { %3194 = vmatprep.mubr.msk.f32.mxu0 %vm467_vm5, %v3731_v23  ;;  %3324 = vmatprep.mubr.msk.f32.mxu1 %vm469_vm6, %v3731_v23  ;;  %vm483_vm5 = vcmp.eq.s32.totalorder %v350_v52, %v4242_v15  ;;  %vm485_vm6 = vcmp.eq.s32.totalorder %v350_v52, %v4244_v16 }
  0xbb   : > { %v378_v51 = vadd.s32 %v4240_v14, %v312_v50 }
  0xbd   : > { %3195 = vmatmul.mubr.msk.f32.gmra.mrb[26].mxu0 %vm466_vm7, %v3731_v23  ;;  %3325 = vmatmul.mubr.msk.f32.gmra.mrb[26].mxu1 %vm468_vm8, %v3731_v23  ;;  %vm482_vm7 = vcmp.eq.s32.totalorder %v350_v52, %v4246_v17  ;;  %vm484_vm8 = vcmp.eq.s32.totalorder %v350_v52, %v4250_v19  ;;  %v313_v52 = vadd.s32 368, %v4230_v6 }
  0xbe   : > { %3196 = vmatprep.mubr.msk.f32.mxu0 %vm471_vm9, %v3731_v23  ;;  %3326 = vmatprep.mubr.msk.f32.mxu1 %vm473_vm10, %v3731_v23  ;;  %vm487_vm9 = vcmp.eq.s32.totalorder %v351_v54, %v4242_v15  ;;  %vm489_vm10 = vcmp.eq.s32.totalorder %v351_v54, %v4244_v16 }
  0xbf   : > { %v379_v53 = vadd.s32 %v4240_v14, %v313_v52 }
  0xc1   : > { %3197 = vmatmul.mubr.msk.f32.gmra.mrb[28].mxu0 %vm470_vm11, %v3731_v23  ;;  %3327 = vmatmul.mubr.msk.f32.gmra.mrb[28].mxu1 %vm472_vm12, %v3731_v23  ;;  %vm486_vm11 = vcmp.eq.s32.totalorder %v351_v54, %v4246_v17  ;;  %vm488_vm12 = vcmp.eq.s32.totalorder %v351_v54, %v4250_v19  ;;  %v314_v54 = vadd.s32 376, %v4230_v6 }
  0xc2   : > { %3198 = vmatprep.mubr.msk.f32.mxu0 %vm475_vm13, %v3731_v23  ;;  %3328 = vmatprep.mubr.msk.f32.mxu1 %vm477_vm14, %v3731_v23  ;;  %vm491_vm13 = vcmp.eq.s32.totalorder %v352_v56, %v4242_v15  ;;  %vm493_vm14 = vcmp.eq.s32.totalorder %v352_v56, %v4244_v16 }
  0xc3   : > { %v380_v55 = vadd.s32 %v4240_v14, %v314_v54  ;;  %v1985_v54 = vld [vmem:[%s4789_s9 + $0x20] sm:$0xff] }
  0xc5   : > { %3199 = vmatmul.mubr.msk.f32.gmra.mrb[30].mxu0 %vm474_vm15, %v3731_v23  ;;  %3329 = vmatmul.mubr.msk.f32.gmra.mrb[30].mxu1 %vm476_vm0, %v3731_v23  ;;  %vm490_vm15 = vcmp.eq.s32.totalorder %v352_v56, %v4246_v17  ;;  %vm492_vm0 = vcmp.eq.s32.totalorder %v352_v56, %v4250_v19  ;;  %v315_v56 = vadd.s32 384, %v4230_v6 }
  0xc6   : > { %3200 = vmatprep.mubr.msk.f32.mxu0 %vm479_vm1, %v3731_v23  ;;  %3330 = vmatprep.mubr.msk.f32.mxu1 %vm481_vm2, %v3731_v23  ;;  %vm495_vm1 = vcmp.eq.s32.totalorder %v353_v58, %v4242_v15  ;;  %vm497_vm2 = vcmp.eq.s32.totalorder %v353_v58, %v4244_v16 }
  0xc7   : > { %v381_v57 = vadd.s32 %v4240_v14, %v315_v56 }
  0xc9   : > { %3201 = vmatmul.mubr.msk.f32.gmra.mrb[32].mxu0 %vm478_vm3, %v3731_v23  ;;  %3331 = vmatmul.mubr.msk.f32.gmra.mrb[32].mxu1 %vm480_vm4, %v3731_v23  ;;  %vm494_vm3 = vcmp.eq.s32.totalorder %v353_v58, %v4246_v17  ;;  %vm496_vm4 = vcmp.eq.s32.totalorder %v353_v58, %v4250_v19  ;;  %v316_v58 = vadd.s32 392, %v4230_v6 }
  0xca   : > { %3202 = vmatprep.mubr.msk.f32.mxu0 %vm483_vm5, %v3731_v23  ;;  %3332 = vmatprep.mubr.msk.f32.mxu1 %vm485_vm6, %v3731_v23  ;;  %vm499_vm5 = vcmp.eq.s32.totalorder %v354_v60, %v4242_v15  ;;  %vm501_vm6 = vcmp.eq.s32.totalorder %v354_v60, %v4244_v16 }
  0xcb   : > { %v382_v59 = vadd.s32 %v4240_v14, %v316_v58 }
  0xcd   : > { %3203 = vmatmul.mubr.msk.f32.gmra.mrb[34].mxu0 %vm482_vm7, %v3731_v23  ;;  %3333 = vmatmul.mubr.msk.f32.gmra.mrb[34].mxu1 %vm484_vm8, %v3731_v23  ;;  %vm498_vm7 = vcmp.eq.s32.totalorder %v354_v60, %v4246_v17  ;;  %vm500_vm8 = vcmp.eq.s32.totalorder %v354_v60, %v4250_v19  ;;  %v317_v60 = vadd.s32 400, %v4230_v6 }
  0xce   : > { %3204 = vmatprep.mubr.msk.f32.mxu0 %vm487_vm9, %v3731_v23  ;;  %3334 = vmatprep.mubr.msk.f32.mxu1 %vm489_vm10, %v3731_v23  ;;  %vm503_vm9 = vcmp.eq.s32.totalorder %v355_v62, %v4242_v15  ;;  %vm505_vm10 = vcmp.eq.s32.totalorder %v355_v62, %v4244_v16 }
  0xcf   : > { %v383_v61 = vadd.s32 %v4240_v14, %v317_v60  ;;  %v328_v60 = vadd.s32 488, %v4230_v6 }
  0xd1   : > { %3205 = vmatmul.mubr.msk.f32.gmra.mrb[36].mxu0 %vm486_vm11, %v3731_v23  ;;  %3335 = vmatmul.mubr.msk.f32.gmra.mrb[36].mxu1 %vm488_vm12, %v3731_v23  ;;  %vm502_vm11 = vcmp.eq.s32.totalorder %v355_v62, %v4246_v17  ;;  %vm504_vm12 = vcmp.eq.s32.totalorder %v355_v62, %v4250_v19  ;;  %v318_v62 = vadd.s32 408, %v4230_v6 }
  0xd2   : > { %3206 = vmatprep.mubr.msk.f32.mxu0 %vm491_vm13, %v3731_v23  ;;  %3336 = vmatprep.mubr.msk.f32.mxu1 %vm493_vm14, %v3731_v23  ;;  %vm507_vm13 = vcmp.eq.s32.totalorder %v356_v0, %v4242_v15  ;;  %vm509_vm14 = vcmp.eq.s32.totalorder %v356_v0, %v4244_v16 }
  0xd3   : > { %v384_v63 = vadd.s32 %v4240_v14, %v318_v62 }
  0xd5   : > { %3207 = vmatmul.mubr.msk.f32.gmra.mrb[38].mxu0 %vm490_vm15, %v3731_v23  ;;  %3337 = vmatmul.mubr.msk.f32.gmra.mrb[38].mxu1 %vm492_vm0, %v3731_v23  ;;  %vm506_vm15 = vcmp.eq.s32.totalorder %v356_v0, %v4246_v17  ;;  %vm508_vm0 = vcmp.eq.s32.totalorder %v356_v0, %v4250_v19  ;;  %v319_v0 = vadd.s32 416, %v4230_v6 }
  0xd6   : > { %3208 = vmatprep.mubr.msk.f32.mxu0 %vm495_vm1, %v3731_v23  ;;  %3338 = vmatprep.mubr.msk.f32.mxu1 %vm497_vm2, %v3731_v23  ;;  %vm511_vm1 = vcmp.eq.s32.totalorder %v357_v2, %v4242_v15  ;;  %vm513_vm2 = vcmp.eq.s32.totalorder %v357_v2, %v4244_v16 }
  0xd7   : > { %v385_v1 = vadd.s32 %v4240_v14, %v319_v0 }
  0xd9   : > { %3209 = vmatmul.mubr.msk.f32.gmra.mrb[40].mxu0 %vm494_vm3, %v3731_v23  ;;  %3339 = vmatmul.mubr.msk.f32.gmra.mrb[40].mxu1 %vm496_vm4, %v3731_v23  ;;  %vm510_vm3 = vcmp.eq.s32.totalorder %v357_v2, %v4246_v17  ;;  %vm512_vm4 = vcmp.eq.s32.totalorder %v357_v2, %v4250_v19  ;;  %v320_v2 = vadd.s32 424, %v4230_v6 }
  0xda   : > { %3210 = vmatprep.mubr.msk.f32.mxu0 %vm499_vm5, %v3731_v23  ;;  %3340 = vmatprep.mubr.msk.f32.mxu1 %vm501_vm6, %v3731_v23  ;;  %vm515_vm5 = vcmp.eq.s32.totalorder %v358_v4, %v4242_v15  ;;  %vm517_vm6 = vcmp.eq.s32.totalorder %v358_v4, %v4244_v16 }
  0xdb   : > { %v386_v3 = vadd.s32 %v4240_v14, %v320_v2 }
  0xdd   : > { %3211 = vmatmul.mubr.msk.f32.gmra.mrb[42].mxu0 %vm498_vm7, %v3731_v23  ;;  %3341 = vmatmul.mubr.msk.f32.gmra.mrb[42].mxu1 %vm500_vm8, %v3731_v23  ;;  %vm514_vm7 = vcmp.eq.s32.totalorder %v358_v4, %v4246_v17  ;;  %vm516_vm8 = vcmp.eq.s32.totalorder %v358_v4, %v4250_v19  ;;  %v321_v4 = vadd.s32 432, %v4230_v6 }
  0xde   : > { %3212 = vmatprep.mubr.msk.f32.mxu0 %vm503_vm9, %v3731_v23  ;;  %3342 = vmatprep.mubr.msk.f32.mxu1 %vm505_vm10, %v3731_v23  ;;  %vm519_vm9 = vcmp.eq.s32.totalorder %v359_v7, %v4242_v15  ;;  %vm521_vm10 = vcmp.eq.s32.totalorder %v359_v7, %v4244_v16 }
  0xdf   : > { %v387_v5 = vadd.s32 %v4240_v14, %v321_v4 }
  0xe1   : > { %3213 = vmatmul.mubr.msk.f32.gmra.mrb[44].mxu0 %vm502_vm11, %v3731_v23  ;;  %3343 = vmatmul.mubr.msk.f32.gmra.mrb[44].mxu1 %vm504_vm12, %v3731_v23  ;;  %vm518_vm11 = vcmp.eq.s32.totalorder %v359_v7, %v4246_v17  ;;  %vm520_vm12 = vcmp.eq.s32.totalorder %v359_v7, %v4250_v19  ;;  %v322_v7 = vadd.s32 440, %v4230_v6 }
  0xe2   : > { %3214 = vmatprep.mubr.msk.f32.mxu0 %vm507_vm13, %v3731_v23  ;;  %3344 = vmatprep.mubr.msk.f32.mxu1 %vm509_vm14, %v3731_v23  ;;  %vm523_vm13 = vcmp.eq.s32.totalorder %v360_v9, %v4242_v15  ;;  %vm525_vm14 = vcmp.eq.s32.totalorder %v360_v9, %v4244_v16 }
  0xe5   : > { %3215 = vmatmul.mubr.msk.f32.gmra.mrb[46].mxu0 %vm506_vm15, %v3731_v23  ;;  %3345 = vmatmul.mubr.msk.f32.gmra.mrb[46].mxu1 %vm508_vm0, %v3731_v23  ;;  %vm522_vm15 = vcmp.eq.s32.totalorder %v360_v9, %v4246_v17  ;;  %vm524_vm0 = vcmp.eq.s32.totalorder %v360_v9, %v4250_v19  ;;  %v388_v9 = vadd.s32 %v4240_v14, %v322_v7 }
  0xe6   : > { %3216 = vmatprep.mubr.msk.f32.mxu0 %vm511_vm1, %v3731_v23  ;;  %3346 = vmatprep.mubr.msk.f32.mxu1 %vm513_vm2, %v3731_v23  ;;  %vm527_vm1 = vcmp.eq.s32.totalorder %v361_v11, %v4242_v15  ;;  %vm529_vm2 = vcmp.eq.s32.totalorder %v361_v11, %v4244_v16 }
  0xe9   : > { %3217 = vmatmul.mubr.msk.f32.gmra.mrb[48].mxu0 %vm510_vm3, %v3731_v23  ;;  %3347 = vmatmul.mubr.msk.f32.gmra.mrb[48].mxu1 %vm512_vm4, %v3731_v23  ;;  %vm526_vm3 = vcmp.eq.s32.totalorder %v361_v11, %v4246_v17  ;;  %vm528_vm4 = vcmp.eq.s32.totalorder %v361_v11, %v4250_v19 }
  0xea   : > { %3218 = vmatprep.mubr.msk.f32.mxu0 %vm515_vm5, %v3731_v23  ;;  %3348 = vmatprep.mubr.msk.f32.mxu1 %vm517_vm6, %v3731_v23  ;;  %vm531_vm5 = vcmp.eq.s32.totalorder %v362_v13, %v4242_v15  ;;  %vm533_vm6 = vcmp.eq.s32.totalorder %v362_v13, %v4244_v16 }
  0xed   : > { %3219 = vmatmul.mubr.msk.f32.gmra.mrb[50].mxu0 %vm514_vm7, %v3731_v23  ;;  %3349 = vmatmul.mubr.msk.f32.gmra.mrb[50].mxu1 %vm516_vm8, %v3731_v23  ;;  %vm530_vm7 = vcmp.eq.s32.totalorder %v362_v13, %v4246_v17  ;;  %vm532_vm8 = vcmp.eq.s32.totalorder %v362_v13, %v4250_v19 }
  0xee   : > { %3220 = vmatprep.mubr.msk.f32.mxu0 %vm519_vm9, %v3731_v23  ;;  %3350 = vmatprep.mubr.msk.f32.mxu1 %vm521_vm10, %v3731_v23  ;;  %vm535_vm9 = vcmp.eq.s32.totalorder %v363_v20, %v4242_v15  ;;  %vm537_vm10 = vcmp.eq.s32.totalorder %v363_v20, %v4244_v16 }
  0xf1   : > { %3221 = vmatmul.mubr.msk.f32.gmra.mrb[52].mxu0 %vm518_vm11, %v3731_v23  ;;  %3351 = vmatmul.mubr.msk.f32.gmra.mrb[52].mxu1 %vm520_vm12, %v3731_v23  ;;  %vm534_vm11 = vcmp.eq.s32.totalorder %v363_v20, %v4246_v17  ;;  %vm536_vm12 = vcmp.eq.s32.totalorder %v363_v20, %v4250_v19 }
  0xf2   : > { %3222 = vmatprep.mubr.msk.f32.mxu0 %vm523_vm13, %v3731_v23  ;;  %3352 = vmatprep.mubr.msk.f32.mxu1 %vm525_vm14, %v3731_v23  ;;  %vm539_vm13 = vcmp.eq.s32.totalorder %v364_v22, %v4242_v15  ;;  %vm541_vm14 = vcmp.eq.s32.totalorder %v364_v22, %v4244_v16 }
  0xf5   : > { %3223 = vmatmul.mubr.msk.f32.gmra.mrb[54].mxu0 %vm522_vm15, %v3731_v23  ;;  %3353 = vmatmul.mubr.msk.f32.gmra.mrb[54].mxu1 %vm524_vm0, %v3731_v23  ;;  %vm538_vm15 = vcmp.eq.s32.totalorder %v364_v22, %v4246_v17  ;;  %vm540_vm0 = vcmp.eq.s32.totalorder %v364_v22, %v4250_v19 }
  0xf6   : > { %3224 = vmatprep.mubr.msk.f32.mxu0 %vm527_vm1, %v3731_v23  ;;  %3354 = vmatprep.mubr.msk.f32.mxu1 %vm529_vm2, %v3731_v23  ;;  %vm543_vm1 = vcmp.eq.s32.totalorder %v365_v25, %v4242_v15  ;;  %vm545_vm2 = vcmp.eq.s32.totalorder %v365_v25, %v4244_v16 }
  0xf9   : > { %3225 = vmatmul.mubr.msk.f32.gmra.mrb[56].mxu0 %vm526_vm3, %v3731_v23  ;;  %3355 = vmatmul.mubr.msk.f32.gmra.mrb[56].mxu1 %vm528_vm4, %v3731_v23  ;;  %vm542_vm3 = vcmp.eq.s32.totalorder %v365_v25, %v4246_v17  ;;  %vm544_vm4 = vcmp.eq.s32.totalorder %v365_v25, %v4250_v19 }
  0xfa   : > { %3226 = vmatprep.mubr.msk.f32.mxu0 %vm531_vm5, %v3731_v23  ;;  %3356 = vmatprep.mubr.msk.f32.mxu1 %vm533_vm6, %v3731_v23  ;;  %vm547_vm5 = vcmp.eq.s32.totalorder %v366_v27, %v4242_v15  ;;  %vm549_vm6 = vcmp.eq.s32.totalorder %v366_v27, %v4244_v16 }
  0xfd   : > { %3227 = vmatmul.mubr.msk.f32.gmra.mrb[58].mxu0 %vm530_vm7, %v3731_v23  ;;  %3357 = vmatmul.mubr.msk.f32.gmra.mrb[58].mxu1 %vm532_vm8, %v3731_v23  ;;  %vm546_vm7 = vcmp.eq.s32.totalorder %v366_v27, %v4246_v17  ;;  %vm548_vm8 = vcmp.eq.s32.totalorder %v366_v27, %v4250_v19  ;;  %v1982_v27 = vld [vmem:[%s4789_s9 + $0x8] sm:$0xff] }
  0xfe   : > { %3228 = vmatprep.mubr.msk.f32.mxu0 %vm535_vm9, %v3731_v23  ;;  %3358 = vmatprep.mubr.msk.f32.mxu1 %vm537_vm10, %v3731_v23  ;;  %vm551_vm9 = vcmp.eq.s32.totalorder %v367_v29, %v4242_v15  ;;  %vm553_vm10 = vcmp.eq.s32.totalorder %v367_v29, %v4244_v16 }
 0x101   : > { %3229 = vmatmul.mubr.msk.f32.gmra.mrb[60].mxu0 %vm534_vm11, %v3731_v23  ;;  %3359 = vmatmul.mubr.msk.f32.gmra.mrb[60].mxu1 %vm536_vm12, %v3731_v23  ;;  %vm550_vm11 = vcmp.eq.s32.totalorder %v367_v29, %v4246_v17  ;;  %vm552_vm12 = vcmp.eq.s32.totalorder %v367_v29, %v4250_v19 }
 0x102   : > { %3230 = vmatprep.mubr.msk.f32.mxu0 %vm539_vm13, %v3731_v23  ;;  %3360 = vmatprep.mubr.msk.f32.mxu1 %vm541_vm14, %v3731_v23  ;;  %vm555_vm13 = vcmp.eq.s32.totalorder %v368_v31, %v4242_v15  ;;  %vm557_vm14 = vcmp.eq.s32.totalorder %v368_v31, %v4244_v16 }
 0x105   : > { %3231 = vmatmul.mubr.msk.f32.gmra.mrb[62].mxu0 %vm538_vm15, %v3731_v23  ;;  %3361 = vmatmul.mubr.msk.f32.gmra.mrb[62].mxu1 %vm540_vm0, %v3731_v23  ;;  %vm554_vm15 = vcmp.eq.s32.totalorder %v368_v31, %v4246_v17  ;;  %vm556_vm0 = vcmp.eq.s32.totalorder %v368_v31, %v4250_v19 }
 0x106   : > { %3232 = vmatprep.mubr.msk.f32.mxu0 %vm543_vm1, %v3731_v23  ;;  %3362 = vmatprep.mubr.msk.f32.mxu1 %vm545_vm2, %v3731_v23  ;;  %vm559_vm1 = vcmp.eq.s32.totalorder %v369_v33, %v4242_v15  ;;  %vm561_vm2 = vcmp.eq.s32.totalorder %v369_v33, %v4244_v16 }
 0x109   : > { %3233 = vmatmul.mubr.msk.f32.gmra.mrb[64].mxu0 %vm542_vm3, %v3731_v23  ;;  %3363 = vmatmul.mubr.msk.f32.gmra.mrb[64].mxu1 %vm544_vm4, %v3731_v23  ;;  %vm558_vm3 = vcmp.eq.s32.totalorder %v369_v33, %v4246_v17  ;;  %vm560_vm4 = vcmp.eq.s32.totalorder %v369_v33, %v4250_v19  ;;  %v325_v33 = vadd.s32 464, %v4230_v6 }
 0x10a   : > { %3234 = vmatprep.mubr.msk.f32.mxu0 %vm547_vm5, %v3731_v23  ;;  %3364 = vmatprep.mubr.msk.f32.mxu1 %vm549_vm6, %v3731_v23  ;;  %vm563_vm5 = vcmp.eq.s32.totalorder %v370_v35, %v4242_v15  ;;  %vm565_vm6 = vcmp.eq.s32.totalorder %v370_v35, %v4244_v16 }
 0x10b   : > { %v391_v42 = vadd.s32 %v4240_v14, %v325_v33  ;;  %v1989_v33 = vld [vmem:[%s4789_s9 + $0x40] sm:$0xff] }
 0x10d   : > { %3235 = vmatmul.mubr.msk.f32.gmra.mrb[66].mxu0 %vm546_vm7, %v3731_v23  ;;  %3365 = vmatmul.mubr.msk.f32.gmra.mrb[66].mxu1 %vm548_vm8, %v3731_v23  ;;  %vm562_vm7 = vcmp.eq.s32.totalorder %v370_v35, %v4246_v17  ;;  %vm564_vm8 = vcmp.eq.s32.totalorder %v370_v35, %v4250_v19 }
 0x10e   : > { %3236 = vmatprep.mubr.msk.f32.mxu0 %vm551_vm9, %v3731_v23  ;;  %3366 = vmatprep.mubr.msk.f32.mxu1 %vm553_vm10, %v3731_v23  ;;  %vm567_vm9 = vcmp.eq.s32.totalorder %v371_v37, %v4242_v15  ;;  %vm569_vm10 = vcmp.eq.s32.totalorder %v371_v37, %v4244_v16 }
 0x111   : > { %3237 = vmatmul.mubr.msk.f32.gmra.mrb[68].mxu0 %vm550_vm11, %v3731_v23  ;;  %3367 = vmatmul.mubr.msk.f32.gmra.mrb[68].mxu1 %vm552_vm12, %v3731_v23  ;;  %vm566_vm11 = vcmp.eq.s32.totalorder %v371_v37, %v4246_v17  ;;  %vm568_vm12 = vcmp.eq.s32.totalorder %v371_v37, %v4250_v19 }
 0x112   : > { %3238 = vmatprep.mubr.msk.f32.mxu0 %vm555_vm13, %v3731_v23  ;;  %3368 = vmatprep.mubr.msk.f32.mxu1 %vm557_vm14, %v3731_v23  ;;  %vm571_vm13 = vcmp.eq.s32.totalorder %v372_v39, %v4242_v15  ;;  %vm573_vm14 = vcmp.eq.s32.totalorder %v372_v39, %v4244_v16 }
 0x115   : > { %3239 = vmatmul.mubr.msk.f32.gmra.mrb[70].mxu0 %vm554_vm15, %v3731_v23  ;;  %3369 = vmatmul.mubr.msk.f32.gmra.mrb[70].mxu1 %vm556_vm0, %v3731_v23  ;;  %vm570_vm15 = vcmp.eq.s32.totalorder %v372_v39, %v4246_v17  ;;  %vm572_vm0 = vcmp.eq.s32.totalorder %v372_v39, %v4250_v19 }
 0x116   : > { %3240 = vmatprep.mubr.msk.f32.mxu0 %vm559_vm1, %v3731_v23  ;;  %3370 = vmatprep.mubr.msk.f32.mxu1 %vm561_vm2, %v3731_v23  ;;  %vm575_vm1 = vcmp.eq.s32.totalorder %v373_v41, %v4242_v15  ;;  %vm577_vm2 = vcmp.eq.s32.totalorder %v373_v41, %v4244_v16 }
 0x119   : > { %3241 = vmatmul.mubr.msk.f32.gmra.mrb[72].mxu0 %vm558_vm3, %v3731_v23  ;;  %3371 = vmatmul.mubr.msk.f32.gmra.mrb[72].mxu1 %vm560_vm4, %v3731_v23  ;;  %vm574_vm3 = vcmp.eq.s32.totalorder %v373_v41, %v4246_v17  ;;  %vm576_vm4 = vcmp.eq.s32.totalorder %v373_v41, %v4250_v19 }
 0x11a   : > { %3242 = vmatprep.mubr.msk.f32.mxu0 %vm563_vm5, %v3731_v23  ;;  %3372 = vmatprep.mubr.msk.f32.mxu1 %vm565_vm6, %v3731_v23  ;;  %vm579_vm5 = vcmp.eq.s32.totalorder %v374_v43, %v4242_v15  ;;  %vm581_vm6 = vcmp.eq.s32.totalorder %v374_v43, %v4244_v16 }
 0x11d   : > { %3243 = vmatmul.mubr.msk.f32.gmra.mrb[74].mxu0 %vm562_vm7, %v3731_v23  ;;  %3373 = vmatmul.mubr.msk.f32.gmra.mrb[74].mxu1 %vm564_vm8, %v3731_v23  ;;  %vm578_vm7 = vcmp.eq.s32.totalorder %v374_v43, %v4246_v17  ;;  %vm580_vm8 = vcmp.eq.s32.totalorder %v374_v43, %v4250_v19 }
 0x11e   : > { %3244 = vmatprep.mubr.msk.f32.mxu0 %vm567_vm9, %v3731_v23  ;;  %3374 = vmatprep.mubr.msk.f32.mxu1 %vm569_vm10, %v3731_v23  ;;  %vm583_vm9 = vcmp.eq.s32.totalorder %v375_v45, %v4242_v15  ;;  %vm585_vm10 = vcmp.eq.s32.totalorder %v375_v45, %v4244_v16 }
 0x121   : > { %3245 = vmatmul.mubr.msk.f32.gmra.mrb[76].mxu0 %vm566_vm11, %v3731_v23  ;;  %3375 = vmatmul.mubr.msk.f32.gmra.mrb[76].mxu1 %vm568_vm12, %v3731_v23  ;;  %vm582_vm11 = vcmp.eq.s32.totalorder %v375_v45, %v4246_v17  ;;  %vm584_vm12 = vcmp.eq.s32.totalorder %v375_v45, %v4250_v19  ;;  %v1984_v45 = vld [vmem:[%s4789_s9 + $0x18] sm:$0xff] }
 0x122   : > { %3246 = vmatprep.mubr.msk.f32.mxu0 %vm571_vm13, %v3731_v23  ;;  %3376 = vmatprep.mubr.msk.f32.mxu1 %vm573_vm14, %v3731_v23  ;;  %vm587_vm13 = vcmp.eq.s32.totalorder %v376_v47, %v4242_v15  ;;  %vm589_vm14 = vcmp.eq.s32.totalorder %v376_v47, %v4244_v16 }
 0x125   : > { %3247 = vmatmul.mubr.msk.f32.gmra.mrb[78].mxu0 %vm570_vm15, %v3731_v23  ;;  %3377 = vmatmul.mubr.msk.f32.gmra.mrb[78].mxu1 %vm572_vm0, %v3731_v23  ;;  %vm586_vm15 = vcmp.eq.s32.totalorder %v376_v47, %v4246_v17  ;;  %vm588_vm0 = vcmp.eq.s32.totalorder %v376_v47, %v4250_v19 }
 0x126   : > { %3248 = vmatprep.mubr.msk.f32.mxu0 %vm575_vm1, %v3731_v23  ;;  %3378 = vmatprep.mubr.msk.f32.mxu1 %vm577_vm2, %v3731_v23  ;;  %vm591_vm1 = vcmp.eq.s32.totalorder %v377_v49, %v4242_v15  ;;  %vm593_vm2 = vcmp.eq.s32.totalorder %v377_v49, %v4244_v16 }
 0x129   : > { %3249 = vmatmul.mubr.msk.f32.gmra.mrb[80].mxu0 %vm574_vm3, %v3731_v23  ;;  %3379 = vmatmul.mubr.msk.f32.gmra.mrb[80].mxu1 %vm576_vm4, %v3731_v23  ;;  %vm590_vm3 = vcmp.eq.s32.totalorder %v377_v49, %v4246_v17  ;;  %vm592_vm4 = vcmp.eq.s32.totalorder %v377_v49, %v4250_v19  ;;  %v392_v49 = vadd.s32 %v4240_v14, %v326_v40  ;;  %v1990_v40 = vld [vmem:[%s4789_s9 + $0x48] sm:$0xff] }
 0x12a   : > { %3250 = vmatprep.mubr.msk.f32.mxu0 %vm579_vm5, %v3731_v23  ;;  %3380 = vmatprep.mubr.msk.f32.mxu1 %vm581_vm6, %v3731_v23  ;;  %vm595_vm5 = vcmp.eq.s32.totalorder %v378_v51, %v4242_v15  ;;  %vm597_vm6 = vcmp.eq.s32.totalorder %v378_v51, %v4244_v16 }
 0x12d   : > { %3251 = vmatmul.mubr.msk.f32.gmra.mrb[82].mxu0 %vm578_vm7, %v3731_v23  ;;  %3381 = vmatmul.mubr.msk.f32.gmra.mrb[82].mxu1 %vm580_vm8, %v3731_v23  ;;  %vm594_vm7 = vcmp.eq.s32.totalorder %v378_v51, %v4246_v17  ;;  %vm596_vm8 = vcmp.eq.s32.totalorder %v378_v51, %v4250_v19  ;;  %v327_v51 = vadd.s32 480, %v4230_v6 }
 0x12e   : > { %3252 = vmatprep.mubr.msk.f32.mxu0 %vm583_vm9, %v3731_v23  ;;  %3382 = vmatprep.mubr.msk.f32.mxu1 %vm585_vm10, %v3731_v23  ;;  %vm599_vm9 = vcmp.eq.s32.totalorder %v379_v53, %v4242_v15  ;;  %vm601_vm10 = vcmp.eq.s32.totalorder %v379_v53, %v4244_v16 }
 0x131   : > { %3253 = vmatmul.mubr.msk.f32.gmra.mrb[84].mxu0 %vm582_vm11, %v3731_v23  ;;  %3383 = vmatmul.mubr.msk.f32.gmra.mrb[84].mxu1 %vm584_vm12, %v3731_v23  ;;  %vm598_vm11 = vcmp.eq.s32.totalorder %v379_v53, %v4246_v17  ;;  %vm600_vm12 = vcmp.eq.s32.totalorder %v379_v53, %v4250_v19 }
 0x132   : > { %3254 = vmatprep.mubr.msk.f32.mxu0 %vm587_vm13, %v3731_v23  ;;  %3384 = vmatprep.mubr.msk.f32.mxu1 %vm589_vm14, %v3731_v23  ;;  %vm603_vm13 = vcmp.eq.s32.totalorder %v380_v55, %v4242_v15  ;;  %vm605_vm14 = vcmp.eq.s32.totalorder %v380_v55, %v4244_v16 }
 0x135   : > { %3255 = vmatmul.mubr.msk.f32.gmra.mrb[86].mxu0 %vm586_vm15, %v3731_v23  ;;  %3385 = vmatmul.mubr.msk.f32.gmra.mrb[86].mxu1 %vm588_vm0, %v3731_v23  ;;  %vm602_vm15 = vcmp.eq.s32.totalorder %v380_v55, %v4246_v17  ;;  %vm604_vm0 = vcmp.eq.s32.totalorder %v380_v55, %v4250_v19 }
 0x136   : > { %3256 = vmatprep.mubr.msk.f32.mxu0 %vm591_vm1, %v3731_v23  ;;  %3386 = vmatprep.mubr.msk.f32.mxu1 %vm593_vm2, %v3731_v23  ;;  %vm607_vm1 = vcmp.eq.s32.totalorder %v381_v57, %v4242_v15  ;;  %vm609_vm2 = vcmp.eq.s32.totalorder %v381_v57, %v4244_v16 }
 0x139   : > { %3257 = vmatmul.mubr.msk.f32.gmra.mrb[88].mxu0 %vm590_vm3, %v3731_v23  ;;  %3387 = vmatmul.mubr.msk.f32.gmra.mrb[88].mxu1 %vm592_vm4, %v3731_v23  ;;  %vm606_vm3 = vcmp.eq.s32.totalorder %v381_v57, %v4246_v17  ;;  %vm608_vm4 = vcmp.eq.s32.totalorder %v381_v57, %v4250_v19 }
 0x13a   : > { %3258 = vmatprep.mubr.msk.f32.mxu0 %vm595_vm5, %v3731_v23  ;;  %3388 = vmatprep.mubr.msk.f32.mxu1 %vm597_vm6, %v3731_v23  ;;  %vm611_vm5 = vcmp.eq.s32.totalorder %v382_v59, %v4242_v15  ;;  %vm613_vm6 = vcmp.eq.s32.totalorder %v382_v59, %v4244_v16 }
 0x13d   : > { %3259 = vmatmul.mubr.msk.f32.gmra.mrb[90].mxu0 %vm594_vm7, %v3731_v23  ;;  %3389 = vmatmul.mubr.msk.f32.gmra.mrb[90].mxu1 %vm596_vm8, %v3731_v23  ;;  %vm610_vm7 = vcmp.eq.s32.totalorder %v382_v59, %v4246_v17  ;;  %vm612_vm8 = vcmp.eq.s32.totalorder %v382_v59, %v4250_v19  ;;  %v393_v59 = vadd.s32 %v4240_v14, %v327_v51  ;;  %v1992_v51 = vld [vmem:[%s4789_s9 + $0x58] sm:$0xff] }
 0x13e   : > { %3260 = vmatprep.mubr.msk.f32.mxu0 %vm599_vm9, %v3731_v23  ;;  %3390 = vmatprep.mubr.msk.f32.mxu1 %vm601_vm10, %v3731_v23  ;;  %vm615_vm9 = vcmp.eq.s32.totalorder %v383_v61, %v4242_v15  ;;  %vm617_vm10 = vcmp.eq.s32.totalorder %v383_v61, %v4244_v16 }
 0x141   : > { %3261 = vmatmul.mubr.msk.f32.gmra.mrb[92].mxu0 %vm598_vm11, %v3731_v23  ;;  %3391 = vmatmul.mubr.msk.f32.gmra.mrb[92].mxu1 %vm600_vm12, %v3731_v23  ;;  %vm614_vm11 = vcmp.eq.s32.totalorder %v383_v61, %v4246_v17  ;;  %vm616_vm12 = vcmp.eq.s32.totalorder %v383_v61, %v4250_v19 }
 0x142   : > { %3262 = vmatprep.mubr.msk.f32.mxu0 %vm603_vm13, %v3731_v23  ;;  %3392 = vmatprep.mubr.msk.f32.mxu1 %vm605_vm14, %v3731_v23  ;;  %vm619_vm13 = vcmp.eq.s32.totalorder %v384_v63, %v4242_v15  ;;  %vm621_vm14 = vcmp.eq.s32.totalorder %v384_v63, %v4244_v16 }
 0x145   : > { %3263 = vmatmul.mubr.msk.f32.gmra.mrb[94].mxu0 %vm602_vm15, %v3731_v23  ;;  %3393 = vmatmul.mubr.msk.f32.gmra.mrb[94].mxu1 %vm604_vm0, %v3731_v23  ;;  %vm618_vm15 = vcmp.eq.s32.totalorder %v384_v63, %v4246_v17  ;;  %vm620_vm0 = vcmp.eq.s32.totalorder %v384_v63, %v4250_v19  ;;  %v1986_v63 = vld [vmem:[%s4789_s9 + $0x28] sm:$0xff] }
 0x146   : > { %3264 = vmatprep.mubr.msk.f32.mxu0 %vm607_vm1, %v3731_v23  ;;  %3394 = vmatprep.mubr.msk.f32.mxu1 %vm609_vm2, %v3731_v23  ;;  %vm623_vm1 = vcmp.eq.s32.totalorder %v385_v1, %v4242_v15  ;;  %vm625_vm2 = vcmp.eq.s32.totalorder %v385_v1, %v4244_v16 }
 0x149   : > { %3265 = vmatmul.mubr.msk.f32.gmra.mrb[96].mxu0 %vm606_vm3, %v3731_v23  ;;  %3395 = vmatmul.mubr.msk.f32.gmra.mrb[96].mxu1 %vm608_vm4, %v3731_v23  ;;  %vm622_vm3 = vcmp.eq.s32.totalorder %v385_v1, %v4246_v17  ;;  %vm624_vm4 = vcmp.eq.s32.totalorder %v385_v1, %v4250_v19 }
 0x14a   : > { %3266 = vmatprep.mubr.msk.f32.mxu0 %vm611_vm5, %v3731_v23  ;;  %3396 = vmatprep.mubr.msk.f32.mxu1 %vm613_vm6, %v3731_v23  ;;  %vm627_vm5 = vcmp.eq.s32.totalorder %v386_v3, %v4242_v15  ;;  %vm629_vm6 = vcmp.eq.s32.totalorder %v386_v3, %v4244_v16 }
 0x14d   : > { %3267 = vmatmul.mubr.msk.f32.gmra.mrb[98].mxu0 %vm610_vm7, %v3731_v23  ;;  %3397 = vmatmul.mubr.msk.f32.gmra.mrb[98].mxu1 %vm612_vm8, %v3731_v23  ;;  %vm626_vm7 = vcmp.eq.s32.totalorder %v386_v3, %v4246_v17  ;;  %vm628_vm8 = vcmp.eq.s32.totalorder %v386_v3, %v4250_v19  ;;  %v329_v3 = vadd.s32 496, %v4230_v6 }
 0x14e   : > { %3268 = vmatprep.mubr.msk.f32.mxu0 %vm615_vm9, %v3731_v23  ;;  %3398 = vmatprep.mubr.msk.f32.mxu1 %vm617_vm10, %v3731_v23  ;;  %vm631_vm9 = vcmp.eq.s32.totalorder %v387_v5, %v4242_v15  ;;  %vm633_vm10 = vcmp.eq.s32.totalorder %v387_v5, %v4244_v16 }
 0x151   : > { %3269 = vmatmul.mubr.msk.f32.gmra.mrb[100].mxu0 %vm614_vm11, %v3731_v23  ;;  %3399 = vmatmul.mubr.msk.f32.gmra.mrb[100].mxu1 %vm616_vm12, %v3731_v23  ;;  %vm2111_vm11 = vcmask 31744   ;;  %vm630_vm12 = vcmp.eq.s32.totalorder %v387_v5, %v4246_v17 }
 0x152   : > { %3270 = vmatprep.mubr.msk.f32.mxu0 %vm619_vm13, %v3731_v23  ;;  %3400 = vmatprep.mubr.msk.f32.mxu1 %vm621_vm14, %v3731_v23  ;;  %vm632_vm13 = vcmp.eq.s32.totalorder %v387_v5, %v4250_v19  ;;  %vm635_vm14 = vcmp.eq.s32.totalorder %v388_v9, %v4242_v15  ;;  %v394_v5 = vadd.s32 %v4240_v14, %v328_v60 }
 0x155   : > { %3271 = vmatmul.mubr.msk.f32.gmra.mrb[102].mxu0 %vm618_vm15, %v3731_v23  ;;  %3401 = vmatmul.mubr.msk.f32.gmra.mrb[102].mxu1 %vm620_vm0, %v3731_v23  ;;  %vm637_vm15 = vcmp.eq.s32.totalorder %v388_v9, %v4244_v16  ;;  %vm634_vm0 = vcmp.eq.s32.totalorder %v388_v9, %v4246_v17 }
 0x156   : > { %3272 = vmatprep.mubr.msk.f32.mxu0 %vm623_vm1, %v3731_v23  ;;  %3402 = vmatprep.mubr.msk.f32.mxu1 %vm625_vm2, %v3731_v23  ;;  %vm636_vm1 = vcmp.eq.s32.totalorder %v388_v9, %v4250_v19  ;;  %vm639_vm2 = vcmp.eq.s32.totalorder %v389_v21, %v4242_v15  ;;  %v1987_v9 = vld [vmem:[%s4789_s9 + $0x30] sm:$0xff] }
 0x159   : > { %3273 = vmatmul.mubr.msk.f32.gmra.mrb[104].mxu0 %vm622_vm3, %v3731_v23  ;;  %3403 = vmatmul.mubr.msk.f32.gmra.mrb[104].mxu1 %vm624_vm4, %v3731_v23  ;;  %vm641_vm3 = vcmp.eq.s32.totalorder %v389_v21, %v4244_v16  ;;  %vm638_vm4 = vcmp.eq.s32.totalorder %v389_v21, %v4246_v17 }
 0x15a   : > { %3274 = vmatprep.mubr.msk.f32.mxu0 %vm627_vm5, %v3731_v23  ;;  %3404 = vmatprep.mubr.msk.f32.mxu1 %vm629_vm6, %v3731_v23  ;;  %vm640_vm5 = vcmp.eq.s32.totalorder %v389_v21, %v4250_v19  ;;  %vm643_vm6 = vcmp.eq.s32.totalorder %v390_v32, %v4242_v15 }
 0x15c   : > { %v1266_v10 = vpop.f32.mrb[0].mxu0  ;;  %v1656_v11 = vpop.f32.mrb[0].mxu1 }
 0x15d   : > { %v1657_v13 = vadd.f32 %v1656_v11, %v1266_v10  ;;  %v1268_v18 = vpop.f32.mrb[1].mxu0  ;;  %3275 = vmatmul.mubr.msk.f32.gmra.mrb[106].mxu0 %vm626_vm7, %v3731_v23  ;;  %v1658_v20 = vpop.f32.mrb[1].mxu1  ;;  %3405 = vmatmul.mubr.msk.f32.gmra.mrb[106].mxu1 %vm628_vm8, %v3731_v23  ;;  %vm645_vm7 = vcmp.eq.s32.totalorder %v390_v32, %v4244_v16  ;;  %vm642_vm8 = vcmp.eq.s32.totalorder %v390_v32, %v4246_v17 }
 0x15e   : > { %3276 = vmatprep.mubr.msk.f32.mxu0 %vm631_vm9, %v3731_v23  ;;  %3406 = vmatprep.mubr.msk.f32.mxu1 %vm633_vm10, %v3731_v23  ;;  %vm644_vm9 = vcmp.eq.s32.totalorder %v390_v32, %v4250_v19  ;;  %vm647_vm10 = vcmp.eq.s32.totalorder %v391_v42, %v4242_v15  ;;  %v330_v20 = vadd.s32 504, %v4230_v6 }
 0x15f   : > { %v2046_v22 = vadd.f32 %v1981_v12, %v1657_v13  ;;  %v395_v13 = vadd.s32 %v4240_v14, %v329_v3 }
 0x160   : > { %v1271_v25 = vpop.f32.mrb[2].mxu0  ;;  %v1661_v26 = vpop.f32.mrb[2].mxu1 }
 0x161   : > { %2112 = vst.msk [vmem:[%s4789_s9] sm:$0xff] %vm2111_vm11, %v2046_v22  ;;  %v1662_v28 = vadd.f32 %v1661_v26, %v1271_v25  ;;  %v1273_v29 = vpop.f32.mrb[3].mxu0  ;;  %3277 = vmatmul.mubr.msk.f32.gmra.mrb[108].mxu0 %vm630_vm12, %v3731_v23  ;;  %v1663_v30 = vpop.f32.mrb[3].mxu1  ;;  %3407 = vmatmul.mubr.msk.f32.gmra.mrb[108].mxu1 %vm632_vm13, %v3731_v23  ;;  %vm649_vm12 = vcmp.eq.s32.totalorder %v391_v42, %v4244_v16 }
 0x162   : > { %3278 = vmatprep.mubr.msk.f32.mxu0 %vm635_vm14, %v3731_v23  ;;  %3408 = vmatprep.mubr.msk.f32.mxu1 %vm637_vm15, %v3731_v23  ;;  %vm646_vm13 = vcmp.eq.s32.totalorder %v391_v42, %v4246_v17  ;;  %vm648_vm14 = vcmp.eq.s32.totalorder %v391_v42, %v4250_v19  ;;  %vm651_vm15 = vcmp.eq.s32.totalorder %v392_v49, %v4242_v15  ;;  %v331_v30 = vadd.s32 512, %v4230_v6 }
 0x163   : > { %v2047_v31 = vadd.f32 %v1982_v27, %v1662_v28  ;;  %v396_v29 = vadd.s32 %v4240_v14, %v330_v20 }
 0x164   : > { %v1276_v34 = vpop.f32.mrb[4].mxu0  ;;  %v1666_v35 = vpop.f32.mrb[4].mxu1 }
 0x165   : > { %2113 = vst.msk [vmem:[%s4789_s9 + $0x8] sm:$0xff] %vm2111_vm11, %v2047_v31  ;;  %v1667_v37 = vadd.f32 %v1666_v35, %v1276_v34  ;;  %v1278_v38 = vpop.f32.mrb[5].mxu0  ;;  %3279 = vmatmul.mubr.msk.f32.gmra.mrb[110].mxu0 %vm634_vm0, %v3731_v23  ;;  %v1668_v39 = vpop.f32.mrb[5].mxu1  ;;  %3409 = vmatmul.mubr.msk.f32.gmra.mrb[110].mxu1 %vm636_vm1, %v3731_v23  ;;  %vm653_vm0 = vcmp.eq.s32.totalorder %v392_v49, %v4244_v16 }
 0x166   : > { %3280 = vmatprep.mubr.msk.f32.mxu0 %vm639_vm2, %v3731_v23  ;;  %3410 = vmatprep.mubr.msk.f32.mxu1 %vm641_vm3, %v3731_v23  ;;  %vm650_vm1 = vcmp.eq.s32.totalorder %v392_v49, %v4246_v17  ;;  %vm652_vm2 = vcmp.eq.s32.totalorder %v392_v49, %v4250_v19  ;;  %vm655_vm3 = vcmp.eq.s32.totalorder %v393_v59, %v4242_v15 }
 0x167   : > { %v2048_v41 = vadd.f32 %v1983_v36, %v1667_v37  ;;  %v397_v37 = vadd.s32 %v4240_v14, %v331_v30 }
 0x168   : > { %v1281_v43 = vpop.f32.mrb[6].mxu0  ;;  %v1671_v44 = vpop.f32.mrb[6].mxu1 }
 0x169   : > { %2114 = vst.msk [vmem:[%s4789_s9 + $0x10] sm:$0xff] %vm2111_vm11, %v2048_v41  ;;  %v1672_v46 = vadd.f32 %v1671_v44, %v1281_v43  ;;  %v1283_v47 = vpop.f32.mrb[7].mxu0  ;;  %3281 = vmatmul.mubr.msk.f32.gmra.mrb[112].mxu0 %vm638_vm4, %v3731_v23  ;;  %v1673_v48 = vpop.f32.mrb[7].mxu1  ;;  %3411 = vmatmul.mubr.msk.f32.gmra.mrb[112].mxu1 %vm640_vm5, %v3731_v23  ;;  %vm657_vm4 = vcmp.eq.s32.totalorder %v393_v59, %v4244_v16 }
 0x16a   : > { %3282 = vmatprep.mubr.msk.f32.mxu0 %vm643_vm6, %v3731_v23  ;;  %3412 = vmatprep.mubr.msk.f32.mxu1 %vm645_vm7, %v3731_v23  ;;  %vm654_vm5 = vcmp.eq.s32.totalorder %v393_v59, %v4246_v17  ;;  %vm656_vm6 = vcmp.eq.s32.totalorder %v393_v59, %v4250_v19  ;;  %vm659_vm7 = vcmp.eq.s32.totalorder %v394_v5, %v4242_v15 }
 0x16b   : > { %v2049_v50 = vadd.f32 %v1984_v45, %v1672_v46  ;;  %v1991_v46 = vld [vmem:[%s4789_s9 + $0x50] sm:$0xff] }
 0x16c   : > { %v1286_v52 = vpop.f32.mrb[8].mxu0  ;;  %v1676_v53 = vpop.f32.mrb[8].mxu1 }
 0x16d   : > { %2115 = vst.msk [vmem:[%s4789_s9 + $0x18] sm:$0xff] %vm2111_vm11, %v2049_v50  ;;  %v1677_v55 = vadd.f32 %v1676_v53, %v1286_v52  ;;  %v1288_v56 = vpop.f32.mrb[9].mxu0  ;;  %3283 = vmatmul.mubr.msk.f32.gmra.mrb[114].mxu0 %vm642_vm8, %v3731_v23  ;;  %v1678_v57 = vpop.f32.mrb[9].mxu1  ;;  %3413 = vmatmul.mubr.msk.f32.gmra.mrb[114].mxu1 %vm644_vm9, %v3731_v23  ;;  %vm661_vm8 = vcmp.eq.s32.totalorder %v394_v5, %v4244_v16 }
 0x16e   : > { %3284 = vmatprep.mubr.msk.f32.mxu0 %vm647_vm10, %v3731_v23  ;;  %3414 = vmatprep.mubr.msk.f32.mxu1 %vm649_vm12, %v3731_v23  ;;  %vm658_vm9 = vcmp.eq.s32.totalorder %v394_v5, %v4246_v17  ;;  %vm660_vm10 = vcmp.eq.s32.totalorder %v394_v5, %v4250_v19  ;;  %vm663_vm12 = vcmp.eq.s32.totalorder %v395_v13, %v4242_v15  ;;  %v1993_v57 = vld [vmem:[%s4789_s9 + $0x60] sm:$0xff]  ;;  %v1995_v5 = vld [vmem:[%s4789_s9 + $0x70] sm:$0xff] }
 0x16f   : > { %v2050_v58 = vadd.f32 %v1985_v54, %v1677_v55 }
 0x170   : > { %v1291_v61 = vpop.f32.mrb[10].mxu0  ;;  %v1681_v62 = vpop.f32.mrb[10].mxu1 }
 0x171   : > { %2116 = vst.msk [vmem:[%s4789_s9 + $0x20] sm:$0xff] %vm2111_vm11, %v2050_v58  ;;  %v1682_v0 = vadd.f32 %v1681_v62, %v1291_v61  ;;  %v1293_v1 = vpop.f32.mrb[11].mxu0  ;;  %3285 = vmatmul.mubr.msk.f32.gmra.mrb[116].mxu0 %vm646_vm13, %v3731_v23  ;;  %v1683_v2 = vpop.f32.mrb[11].mxu1  ;;  %3415 = vmatmul.mubr.msk.f32.gmra.mrb[116].mxu1 %vm648_vm14, %v3731_v23  ;;  %vm665_vm13 = vcmp.eq.s32.totalorder %v395_v13, %v4244_v16 }
 0x172   : > { %3286 = vmatprep.mubr.msk.f32.mxu0 %vm651_vm15, %v3731_v23  ;;  %3416 = vmatprep.mubr.msk.f32.mxu1 %vm653_vm0, %v3731_v23  ;;  %vm662_vm14 = vcmp.eq.s32.totalorder %v395_v13, %v4246_v17  ;;  %vm664_vm15 = vcmp.eq.s32.totalorder %v395_v13, %v4250_v19  ;;  %vm667_vm0 = vcmp.eq.s32.totalorder %v396_v29, %v4242_v15  ;;  %v1996_v13 = vld [vmem:[%s4789_s9 + $0x78] sm:$0xff] }
 0x173   : > { %v2051_v4 = vadd.f32 %v1986_v63, %v1682_v0  ;;  %v1994_v63 = vld [vmem:[%s4789_s9 + $0x68] sm:$0xff] }
 0x174   : > { %v1296_v7 = vpop.f32.mrb[12].mxu0  ;;  %v1686_v8 = vpop.f32.mrb[12].mxu1 }
 0x175   : > { %2117 = vst.msk [vmem:[%s4789_s9 + $0x28] sm:$0xff] %vm2111_vm11, %v2051_v4  ;;  %v1687_v10 = vadd.f32 %v1686_v8, %v1296_v7  ;;  %v1298_v11 = vpop.f32.mrb[13].mxu0  ;;  %3287 = vmatmul.mubr.msk.f32.gmra.mrb[118].mxu0 %vm650_vm1, %v3731_v23  ;;  %v1688_v12 = vpop.f32.mrb[13].mxu1  ;;  %3417 = vmatmul.mubr.msk.f32.gmra.mrb[118].mxu1 %vm652_vm2, %v3731_v23  ;;  %vm669_vm1 = vcmp.eq.s32.totalorder %v396_v29, %v4244_v16 }
 0x176   : > { %3288 = vmatprep.mubr.msk.f32.mxu0 %vm655_vm3, %v3731_v23  ;;  %3418 = vmatprep.mubr.msk.f32.mxu1 %vm657_vm4, %v3731_v23  ;;  %vm666_vm2 = vcmp.eq.s32.totalorder %v396_v29, %v4246_v17  ;;  %vm668_vm3 = vcmp.eq.s32.totalorder %v396_v29, %v4250_v19  ;;  %vm671_vm4 = vcmp.eq.s32.totalorder %v397_v37, %v4242_v15 }
 0x177   : > { %v2052_v18 = vadd.f32 %v1987_v9, %v1687_v10 }
 0x178   : > { %v1301_v21 = vpop.f32.mrb[14].mxu0  ;;  %v1691_v22 = vpop.f32.mrb[14].mxu1 }
 0x179   : > { %2118 = vst.msk [vmem:[%s4789_s9 + $0x30] sm:$0xff] %vm2111_vm11, %v2052_v18  ;;  %v1692_v25 = vadd.f32 %v1691_v22, %v1301_v21  ;;  %v1303_v26 = vpop.f32.mrb[15].mxu0  ;;  %3289 = vmatmul.mubr.msk.f32.gmra.mrb[120].mxu0 %vm654_vm5, %v3731_v23  ;;  %v1693_v27 = vpop.f32.mrb[15].mxu1  ;;  %3419 = vmatmul.mubr.msk.f32.gmra.mrb[120].mxu1 %vm656_vm6, %v3731_v23  ;;  %vm673_vm5 = vcmp.eq.s32.totalorder %v397_v37, %v4244_v16 }
 0x17a   : > { %3290 = vmatprep.mubr.msk.f32.mxu0 %vm659_vm7, %v3731_v23  ;;  %3420 = vmatprep.mubr.msk.f32.mxu1 %vm661_vm8, %v3731_v23  ;;  %vm670_vm6 = vcmp.eq.s32.totalorder %v397_v37, %v4246_v17  ;;  %vm672_vm7 = vcmp.eq.s32.totalorder %v397_v37, %v4250_v19  ;;  %v1997_v26 = vld [vmem:[%s4789_s9 + $0x80] sm:$0xff] }
 0x17b   : > { %v2053_v28 = vadd.f32 %v1988_v24, %v1692_v25 }
 0x17c   : > { %v1306_v31 = vpop.f32.mrb[16].mxu0  ;;  %v1696_v32 = vpop.f32.mrb[16].mxu1 }
 0x17d   : > { %2119 = vst.msk [vmem:[%s4789_s9 + $0x38] sm:$0xff] %vm2111_vm11, %v2053_v28  ;;  %v1697_v34 = vadd.f32 %v1696_v32, %v1306_v31  ;;  %v1308_v35 = vpop.f32.mrb[17].mxu0  ;;  %3291 = vmatmul.mubr.msk.f32.gmra.mrb[122].mxu0 %vm658_vm9, %v3731_v23  ;;  %v1698_v36 = vpop.f32.mrb[17].mxu1  ;;  %3421 = vmatmul.mubr.msk.f32.gmra.mrb[122].mxu1 %vm660_vm10, %v3731_v23 }
 0x17e   : > { %3292 = vmatprep.mubr.msk.f32.mxu0 %vm663_vm12, %v3731_v23  ;;  %3422 = vmatprep.mubr.msk.f32.mxu1 %vm665_vm13, %v3731_v23 }
 0x17f   : > { %v2054_v6 = vadd.f32 %v1989_v33, %v1697_v34  ;;  %v1998_v33 = vld [vmem:[%s4789_s9 + $0x88] sm:$0xff] }
 0x180   : > { %v1311_v38 = vpop.f32.mrb[18].mxu0  ;;  %v1701_v39 = vpop.f32.mrb[18].mxu1 }
 0x181   : > { %2120 = vst.msk [vmem:[%s4789_s9 + $0x40] sm:$0xff] %vm2111_vm11, %v2054_v6  ;;  %v1702_v41 = vadd.f32 %v1701_v39, %v1311_v38  ;;  %v1313_v42 = vpop.f32.mrb[19].mxu0  ;;  %3293 = vmatmul.mubr.msk.f32.gmra.mrb[124].mxu0 %vm662_vm14, %v3731_v23  ;;  %v1703_v43 = vpop.f32.mrb[19].mxu1  ;;  %3423 = vmatmul.mubr.msk.f32.gmra.mrb[124].mxu1 %vm664_vm15, %v3731_v23  ;;  %v1999_v39 = vld [vmem:[%s4789_s9 + $0x90] sm:$0xff] }
 0x182   : > { %3294 = vmatprep.mubr.msk.f32.mxu0 %vm667_vm0, %v3731_v23  ;;  %3424 = vmatprep.mubr.msk.f32.mxu1 %vm669_vm1, %v3731_v23 }
 0x183   : > { %v2055_v14 = vadd.f32 %v1990_v40, %v1702_v41 }
 0x184   : > { %v1316_v44 = vpop.f32.mrb[20].mxu0  ;;  %v1706_v45 = vpop.f32.mrb[20].mxu1 }
 0x185   : > { %2121 = vst.msk [vmem:[%s4789_s9 + $0x48] sm:$0xff] %vm2111_vm11, %v2055_v14  ;;  %v1707_v47 = vadd.f32 %v1706_v45, %v1316_v44  ;;  %v1318_v48 = vpop.f32.mrb[21].mxu0  ;;  %3295 = vmatmul.mubr.msk.f32.gmra.mrb[126].mxu0 %vm666_vm2, %v3731_v23  ;;  %v1708_v49 = vpop.f32.mrb[21].mxu1  ;;  %3425 = vmatmul.mubr.msk.f32.gmra.mrb[126].mxu1 %vm668_vm3, %v3731_v23  ;;  %v2000_v45 = vld [vmem:[%s4789_s9 + $0x98] sm:$0xff] }
 0x186   : > { %3296 = vmatprep.mubr.msk.f32.mxu0 %vm671_vm4, %v3731_v23  ;;  %3426 = vmatprep.mubr.msk.f32.mxu1 %vm673_vm5, %v3731_v23 }
 0x187   : > { %v2056_v15 = vadd.f32 %v1991_v46, %v1707_v47 }
 0x188   : > { %v1321_v16 = vpop.f32.mrb[22].mxu0  ;;  %v1711_v50 = vpop.f32.mrb[22].mxu1 }
 0x189   : > { %2122 = vst.msk [vmem:[%s4789_s9 + $0x50] sm:$0xff] %vm2111_vm11, %v2056_v15  ;;  %v1712_v52 = vadd.f32 %v1711_v50, %v1321_v16  ;;  %v1323_v53 = vpop.f32.mrb[23].mxu0  ;;  %3297 = vmatmul.mubr.msk.f32.gmra.mrb[128].mxu0 %vm670_vm6, %v3731_v23  ;;  %v1713_v54 = vpop.f32.mrb[23].mxu1  ;;  %3427 = vmatmul.mubr.msk.f32.gmra.mrb[128].mxu1 %vm672_vm7, %v3731_v23  ;;  %v2001_v50 = vld [vmem:[%s4789_s9 + $0xa0] sm:$0xff] }
 0x18b   : > { %v2057_v55 = vadd.f32 %v1992_v51, %v1712_v52 }
 0x18c   : > { %v1326_v17 = vpop.f32.mrb[24].mxu0  ;;  %v1716_v56 = vpop.f32.mrb[24].mxu1 }
 0x18d   : > { %2123 = vst.msk [vmem:[%s4789_s9 + $0x58] sm:$0xff] %vm2111_vm11, %v2057_v55  ;;  %v1717_v19 = vadd.f32 %v1716_v56, %v1326_v17  ;;  %v1328_v58 = vpop.f32.mrb[25].mxu0  ;;  %v1718_v59 = vpop.f32.mrb[25].mxu1  ;;  %v2002_v56 = vld [vmem:[%s4789_s9 + $0xa8] sm:$0xff] }
 0x18f   : > { %v2058_v60 = vadd.f32 %v1993_v57, %v1717_v19 }
 0x190   : > { %v1331_v61 = vpop.f32.mrb[26].mxu0  ;;  %v1721_v62 = vpop.f32.mrb[26].mxu1 }
 0x191   : > { %2124 = vst.msk [vmem:[%s4789_s9 + $0x60] sm:$0xff] %vm2111_vm11, %v2058_v60  ;;  %v1722_v23 = vadd.f32 %v1721_v62, %v1331_v61  ;;  %v1333_v0 = vpop.f32.mrb[27].mxu0  ;;  %v1723_v1 = vpop.f32.mrb[27].mxu1  ;;  %v2003_v62 = vld [vmem:[%s4789_s9 + $0xb0] sm:$0xff] }
 0x193   : > { %v2059_v2 = vadd.f32 %v1994_v63, %v1722_v23 }
 0x194   : > { %v1336_v3 = vpop.f32.mrb[28].mxu0  ;;  %v1726_v4 = vpop.f32.mrb[28].mxu1 }
 0x195   : > { %2125 = vst.msk [vmem:[%s4789_s9 + $0x68] sm:$0xff] %vm2111_vm11, %v2059_v2  ;;  %v1727_v7 = vadd.f32 %v1726_v4, %v1336_v3  ;;  %v1338_v8 = vpop.f32.mrb[29].mxu0  ;;  %v1728_v9 = vpop.f32.mrb[29].mxu1  ;;  %v2004_v4 = vld [vmem:[%s4789_s9 + $0xb8] sm:$0xff] }
 0x197   : > { %v2060_v10 = vadd.f32 %v1995_v5, %v1727_v7 }
 0x198   : > { %v1341_v11 = vpop.f32.mrb[30].mxu0  ;;  %v1731_v12 = vpop.f32.mrb[30].mxu1 }
 0x199   : > { %2126 = vst.msk [vmem:[%s4789_s9 + $0x70] sm:$0xff] %vm2111_vm11, %v2060_v10  ;;  %v1732_v18 = vadd.f32 %v1731_v12, %v1341_v11  ;;  %v1343_v20 = vpop.f32.mrb[31].mxu0  ;;  %v1733_v21 = vpop.f32.mrb[31].mxu1  ;;  %v2005_v12 = vld [vmem:[%s4789_s9 + $0xc0] sm:$0xff] }
 0x19b   : > { %v2061_v22 = vadd.f32 %v1996_v13, %v1732_v18 }
 0x19c   : > { %v1346_v24 = vpop.f32.mrb[32].mxu0  ;;  %v1736_v25 = vpop.f32.mrb[32].mxu1 }
 0x19d   : > { %2127 = vst.msk [vmem:[%s4789_s9 + $0x78] sm:$0xff] %vm2111_vm11, %v2061_v22  ;;  %v1737_v27 = vadd.f32 %v1736_v25, %v1346_v24  ;;  %v1348_v28 = vpop.f32.mrb[33].mxu0  ;;  %v1738_v29 = vpop.f32.mrb[33].mxu1  ;;  %v2006_v25 = vld [vmem:[%s4789_s9 + $0xc8] sm:$0xff] }
 0x19f   : > { %v2062_v30 = vadd.f32 %v1997_v26, %v1737_v27 }
 0x1a0   : > { %v1351_v31 = vpop.f32.mrb[34].mxu0  ;;  %v1741_v32 = vpop.f32.mrb[34].mxu1 }
 0x1a1   : > { %2128 = vst.msk [vmem:[%s4789_s9 + $0x80] sm:$0xff] %vm2111_vm11, %v2062_v30  ;;  %v1742_v34 = vadd.f32 %v1741_v32, %v1351_v31  ;;  %v1353_v35 = vpop.f32.mrb[35].mxu0  ;;  %v1743_v36 = vpop.f32.mrb[35].mxu1  ;;  %v2007_v32 = vld [vmem:[%s4789_s9 + $0xd0] sm:$0xff] }
 0x1a3   : > { %v2063_v6 = vadd.f32 %v1998_v33, %v1742_v34 }
 0x1a4   : > { %v1356_v37 = vpop.f32.mrb[36].mxu0  ;;  %v1746_v38 = vpop.f32.mrb[36].mxu1 }
 0x1a5   : > { %2129 = vst.msk [vmem:[%s4789_s9 + $0x88] sm:$0xff] %vm2111_vm11, %v2063_v6  ;;  %v1747_v40 = vadd.f32 %v1746_v38, %v1356_v37  ;;  %v1358_v41 = vpop.f32.mrb[37].mxu0  ;;  %v1748_v42 = vpop.f32.mrb[37].mxu1  ;;  %v2008_v38 = vld [vmem:[%s4789_s9 + $0xd8] sm:$0xff] }
 0x1a7   : > { %v2064_v43 = vadd.f32 %v1999_v39, %v1747_v40 }
 0x1a8   : > { %v1361_v14 = vpop.f32.mrb[38].mxu0  ;;  %v1751_v44 = vpop.f32.mrb[38].mxu1 }
 0x1a9   : > { %2130 = vst.msk [vmem:[%s4789_s9 + $0x90] sm:$0xff] %vm2111_vm11, %v2064_v43  ;;  %v1752_v46 = vadd.f32 %v1751_v44, %v1361_v14  ;;  %v1363_v47 = vpop.f32.mrb[39].mxu0  ;;  %v1753_v48 = vpop.f32.mrb[39].mxu1  ;;  %v2009_v44 = vld [vmem:[%s4789_s9 + $0xe0] sm:$0xff] }
 0x1ab   : > { %v2065_v49 = vadd.f32 %v2000_v45, %v1752_v46 }
 0x1ac   : > { %v1366_v15 = vpop.f32.mrb[40].mxu0  ;;  %v1756_v16 = vpop.f32.mrb[40].mxu1 }
 0x1ad   : > { %2131 = vst.msk [vmem:[%s4789_s9 + $0x98] sm:$0xff] %vm2111_vm11, %v2065_v49  ;;  %v1757_v51 = vadd.f32 %v1756_v16, %v1366_v15  ;;  %v1368_v52 = vpop.f32.mrb[41].mxu0  ;;  %v1758_v53 = vpop.f32.mrb[41].mxu1  ;;  %v2010_v16 = vld [vmem:[%s4789_s9 + $0xe8] sm:$0xff] }
 0x1af   : > { %v2066_v54 = vadd.f32 %v2001_v50, %v1757_v51 }
 0x1b0   : > { %v1371_v55 = vpop.f32.mrb[42].mxu0  ;;  %v1761_v17 = vpop.f32.mrb[42].mxu1 }
 0x1b1   : > { %2132 = vst.msk [vmem:[%s4789_s9 + $0xa0] sm:$0xff] %vm2111_vm11, %v2066_v54  ;;  %v1762_v57 = vadd.f32 %v1761_v17, %v1371_v55  ;;  %v1373_v19 = vpop.f32.mrb[43].mxu0  ;;  %v1763_v58 = vpop.f32.mrb[43].mxu1  ;;  %v2011_v17 = vld [vmem:[%s4789_s9 + $0xf0] sm:$0xff] }
 0x1b3   : > { %v2067_v59 = vadd.f32 %v2002_v56, %v1762_v57 }
 0x1b4   : > { %v1376_v60 = vpop.f32.mrb[44].mxu0  ;;  %v1766_v61 = vpop.f32.mrb[44].mxu1 }
 0x1b5   : > { %2133 = vst.msk [vmem:[%s4789_s9 + $0xa8] sm:$0xff] %vm2111_vm11, %v2067_v59  ;;  %v1767_v63 = vadd.f32 %v1766_v61, %v1376_v60  ;;  %v1378_v23 = vpop.f32.mrb[45].mxu0  ;;  %v1768_v0 = vpop.f32.mrb[45].mxu1  ;;  %v2012_v61 = vld [vmem:[%s4789_s9 + $0xf8] sm:$0xff] }
 0x1b7   : > { %v2068_v1 = vadd.f32 %v2003_v62, %v1767_v63 }
 0x1b8   : > { %v1381_v2 = vpop.f32.mrb[46].mxu0  ;;  %v1771_v3 = vpop.f32.mrb[46].mxu1 }
 0x1b9   : > { %2134 = vst.msk [vmem:[%s4789_s9 + $0xb0] sm:$0xff] %vm2111_vm11, %v2068_v1  ;;  %v1772_v5 = vadd.f32 %v1771_v3, %v1381_v2  ;;  %v1383_v7 = vpop.f32.mrb[47].mxu0  ;;  %v1773_v8 = vpop.f32.mrb[47].mxu1  ;;  %v2013_v3 = vld [vmem:[%s4789_s9 + $0x100] sm:$0xff] }
 0x1bb   : > { %v2069_v9 = vadd.f32 %v2004_v4, %v1772_v5 }
 0x1bc   : > { %v1386_v10 = vpop.f32.mrb[48].mxu0  ;;  %v1776_v11 = vpop.f32.mrb[48].mxu1 }
 0x1bd   : > { %2135 = vst.msk [vmem:[%s4789_s9 + $0xb8] sm:$0xff] %vm2111_vm11, %v2069_v9  ;;  %v1777_v13 = vadd.f32 %v1776_v11, %v1386_v10  ;;  %v1388_v18 = vpop.f32.mrb[49].mxu0  ;;  %v1778_v20 = vpop.f32.mrb[49].mxu1  ;;  %v2014_v11 = vld [vmem:[%s4789_s9 + $0x108] sm:$0xff] }
 0x1bf   : > { %v2070_v21 = vadd.f32 %v2005_v12, %v1777_v13 }
 0x1c0   : > { %v1391_v22 = vpop.f32.mrb[50].mxu0  ;;  %v1781_v24 = vpop.f32.mrb[50].mxu1 }
 0x1c1   : > { %2136 = vst.msk [vmem:[%s4789_s9 + $0xc0] sm:$0xff] %vm2111_vm11, %v2070_v21  ;;  %v1782_v26 = vadd.f32 %v1781_v24, %v1391_v22  ;;  %v1393_v27 = vpop.f32.mrb[51].mxu0  ;;  %v1783_v28 = vpop.f32.mrb[51].mxu1  ;;  %v2015_v24 = vld [vmem:[%s4789_s9 + $0x110] sm:$0xff] }
 0x1c3   : > { %v2071_v29 = vadd.f32 %v2006_v25, %v1782_v26 }
 0x1c4   : > { %v1396_v30 = vpop.f32.mrb[52].mxu0  ;;  %v1786_v31 = vpop.f32.mrb[52].mxu1 }
 0x1c5   : > { %2137 = vst.msk [vmem:[%s4789_s9 + $0xc8] sm:$0xff] %vm2111_vm11, %v2071_v29  ;;  %v1787_v33 = vadd.f32 %v1786_v31, %v1396_v30  ;;  %v1398_v34 = vpop.f32.mrb[53].mxu0  ;;  %v1788_v35 = vpop.f32.mrb[53].mxu1  ;;  %v2016_v31 = vld [vmem:[%s4789_s9 + $0x118] sm:$0xff] }
 0x1c7   : > { %v2072_v36 = vadd.f32 %v2007_v32, %v1787_v33 }
 0x1c8   : > { %v1401_v6 = vpop.f32.mrb[54].mxu0  ;;  %v1791_v37 = vpop.f32.mrb[54].mxu1 }
 0x1c9   : > { %2138 = vst.msk [vmem:[%s4789_s9 + $0xd0] sm:$0xff] %vm2111_vm11, %v2072_v36  ;;  %v1792_v39 = vadd.f32 %v1791_v37, %v1401_v6  ;;  %v1403_v40 = vpop.f32.mrb[55].mxu0  ;;  %v1793_v41 = vpop.f32.mrb[55].mxu1  ;;  %v2017_v37 = vld [vmem:[%s4789_s9 + $0x120] sm:$0xff] }
 0x1cb   : > { %v2073_v42 = vadd.f32 %v2008_v38, %v1792_v39 }
 0x1cc   : > { %v1406_v43 = vpop.f32.mrb[56].mxu0  ;;  %v1796_v14 = vpop.f32.mrb[56].mxu1 }
 0x1cd   : > { %2139 = vst.msk [vmem:[%s4789_s9 + $0xd8] sm:$0xff] %vm2111_vm11, %v2073_v42  ;;  %v1797_v45 = vadd.f32 %v1796_v14, %v1406_v43  ;;  %v1408_v46 = vpop.f32.mrb[57].mxu0  ;;  %v1798_v47 = vpop.f32.mrb[57].mxu1  ;;  %v2018_v14 = vld [vmem:[%s4789_s9 + $0x128] sm:$0xff] }
 0x1cf   : > { %v2074_v48 = vadd.f32 %v2009_v44, %v1797_v45 }
 0x1d0   : > { %v1411_v49 = vpop.f32.mrb[58].mxu0  ;;  %v1801_v15 = vpop.f32.mrb[58].mxu1 }
 0x1d1   : > { %2140 = vst.msk [vmem:[%s4789_s9 + $0xe0] sm:$0xff] %vm2111_vm11, %v2074_v48  ;;  %v1802_v50 = vadd.f32 %v1801_v15, %v1411_v49  ;;  %v1413_v51 = vpop.f32.mrb[59].mxu0  ;;  %v1803_v52 = vpop.f32.mrb[59].mxu1  ;;  %v2019_v15 = vld [vmem:[%s4789_s9 + $0x130] sm:$0xff] }
 0x1d3   : > { %v2075_v53 = vadd.f32 %v2010_v16, %v1802_v50 }
 0x1d4   : > { %v1416_v54 = vpop.f32.mrb[60].mxu0  ;;  %v1806_v55 = vpop.f32.mrb[60].mxu1 }
 0x1d5   : > { %2141 = vst.msk [vmem:[%s4789_s9 + $0xe8] sm:$0xff] %vm2111_vm11, %v2075_v53  ;;  %v1807_v56 = vadd.f32 %v1806_v55, %v1416_v54  ;;  %v1418_v57 = vpop.f32.mrb[61].mxu0  ;;  %v1808_v19 = vpop.f32.mrb[61].mxu1  ;;  %v2020_v55 = vld [vmem:[%s4789_s9 + $0x138] sm:$0xff] }
 0x1d7   : > { %v2076_v58 = vadd.f32 %v2011_v17, %v1807_v56 }
 0x1d8   : > { %v1421_v59 = vpop.f32.mrb[62].mxu0  ;;  %v1811_v60 = vpop.f32.mrb[62].mxu1 }
 0x1d9   : > { %2142 = vst.msk [vmem:[%s4789_s9 + $0xf0] sm:$0xff] %vm2111_vm11, %v2076_v58  ;;  %v1812_v62 = vadd.f32 %v1811_v60, %v1421_v59  ;;  %v1423_v63 = vpop.f32.mrb[63].mxu0  ;;  %v1813_v23 = vpop.f32.mrb[63].mxu1  ;;  %v2021_v60 = vld [vmem:[%s4789_s9 + $0x140] sm:$0xff] }
 0x1db   : > { %v2077_v0 = vadd.f32 %v2012_v61, %v1812_v62 }
 0x1dc   : > { %v1426_v1 = vpop.f32.mrb[64].mxu0  ;;  %v1816_v2 = vpop.f32.mrb[64].mxu1 }
 0x1dd   : > { %2143 = vst.msk [vmem:[%s4789_s9 + $0xf8] sm:$0xff] %vm2111_vm11, %v2077_v0  ;;  %v1817_v4 = vadd.f32 %v1816_v2, %v1426_v1  ;;  %v1428_v5 = vpop.f32.mrb[65].mxu0  ;;  %v1818_v7 = vpop.f32.mrb[65].mxu1  ;;  %v2022_v2 = vld [vmem:[%s4789_s9 + $0x148] sm:$0xff] }
 0x1df   : > { %v2078_v8 = vadd.f32 %v2013_v3, %v1817_v4 }
 0x1e0   : > { %v1431_v9 = vpop.f32.mrb[66].mxu0  ;;  %v1821_v10 = vpop.f32.mrb[66].mxu1 }
 0x1e1   : > { %2144 = vst.msk [vmem:[%s4789_s9 + $0x100] sm:$0xff] %vm2111_vm11, %v2078_v8  ;;  %v1822_v12 = vadd.f32 %v1821_v10, %v1431_v9  ;;  %v1433_v13 = vpop.f32.mrb[67].mxu0  ;;  %v1823_v18 = vpop.f32.mrb[67].mxu1  ;;  %v2023_v10 = vld [vmem:[%s4789_s9 + $0x150] sm:$0xff] }
 0x1e3   : > { %v2079_v20 = vadd.f32 %v2014_v11, %v1822_v12 }
 0x1e4   : > { %v1436_v21 = vpop.f32.mrb[68].mxu0  ;;  %v1826_v22 = vpop.f32.mrb[68].mxu1 }
 0x1e5   : > { %2145 = vst.msk [vmem:[%s4789_s9 + $0x108] sm:$0xff] %vm2111_vm11, %v2079_v20  ;;  %v1827_v25 = vadd.f32 %v1826_v22, %v1436_v21  ;;  %v1438_v26 = vpop.f32.mrb[69].mxu0  ;;  %v1828_v27 = vpop.f32.mrb[69].mxu1  ;;  %v2024_v22 = vld [vmem:[%s4789_s9 + $0x158] sm:$0xff] }
 0x1e7   : > { %v2080_v28 = vadd.f32 %v2015_v24, %v1827_v25 }
 0x1e8   : > { %v1441_v29 = vpop.f32.mrb[70].mxu0  ;;  %v1831_v30 = vpop.f32.mrb[70].mxu1 }
 0x1e9   : > { %2146 = vst.msk [vmem:[%s4789_s9 + $0x110] sm:$0xff] %vm2111_vm11, %v2080_v28  ;;  %v1832_v32 = vadd.f32 %v1831_v30, %v1441_v29  ;;  %v1443_v33 = vpop.f32.mrb[71].mxu0  ;;  %v1833_v34 = vpop.f32.mrb[71].mxu1  ;;  %v2025_v30 = vld [vmem:[%s4789_s9 + $0x160] sm:$0xff] }
 0x1eb   : > { %v2081_v35 = vadd.f32 %v2016_v31, %v1832_v32 }
 0x1ec   : > { %v1446_v36 = vpop.f32.mrb[72].mxu0  ;;  %v1836_v6 = vpop.f32.mrb[72].mxu1 }
 0x1ed   : > { %2147 = vst.msk [vmem:[%s4789_s9 + $0x118] sm:$0xff] %vm2111_vm11, %v2081_v35  ;;  %v1837_v38 = vadd.f32 %v1836_v6, %v1446_v36  ;;  %v1448_v39 = vpop.f32.mrb[73].mxu0  ;;  %v1838_v40 = vpop.f32.mrb[73].mxu1  ;;  %v2026_v6 = vld [vmem:[%s4789_s9 + $0x168] sm:$0xff] }
 0x1ef   : > { %v2082_v41 = vadd.f32 %v2017_v37, %v1837_v38 }
 0x1f0   : > { %v1451_v42 = vpop.f32.mrb[74].mxu0  ;;  %v1841_v43 = vpop.f32.mrb[74].mxu1 }
 0x1f1   : > { %2148 = vst.msk [vmem:[%s4789_s9 + $0x120] sm:$0xff] %vm2111_vm11, %v2082_v41  ;;  %v1842_v44 = vadd.f32 %v1841_v43, %v1451_v42  ;;  %v1453_v45 = vpop.f32.mrb[75].mxu0  ;;  %v1843_v46 = vpop.f32.mrb[75].mxu1  ;;  %v2027_v43 = vld [vmem:[%s4789_s9 + $0x170] sm:$0xff] }
 0x1f3   : > { %v2083_v47 = vadd.f32 %v2018_v14, %v1842_v44 }
 0x1f4   : > { %v1456_v48 = vpop.f32.mrb[76].mxu0  ;;  %v1846_v49 = vpop.f32.mrb[76].mxu1 }
 0x1f5   : > { %2149 = vst.msk [vmem:[%s4789_s9 + $0x128] sm:$0xff] %vm2111_vm11, %v2083_v47  ;;  %v1847_v16 = vadd.f32 %v1846_v49, %v1456_v48  ;;  %v1458_v50 = vpop.f32.mrb[77].mxu0  ;;  %v1848_v51 = vpop.f32.mrb[77].mxu1  ;;  %v2028_v49 = vld [vmem:[%s4789_s9 + $0x178] sm:$0xff] }
 0x1f7   : > { %v2084_v52 = vadd.f32 %v2019_v15, %v1847_v16 }
 0x1f8   : > { %v1461_v53 = vpop.f32.mrb[78].mxu0  ;;  %v1851_v54 = vpop.f32.mrb[78].mxu1 }
 0x1f9   : > { %2150 = vst.msk [vmem:[%s4789_s9 + $0x130] sm:$0xff] %vm2111_vm11, %v2084_v52  ;;  %v1852_v17 = vadd.f32 %v1851_v54, %v1461_v53  ;;  %v1463_v56 = vpop.f32.mrb[79].mxu0  ;;  %v1853_v57 = vpop.f32.mrb[79].mxu1  ;;  %v2029_v54 = vld [vmem:[%s4789_s9 + $0x180] sm:$0xff] }
 0x1fb   : > { %v2085_v19 = vadd.f32 %v2020_v55, %v1852_v17 }
 0x1fc   : > { %v1466_v58 = vpop.f32.mrb[80].mxu0  ;;  %v1856_v59 = vpop.f32.mrb[80].mxu1 }
 0x1fd   : > { %2151 = vst.msk [vmem:[%s4789_s9 + $0x138] sm:$0xff] %vm2111_vm11, %v2085_v19  ;;  %v1857_v61 = vadd.f32 %v1856_v59, %v1466_v58  ;;  %v1468_v62 = vpop.f32.mrb[81].mxu0  ;;  %v1858_v63 = vpop.f32.mrb[81].mxu1  ;;  %v2030_v59 = vld [vmem:[%s4789_s9 + $0x188] sm:$0xff] }
 0x1ff   : > { %v2086_v23 = vadd.f32 %v2021_v60, %v1857_v61 }
 0x200   : > { %v1471_v0 = vpop.f32.mrb[82].mxu0  ;;  %v1861_v1 = vpop.f32.mrb[82].mxu1 }
 0x201   : > { %2152 = vst.msk [vmem:[%s4789_s9 + $0x140] sm:$0xff] %vm2111_vm11, %v2086_v23  ;;  %v1862_v3 = vadd.f32 %v1861_v1, %v1471_v0  ;;  %v1473_v4 = vpop.f32.mrb[83].mxu0  ;;  %v1863_v5 = vpop.f32.mrb[83].mxu1  ;;  %v2031_v1 = vld [vmem:[%s4789_s9 + $0x190] sm:$0xff] }
 0x203   : > { %v2087_v7 = vadd.f32 %v2022_v2, %v1862_v3 }
 0x204   : > { %v1476_v8 = vpop.f32.mrb[84].mxu0  ;;  %v1866_v9 = vpop.f32.mrb[84].mxu1 }
 0x205   : > { %2153 = vst.msk [vmem:[%s4789_s9 + $0x148] sm:$0xff] %vm2111_vm11, %v2087_v7  ;;  %v1867_v11 = vadd.f32 %v1866_v9, %v1476_v8  ;;  %v1478_v12 = vpop.f32.mrb[85].mxu0  ;;  %v1868_v13 = vpop.f32.mrb[85].mxu1  ;;  %v2032_v9 = vld [vmem:[%s4789_s9 + $0x198] sm:$0xff] }
 0x207   : > { %v2088_v18 = vadd.f32 %v2023_v10, %v1867_v11 }
 0x208   : > { %v1481_v20 = vpop.f32.mrb[86].mxu0  ;;  %v1871_v21 = vpop.f32.mrb[86].mxu1 }
 0x209   : > { %2154 = vst.msk [vmem:[%s4789_s9 + $0x150] sm:$0xff] %vm2111_vm11, %v2088_v18  ;;  %v1872_v24 = vadd.f32 %v1871_v21, %v1481_v20  ;;  %v1483_v25 = vpop.f32.mrb[87].mxu0  ;;  %v1873_v26 = vpop.f32.mrb[87].mxu1  ;;  %v2033_v21 = vld [vmem:[%s4789_s9 + $0x1a0] sm:$0xff] }
 0x20b   : > { %v2089_v27 = vadd.f32 %v2024_v22, %v1872_v24 }
 0x20c   : > { %v1486_v28 = vpop.f32.mrb[88].mxu0  ;;  %v1876_v29 = vpop.f32.mrb[88].mxu1 }
 0x20d   : > { %2155 = vst.msk [vmem:[%s4789_s9 + $0x158] sm:$0xff] %vm2111_vm11, %v2089_v27  ;;  %v1877_v31 = vadd.f32 %v1876_v29, %v1486_v28  ;;  %v1488_v32 = vpop.f32.mrb[89].mxu0  ;;  %v1878_v33 = vpop.f32.mrb[89].mxu1  ;;  %v2034_v29 = vld [vmem:[%s4789_s9 + $0x1a8] sm:$0xff] }
 0x20f   : > { %v2090_v34 = vadd.f32 %v2025_v30, %v1877_v31 }
 0x210   : > { %v1491_v35 = vpop.f32.mrb[90].mxu0  ;;  %v1881_v36 = vpop.f32.mrb[90].mxu1 }
 0x211   : > { %2156 = vst.msk [vmem:[%s4789_s9 + $0x160] sm:$0xff] %vm2111_vm11, %v2090_v34  ;;  %v1882_v37 = vadd.f32 %v1881_v36, %v1491_v35  ;;  %v1493_v38 = vpop.f32.mrb[91].mxu0  ;;  %v1883_v39 = vpop.f32.mrb[91].mxu1  ;;  %v2035_v36 = vld [vmem:[%s4789_s9 + $0x1b0] sm:$0xff] }
 0x213   : > { %v2091_v40 = vadd.f32 %v2026_v6, %v1882_v37 }
 0x214   : > { %v1496_v41 = vpop.f32.mrb[92].mxu0  ;;  %v1886_v42 = vpop.f32.mrb[92].mxu1 }
 0x215   : > { %2157 = vst.msk [vmem:[%s4789_s9 + $0x168] sm:$0xff] %vm2111_vm11, %v2091_v40  ;;  %v1887_v14 = vadd.f32 %v1886_v42, %v1496_v41  ;;  %v1498_v44 = vpop.f32.mrb[93].mxu0  ;;  %v1888_v45 = vpop.f32.mrb[93].mxu1  ;;  %v2036_v42 = vld [vmem:[%s4789_s9 + $0x1b8] sm:$0xff] }
 0x217   : > { %v2092_v46 = vadd.f32 %v2027_v43, %v1887_v14 }
 0x218   : > { %v1501_v47 = vpop.f32.mrb[94].mxu0  ;;  %v1891_v48 = vpop.f32.mrb[94].mxu1 }
 0x219   : > { %2158 = vst.msk [vmem:[%s4789_s9 + $0x170] sm:$0xff] %vm2111_vm11, %v2092_v46  ;;  %v1892_v15 = vadd.f32 %v1891_v48, %v1501_v47  ;;  %v1503_v16 = vpop.f32.mrb[95].mxu0  ;;  %v1893_v50 = vpop.f32.mrb[95].mxu1  ;;  %v2037_v48 = vld [vmem:[%s4789_s9 + $0x1c0] sm:$0xff] }
 0x21b   : > { %v2093_v51 = vadd.f32 %v2028_v49, %v1892_v15 }
 0x21c   : > { %v1506_v52 = vpop.f32.mrb[96].mxu0  ;;  %v1896_v53 = vpop.f32.mrb[96].mxu1 }
 0x21d   : > { %2159 = vst.msk [vmem:[%s4789_s9 + $0x178] sm:$0xff] %vm2111_vm11, %v2093_v51  ;;  %v1897_v55 = vadd.f32 %v1896_v53, %v1506_v52  ;;  %v1508_v17 = vpop.f32.mrb[97].mxu0  ;;  %v1898_v56 = vpop.f32.mrb[97].mxu1  ;;  %v2038_v53 = vld [vmem:[%s4789_s9 + $0x1c8] sm:$0xff] }
 0x21f   : > { %v2094_v57 = vadd.f32 %v2029_v54, %v1897_v55 }
 0x220   : > { %v1511_v19 = vpop.f32.mrb[98].mxu0  ;;  %v1901_v58 = vpop.f32.mrb[98].mxu1 }
 0x221   : > { %2160 = vst.msk [vmem:[%s4789_s9 + $0x180] sm:$0xff] %vm2111_vm11, %v2094_v57  ;;  %v1902_v60 = vadd.f32 %v1901_v58, %v1511_v19  ;;  %v1513_v61 = vpop.f32.mrb[99].mxu0  ;;  %v1903_v62 = vpop.f32.mrb[99].mxu1  ;;  %v2039_v58 = vld [vmem:[%s4789_s9 + $0x1d0] sm:$0xff] }
 0x223   : > { %v2095_v63 = vadd.f32 %v2030_v59, %v1902_v60 }
 0x224   : > { %v1516_v23 = vpop.f32.mrb[100].mxu0  ;;  %v1906_v0 = vpop.f32.mrb[100].mxu1 }
 0x225   : > { %2161 = vst.msk [vmem:[%s4789_s9 + $0x188] sm:$0xff] %vm2111_vm11, %v2095_v63  ;;  %v1907_v2 = vadd.f32 %v1906_v0, %v1516_v23  ;;  %v1518_v3 = vpop.f32.mrb[101].mxu0  ;;  %v1908_v4 = vpop.f32.mrb[101].mxu1  ;;  %v2040_v0 = vld [vmem:[%s4789_s9 + $0x1d8] sm:$0xff] }
 0x227   : > { %v2096_v5 = vadd.f32 %v2031_v1, %v1907_v2 }
 0x228   : > { %v1521_v7 = vpop.f32.mrb[102].mxu0  ;;  %v1911_v8 = vpop.f32.mrb[102].mxu1 }
 0x229   : > { %2162 = vst.msk [vmem:[%s4789_s9 + $0x190] sm:$0xff] %vm2111_vm11, %v2096_v5  ;;  %v1912_v10 = vadd.f32 %v1911_v8, %v1521_v7  ;;  %v1523_v11 = vpop.f32.mrb[103].mxu0  ;;  %v1913_v12 = vpop.f32.mrb[103].mxu1  ;;  %v2041_v8 = vld [vmem:[%s4789_s9 + $0x1e0] sm:$0xff] }
 0x22b   : > { %v2097_v13 = vadd.f32 %v2032_v9, %v1912_v10 }
 0x22c   : > { %v1526_v18 = vpop.f32.mrb[104].mxu0  ;;  %v1916_v20 = vpop.f32.mrb[104].mxu1 }
 0x22d   : > { %2163 = vst.msk [vmem:[%s4789_s9 + $0x198] sm:$0xff] %vm2111_vm11, %v2097_v13  ;;  %v1917_v22 = vadd.f32 %v1916_v20, %v1526_v18  ;;  %v1528_v24 = vpop.f32.mrb[105].mxu0  ;;  %v1918_v25 = vpop.f32.mrb[105].mxu1  ;;  %v2042_v20 = vld [vmem:[%s4789_s9 + $0x1e8] sm:$0xff] }
 0x22f   : > { %v2098_v26 = vadd.f32 %v2033_v21, %v1917_v22 }
 0x230   : > { %v1531_v27 = vpop.f32.mrb[106].mxu0  ;;  %v1921_v28 = vpop.f32.mrb[106].mxu1 }
 0x231   : > { %2164 = vst.msk [vmem:[%s4789_s9 + $0x1a0] sm:$0xff] %vm2111_vm11, %v2098_v26  ;;  %v1922_v30 = vadd.f32 %v1921_v28, %v1531_v27  ;;  %v1533_v31 = vpop.f32.mrb[107].mxu0  ;;  %v1923_v32 = vpop.f32.mrb[107].mxu1  ;;  %v2043_v28 = vld [vmem:[%s4789_s9 + $0x1f0] sm:$0xff] }
 0x233   : > { %v2099_v33 = vadd.f32 %v2034_v29, %v1922_v30 }
 0x234   : > { %v1536_v34 = vpop.f32.mrb[108].mxu0  ;;  %v1926_v35 = vpop.f32.mrb[108].mxu1 }
 0x235   : > { %2165 = vst.msk [vmem:[%s4789_s9 + $0x1a8] sm:$0xff] %vm2111_vm11, %v2099_v33  ;;  %v1927_v6 = vadd.f32 %v1926_v35, %v1536_v34  ;;  %v1538_v37 = vpop.f32.mrb[109].mxu0  ;;  %v1928_v38 = vpop.f32.mrb[109].mxu1  ;;  %v2044_v35 = vld [vmem:[%s4789_s9 + $0x1f8] sm:$0xff] }
 0x237   : > { %v2100_v39 = vadd.f32 %v2035_v36, %v1927_v6 }
 0x238   : > { %v1541_v40 = vpop.f32.mrb[110].mxu0  ;;  %v1931_v41 = vpop.f32.mrb[110].mxu1 }
 0x239   : > { %2166 = vst.msk [vmem:[%s4789_s9 + $0x1b0] sm:$0xff] %vm2111_vm11, %v2100_v39  ;;  %v1932_v43 = vadd.f32 %v1931_v41, %v1541_v40  ;;  %v1543_v14 = vpop.f32.mrb[111].mxu0  ;;  %v1933_v44 = vpop.f32.mrb[111].mxu1  ;;  %v2045_v41 = vld [vmem:[%s4789_s9 + $0x200] sm:$0xff] }
 0x23b   : > { %v2101_v45 = vadd.f32 %v2036_v42, %v1932_v43 }
 0x23c   : > { %v1546_v46 = vpop.f32.mrb[112].mxu0  ;;  %v1936_v47 = vpop.f32.mrb[112].mxu1 }
 0x23d   : > { %2167 = vst.msk [vmem:[%s4789_s9 + $0x1b8] sm:$0xff] %vm2111_vm11, %v2101_v45  ;;  %v1937_v49 = vadd.f32 %v1936_v47, %v1546_v46  ;;  %v1548_v15 = vpop.f32.mrb[113].mxu0  ;;  %v1938_v16 = vpop.f32.mrb[113].mxu1 }
 0x23f   : > { %v2102_v50 = vadd.f32 %v2037_v48, %v1937_v49 }
 0x240   : > { %v1551_v51 = vpop.f32.mrb[114].mxu0  ;;  %v1941_v52 = vpop.f32.mrb[114].mxu1 }
 0x241   : > { %2168 = vst.msk [vmem:[%s4789_s9 + $0x1c0] sm:$0xff] %vm2111_vm11, %v2102_v50  ;;  %v1942_v54 = vadd.f32 %v1941_v52, %v1551_v51  ;;  %v1553_v55 = vpop.f32.mrb[115].mxu0  ;;  %v1943_v17 = vpop.f32.mrb[115].mxu1 }
 0x243   : > { %v2103_v56 = vadd.f32 %v2038_v53, %v1942_v54 }
 0x244   : > { %v1556_v57 = vpop.f32.mrb[116].mxu0  ;;  %v1946_v19 = vpop.f32.mrb[116].mxu1 }
 0x245   : > { %2169 = vst.msk [vmem:[%s4789_s9 + $0x1c8] sm:$0xff] %vm2111_vm11, %v2103_v56  ;;  %v1947_v59 = vadd.f32 %v1946_v19, %v1556_v57  ;;  %v1558_v60 = vpop.f32.mrb[117].mxu0  ;;  %v1948_v61 = vpop.f32.mrb[117].mxu1 }
 0x247   : > { %v2104_v62 = vadd.f32 %v2039_v58, %v1947_v59 }
 0x248   : > { %v1561_v63 = vpop.f32.mrb[118].mxu0  ;;  %v1951_v23 = vpop.f32.mrb[118].mxu1 }
 0x249   : > { %2170 = vst.msk [vmem:[%s4789_s9 + $0x1d0] sm:$0xff] %vm2111_vm11, %v2104_v62  ;;  %v1952_v1 = vadd.f32 %v1951_v23, %v1561_v63  ;;  %v1563_v2 = vpop.f32.mrb[119].mxu0  ;;  %v1953_v3 = vpop.f32.mrb[119].mxu1 }
 0x24b   : > { %v2105_v4 = vadd.f32 %v2040_v0, %v1952_v1 }
 0x24c   : > { %v1566_v5 = vpop.f32.mrb[120].mxu0  ;;  %v1956_v7 = vpop.f32.mrb[120].mxu1 }
 0x24d   : > { %2171 = vst.msk [vmem:[%s4789_s9 + $0x1d8] sm:$0xff] %vm2111_vm11, %v2105_v4  ;;  %v1957_v9 = vadd.f32 %v1956_v7, %v1566_v5  ;;  %v1568_v10 = vpop.f32.mrb[121].mxu0  ;;  %v1958_v11 = vpop.f32.mrb[121].mxu1 }
 0x24f   : > { %v2106_v12 = vadd.f32 %v2041_v8, %v1957_v9 }
 0x250   : > { %v1571_v13 = vpop.f32.mrb[122].mxu0  ;;  %v1961_v18 = vpop.f32.mrb[122].mxu1 }
 0x251   : > { %2172 = vst.msk [vmem:[%s4789_s9 + $0x1e0] sm:$0xff] %vm2111_vm11, %v2106_v12  ;;  %v1962_v21 = vadd.f32 %v1961_v18, %v1571_v13  ;;  %v1573_v22 = vpop.f32.mrb[123].mxu0  ;;  %v1963_v24 = vpop.f32.mrb[123].mxu1 }
 0x253   : > { %v2107_v25 = vadd.f32 %v2042_v20, %v1962_v21 }
 0x254   : > { %v1576_v26 = vpop.f32.mrb[124].mxu0  ;;  %v1966_v27 = vpop.f32.mrb[124].mxu1 }
 0x255   : > { %2173 = vst.msk [vmem:[%s4789_s9 + $0x1e8] sm:$0xff] %vm2111_vm11, %v2107_v25  ;;  %v1967_v29 = vadd.f32 %v1966_v27, %v1576_v26  ;;  %v1578_v30 = vpop.f32.mrb[125].mxu0  ;;  %v1968_v31 = vpop.f32.mrb[125].mxu1 }
 0x257   : > { %v2108_v32 = vadd.f32 %v2043_v28, %v1967_v29 }
 0x258   : > { %v1581_v33 = vpop.f32.mrb[126].mxu0  ;;  %v1971_v34 = vpop.f32.mrb[126].mxu1 }
 0x259   : > { %2174 = vst.msk [vmem:[%s4789_s9 + $0x1f0] sm:$0xff] %vm2111_vm11, %v2108_v32  ;;  %v1972_v36 = vadd.f32 %v1971_v34, %v1581_v33  ;;  %v1583_v6 = vpop.f32.mrb[127].mxu0  ;;  %v1973_v37 = vpop.f32.mrb[127].mxu1 }
 0x25b   : > { %v2109_v38 = vadd.f32 %v2044_v35, %v1972_v36  ;;  %2180 = sbr.rel (%p3428_p11) target bundleno = 890 (0x37a), region = 44 }
 0x25c   : > { %v1586_v39 = vpop.f32.mrb[128].mxu0  ;;  %v1976_v40 = vpop.f32.mrb[128].mxu1 }
 0x25d   : > { %2175 = vst.msk [vmem:[%s4789_s9 + $0x1f8] sm:$0xff] %vm2111_vm11, %v2109_v38  ;;  %v1977_v42 = vadd.f32 %v1976_v40, %v1586_v39  ;;  %v1588_v43 = vpop.f32.mrb[129].mxu0  ;;  %v1978_v14 = vpop.f32.mrb[129].mxu1 }
 0x25f   : > { %v2110_v44 = vadd.f32 %v2045_v41, %v1977_v42 }
 0x261   : > { %2176 = vst.msk [vmem:[%s4789_s9 + $0x200] sm:$0xff] %vm2111_vm11, %v2110_v44 }
 0x262   : > { %v3732_v48 = vmov 3   ;;  %vm2766_vm11 = vcmask 23552  }
 0x263   : > { %3484 = vset.pattern.permute.xlu1 %v3732_v48  ;;  %3483 = vset.pattern.permute.xlu0 %v3732_v48 }
 0x268   : > { %v5103_v45 = vld [vmem:[%s5831_s3 + $0x10] sm:$0xff]  ;;  %v5108_v46 = vld [vmem:[%s5831_s3] sm:$0xff]  ;;  %v5113_v47 = vld [vmem:[%s5831_s3 + $0x18] sm:$0xff] }
 0x269   : > { %v2248_v49 = vmax.f32 %v5103_v45, 1.0  ;;  %v2246_v15 = vmax.f32 %v5108_v46, 1.0  ;;  %v5120_v16 = vld [vmem:[%s5831_s3 + $0x8] sm:$0xff]  ;;  %v2249_v50 = vmax.f32 %v5113_v47, 1.0  ;;  %v5132_v53 = vld [vmem:[%s5831_s3 + $0x20] sm:$0xff]  ;;  %v5139_v17 = vld [vmem:[%s5831_s3 + $0x38] sm:$0xff] }
 0x26a   : > { %v2247_v51 = vmax.f32 %v5120_v16, 1.0  ;;  %v5127_v52 = vld [vmem:[%s5831_s3 + $0x28] sm:$0xff]  ;;  %v2250_v55 = vmax.f32 %v5132_v53, 1.0  ;;  %v5144_v56 = vld [vmem:[%s5831_s3 + $0x30] sm:$0xff]  ;;  %v2253_v57 = vmax.f32 %v5139_v17, 1.0  ;;  %v5156_v59 = vld [vmem:[%s5831_s3 + $0x40] sm:$0xff] }
 0x26b   : > { %2323 = vperm.xlu1 %3484, %v2248_v49   ;;  %2313 = vperm.xlu0 %3483, %v2246_v15   ;;  %v2251_v54 = vmax.f32 %v5127_v52, 1.0  ;;  %v2252_v19 = vmax.f32 %v5144_v56, 1.0  ;;  %v5151_v58 = vld [vmem:[%s5831_s3 + $0x48] sm:$0xff]  ;;  %v2254_v61 = vmax.f32 %v5156_v59, 1.0  ;;  %v5163_v62 = vld [vmem:[%s5831_s3 + $0x58] sm:$0xff]  ;;  %v5168_v63 = vld [vmem:[%s5831_s3 + $0x50] sm:$0xff] }
 0x26c   : > { %v2255_v60 = vmax.f32 %v5151_v58, 1.0  ;;  %v2257_v23 = vmax.f32 %v5163_v62, 1.0  ;;  %v2256_v0 = vmax.f32 %v5168_v63, 1.0  ;;  %v5175_v1 = vld [vmem:[%s5831_s3 + $0x68] sm:$0xff]  ;;  %v5180_v2 = vld [vmem:[%s5831_s3 + $0x60] sm:$0xff]  ;;  %v5187_v5 = vld [vmem:[%s5831_s3 + $0x78] sm:$0xff] }
 0x26d   : > { %v2259_v3 = vmax.f32 %v5175_v1, 1.0  ;;  %v2258_v4 = vmax.f32 %v5180_v2, 1.0  ;;  %v5192_v7 = vld [vmem:[%s5831_s3 + $0x70] sm:$0xff]  ;;  %v2261_v8 = vmax.f32 %v5187_v5, 1.0  ;;  %v5199_v10 = vld [vmem:[%s5831_s3 + $0x88] sm:$0xff]  ;;  %v5204_v11 = vld [vmem:[%s5831_s3 + $0x80] sm:$0xff] }
 0x26e   : > { %v2260_v9 = vmax.f32 %v5192_v7, 1.0  ;;  %v2263_v12 = vmax.f32 %v5199_v10, 1.0  ;;  %v2262_v13 = vmax.f32 %v5204_v11, 1.0  ;;  %v5211_v18 = vld [vmem:[%s5831_s3 + $0x98] sm:$0xff]  ;;  %v5216_v20 = vld [vmem:[%s5831_s3 + $0x90] sm:$0xff]  ;;  %v5223_v24 = vld [vmem:[%s5831_s3 + $0xa8] sm:$0xff] }
 0x26f   : > { %2328 = vperm.xlu1 %3484, %v2249_v50   ;;  %2318 = vperm.xlu0 %3483, %v2247_v51   ;;  %v2265_v21 = vmax.f32 %v5211_v18, 1.0  ;;  %v2264_v22 = vmax.f32 %v5216_v20, 1.0  ;;  %v5228_v25 = vld [vmem:[%s5831_s3 + $0xa0] sm:$0xff]  ;;  %v2267_v26 = vmax.f32 %v5223_v24, 1.0  ;;  %v5235_v28 = vld [vmem:[%s5831_s3 + $0xb8] sm:$0xff]  ;;  %v5240_v29 = vld [vmem:[%s5831_s3 + $0xb0] sm:$0xff] }
 0x270   : > { %v2266_v27 = vmax.f32 %v5228_v25, 1.0  ;;  %v2269_v30 = vmax.f32 %v5235_v28, 1.0  ;;  %v2268_v31 = vmax.f32 %v5240_v29, 1.0  ;;  %v5247_v32 = vld [vmem:[%s5831_s3 + $0xc8] sm:$0xff]  ;;  %v5252_v33 = vld [vmem:[%s5831_s3 + $0xc0] sm:$0xff]  ;;  %v5259_v36 = vld [vmem:[%s5831_s3 + $0xd8] sm:$0xff] }
 0x271   : > { %v2271_v34 = vmax.f32 %v5247_v32, 1.0  ;;  %v2270_v35 = vmax.f32 %v5252_v33, 1.0  ;;  %v5264_v6 = vld [vmem:[%s5831_s3 + $0xd0] sm:$0xff]  ;;  %v2273_v37 = vmax.f32 %v5259_v36, 1.0  ;;  %v5271_v39 = vld [vmem:[%s5831_s3 + $0xe8] sm:$0xff]  ;;  %v5276_v40 = vld [vmem:[%s5831_s3 + $0xe0] sm:$0xff] }
 0x272   : > { %v2272_v38 = vmax.f32 %v5264_v6, 1.0  ;;  %v2275_v41 = vmax.f32 %v5271_v39, 1.0  ;;  %v2274_v42 = vmax.f32 %v5276_v40, 1.0  ;;  %v5283_v43 = vld [vmem:[%s5831_s3 + $0xf8] sm:$0xff]  ;;  %v5288_v14 = vld [vmem:[%s5831_s3 + $0xf0] sm:$0xff]  ;;  %v5295_v49 = vld [vmem:[%s5831_s3 + $0x108] sm:$0xff] }
 0x273   : > { %2338 = vperm.xlu1 %3484, %v2251_v54   ;;  %2333 = vperm.xlu0 %3483, %v2250_v55   ;;  %v2277_v44 = vmax.f32 %v5283_v43, 1.0  ;;  %v2276_v48 = vmax.f32 %v5288_v14, 1.0  ;;  %v5300_v15 = vld [vmem:[%s5831_s3 + $0x100] sm:$0xff]  ;;  %v2279_v50 = vmax.f32 %v5295_v49, 1.0  ;;  %v5307_v54 = vld [vmem:[%s5831_s3 + $0x118] sm:$0xff]  ;;  %v5312_v55 = vld [vmem:[%s5831_s3 + $0x110] sm:$0xff] }
 0x274   : > { %v2278_v51 = vmax.f32 %v5300_v15, 1.0 }
 0x277   : > { %2348 = vperm.xlu1 %3484, %v2253_v57   ;;  %2343 = vperm.xlu0 %3483, %v2252_v19   ;;  %v2281_v57 = vmax.f32 %v5307_v54, 1.0  ;;  %v2280_v19 = vmax.f32 %v5312_v55, 1.0 }
 0x27b   : > { %2358 = vperm.xlu1 %3484, %v2255_v60   ;;  %2353 = vperm.xlu0 %3483, %v2254_v61   ;;  %v5319_v60 = vld [vmem:[%s5831_s3 + $0x128] sm:$0xff]  ;;  %v5324_v61 = vld [vmem:[%s5831_s3 + $0x120] sm:$0xff] }
 0x27f   : > { %2368 = vperm.xlu1 %3484, %v2257_v23   ;;  %2363 = vperm.xlu0 %3483, %v2256_v0   ;;  %v2283_v23 = vmax.f32 %v5319_v60, 1.0  ;;  %v2282_v0 = vmax.f32 %v5324_v61, 1.0 }
 0x283   : > { %2378 = vperm.xlu1 %3484, %v2259_v3   ;;  %2373 = vperm.xlu0 %3483, %v2258_v4   ;;  %v5331_v3 = vld [vmem:[%s5831_s3 + $0x138] sm:$0xff]  ;;  %v5336_v4 = vld [vmem:[%s5831_s3 + $0x130] sm:$0xff] }
 0x287   : > { %2388 = vperm.xlu1 %3484, %v2261_v8   ;;  %2383 = vperm.xlu0 %3483, %v2260_v9   ;;  %v2285_v8 = vmax.f32 %v5331_v3, 1.0  ;;  %v2284_v9 = vmax.f32 %v5336_v4, 1.0 }
 0x28b   : > { %2398 = vperm.xlu1 %3484, %v2263_v12   ;;  %2393 = vperm.xlu0 %3483, %v2262_v13   ;;  %v5343_v12 = vld [vmem:[%s5831_s3 + $0x148] sm:$0xff]  ;;  %v5348_v13 = vld [vmem:[%s5831_s3 + $0x140] sm:$0xff] }
 0x28f   : > { %2408 = vperm.xlu1 %3484, %v2265_v21   ;;  %2403 = vperm.xlu0 %3483, %v2264_v22   ;;  %v2287_v21 = vmax.f32 %v5343_v12, 1.0  ;;  %v2286_v22 = vmax.f32 %v5348_v13, 1.0 }
 0x293   : > { %2418 = vperm.xlu1 %3484, %v2267_v26   ;;  %2413 = vperm.xlu0 %3483, %v2266_v27   ;;  %v5355_v26 = vld [vmem:[%s5831_s3 + $0x158] sm:$0xff]  ;;  %v5360_v27 = vld [vmem:[%s5831_s3 + $0x150] sm:$0xff] }
 0x297   : > { %2428 = vperm.xlu1 %3484, %v2269_v30   ;;  %2423 = vperm.xlu0 %3483, %v2268_v31   ;;  %v2289_v30 = vmax.f32 %v5355_v26, 1.0  ;;  %v2288_v31 = vmax.f32 %v5360_v27, 1.0 }
 0x29b   : > { %2438 = vperm.xlu1 %3484, %v2271_v34   ;;  %2433 = vperm.xlu0 %3483, %v2270_v35   ;;  %v5367_v34 = vld [vmem:[%s5831_s3 + $0x168] sm:$0xff]  ;;  %v5372_v35 = vld [vmem:[%s5831_s3 + $0x160] sm:$0xff] }
 0x29f   : > { %2448 = vperm.xlu1 %3484, %v2273_v37   ;;  %2443 = vperm.xlu0 %3483, %v2272_v38   ;;  %v2291_v37 = vmax.f32 %v5367_v34, 1.0  ;;  %v2290_v38 = vmax.f32 %v5372_v35, 1.0 }
 0x2a3   : > { %2458 = vperm.xlu1 %3484, %v2275_v41   ;;  %2453 = vperm.xlu0 %3483, %v2274_v42   ;;  %v5379_v41 = vld [vmem:[%s5831_s3 + $0x178] sm:$0xff]  ;;  %v5384_v42 = vld [vmem:[%s5831_s3 + $0x170] sm:$0xff] }
 0x2a7   : > { %2468 = vperm.xlu1 %3484, %v2277_v44   ;;  %2463 = vperm.xlu0 %3483, %v2276_v48   ;;  %v2293_v44 = vmax.f32 %v5379_v41, 1.0  ;;  %v2292_v48 = vmax.f32 %v5384_v42, 1.0 }
 0x2ab   : > { %2478 = vperm.xlu1 %3484, %v2279_v50   ;;  %2473 = vperm.xlu0 %3483, %v2278_v51   ;;  %v5391_v50 = vld [vmem:[%s5831_s3 + $0x188] sm:$0xff]  ;;  %v5396_v51 = vld [vmem:[%s5831_s3 + $0x180] sm:$0xff] }
 0x2af   : > { %2488 = vperm.xlu1 %3484, %v2281_v57   ;;  %2483 = vperm.xlu0 %3483, %v2280_v19   ;;  %v2295_v57 = vmax.f32 %v5391_v50, 1.0  ;;  %v2294_v19 = vmax.f32 %v5396_v51, 1.0 }
 0x2b3   : > { %2498 = vperm.xlu1 %3484, %v2283_v23   ;;  %2493 = vperm.xlu0 %3483, %v2282_v0   ;;  %v5403_v23 = vld [vmem:[%s5831_s3 + $0x198] sm:$0xff]  ;;  %v5408_v0 = vld [vmem:[%s5831_s3 + $0x190] sm:$0xff] }
 0x2b4   : > { %5854 = vst [vmem:[#allocation11_spill] sm:$0xff] %v5408_v0 }
 0x2b7   : > { %2508 = vperm.xlu1 %3484, %v2285_v8   ;;  %2503 = vperm.xlu0 %3483, %v2284_v9   ;;  %v2297_v8 = vmax.f32 %v5403_v23, 1.0  ;;  %v2296_v9 = vmax.f32 %v5408_v0, 1.0 }
 0x2bb   : > { %2518 = vperm.xlu1 %3484, %v2287_v21   ;;  %2513 = vperm.xlu0 %3483, %v2286_v22   ;;  %v5415_v21 = vld [vmem:[%s5831_s3 + $0x1a8] sm:$0xff]  ;;  %v5420_v22 = vld [vmem:[%s5831_s3 + $0x1a0] sm:$0xff] }
 0x2bc   : > { %5855 = vst [vmem:[#allocation12_spill] sm:$0xff] %v5415_v21  ;;  %5856 = vst [vmem:[#allocation13_spill] sm:$0xff] %v5420_v22 }
 0x2bf   : > { %2528 = vperm.xlu1 %3484, %v2289_v30   ;;  %2523 = vperm.xlu0 %3483, %v2288_v31   ;;  %v2299_v30 = vmax.f32 %v5415_v21, 1.0  ;;  %v2298_v31 = vmax.f32 %v5420_v22, 1.0 }
 0x2c3   : > { %2538 = vperm.xlu1 %3484, %v2291_v37   ;;  %2533 = vperm.xlu0 %3483, %v2290_v38   ;;  %v5427_v37 = vld [vmem:[%s5831_s3 + $0x1b8] sm:$0xff]  ;;  %v5432_v38 = vld [vmem:[%s5831_s3 + $0x1b0] sm:$0xff] }
 0x2c4   : > { %5857 = vst [vmem:[#allocation14_spill] sm:$0xff] %v5427_v37  ;;  %5858 = vst [vmem:[#allocation15_spill] sm:$0xff] %v5432_v38 }
 0x2c7   : > { %2548 = vperm.xlu1 %3484, %v2293_v44   ;;  %2543 = vperm.xlu0 %3483, %v2292_v48   ;;  %v2301_v44 = vmax.f32 %v5427_v37, 1.0  ;;  %v2300_v48 = vmax.f32 %v5432_v38, 1.0 }
 0x2cb   : > { %2558 = vperm.xlu1 %3484, %v2295_v57   ;;  %2553 = vperm.xlu0 %3483, %v2294_v19   ;;  %v5439_v57 = vld [vmem:[%s5831_s3 + $0x1c8] sm:$0xff]  ;;  %v5444_v19 = vld [vmem:[%s5831_s3 + $0x1c0] sm:$0xff] }
 0x2cc   : > { %5859 = vst [vmem:[#allocation16_spill] sm:$0xff] %v5439_v57  ;;  %5860 = vst [vmem:[#allocation17_spill] sm:$0xff] %v5444_v19 }
 0x2cf   : > { %2568 = vperm.xlu1 %3484, %v2297_v8   ;;  %2563 = vperm.xlu0 %3483, %v2296_v9   ;;  %v2303_v8 = vmax.f32 %v5439_v57, 1.0  ;;  %v2302_v9 = vmax.f32 %v5444_v19, 1.0  ;;  %v5468_v19 = vld [vmem:[%s5831_s3 + $0x1e0] sm:$0xff] }
 0x2d0   : > { %5864 = vst [vmem:[#allocation21_spill] sm:$0xff] %v5468_v19 }
 0x2d3   : > { %2578 = vperm.xlu1 %3484, %v2299_v30   ;;  %2573 = vperm.xlu0 %3483, %v2298_v31   ;;  %v5451_v30 = vld [vmem:[%s5831_s3 + $0x1d8] sm:$0xff]  ;;  %v5456_v31 = vld [vmem:[%s5831_s3 + $0x1d0] sm:$0xff] }
 0x2d4   : > { %5861 = vst [vmem:[#allocation18_spill] sm:$0xff] %v5451_v30  ;;  %5862 = vst [vmem:[#allocation19_spill] sm:$0xff] %v5456_v31  ;;  %v2305_v38 = vmax.f32 %v5451_v30, 1.0 }
 0x2d7   : > { %2588 = vperm.xlu1 %3484, %v2301_v44   ;;  %2583 = vperm.xlu0 %3483, %v2300_v48   ;;  %v2304_v44 = vmax.f32 %v5456_v31, 1.0  ;;  %v5463_v48 = vld [vmem:[%s5831_s3 + $0x1e8] sm:$0xff]  ;;  %v5480_v31 = vld [vmem:[%s5831_s3 + $0x1f0] sm:$0xff] }
 0x2d8   : > { %5863 = vst [vmem:[#allocation20_spill] sm:$0xff] %v5463_v48  ;;  %v2307_v57 = vmax.f32 %v5463_v48, 1.0  ;;  %5866 = vst [vmem:[#allocation23_spill] sm:$0xff] %v5480_v31 }
 0x2db   : > { %2598 = vperm.xlu1 %3484, %v2303_v8   ;;  %2593 = vperm.xlu0 %3483, %v2302_v9   ;;  %v2306_v8 = vmax.f32 %v5468_v19, 1.0  ;;  %v5475_v9 = vld [vmem:[%s5831_s3 + $0x1f8] sm:$0xff] }
 0x2dc   : > { %5865 = vst [vmem:[#allocation22_spill] sm:$0xff] %v5475_v9  ;;  %v2309_v30 = vmax.f32 %v5475_v9, 1.0 }
 0x2df   : > { %2608 = vperm.xlu1 %3484, %v2305_v38   ;;  %2603 = vperm.xlu0 %3483, %v2304_v44   ;;  %v2308_v38 = vmax.f32 %v5480_v31, 1.0  ;;  %v5487_v44 = vld [vmem:[%s5831_s3 + $0x200] sm:$0xff] }
 0x2e0   : > { %5867 = vst [vmem:[#allocation24_spill] sm:$0xff] %v5487_v44  ;;  %v2310_v19 = vmax.f32 %v5487_v44, 1.0 }
 0x2e3   : > { %2618 = vperm.xlu1 %3484, %v2307_v57   ;;  %2613 = vperm.xlu0 %3483, %v2306_v8  }
 0x2e7   : > { %2628 = vperm.xlu1 %3484, %v2309_v30   ;;  %2623 = vperm.xlu0 %3483, %v2308_v38  }
 0x2ea   : > { %v2324_v48 = vpop.permute.xlu1 %2323  ;;  %v2314_v37 = vpop.permute.xlu0 %2313 }
 0x2eb   : > { %3485 = vrcp.f32 %v2324_v48  ;;  %2633 = vperm.xlu0 %3483, %v2310_v19  }
 0x2ec   : > { %3487 = vrcp.f32 %v2314_v37 }
 0x2ee   : > { %v2329_v57 = vpop.permute.xlu1 %2328  ;;  %v2319_v8 = vpop.permute.xlu0 %2318 }
 0x2ef   : > { %3489 = vrcp.f32 %v2329_v57 }
 0x2f0   : > { %3491 = vrcp.f32 %v2319_v8 }
 0x2f2   : > { %v2339_v9 = vpop.permute.xlu1 %2338  ;;  %v2334_v31 = vpop.permute.xlu0 %2333 }
 0x2f3   : > { %3493 = vrcp.f32 %v2339_v9 }
 0x2f4   : > { %3495 = vrcp.f32 %v2334_v31 }
 0x2f5   : > { %v3486_v22 = vpop.eup %3485 }
 0x2f6   : > { %v3488_v21 = vpop.eup %3487  ;;  %v2641_v30 = vmul.f32 %v3486_v22, %v5103_v45  ;;  %v2349_v38 = vpop.permute.xlu1 %2348 }
 0x2f7   : > { %v2344_v44 = vpop.permute.xlu0 %2343  ;;  %v2637_v0 = vmul.f32 %v3488_v21, %v5108_v46  ;;  %3497 = vrcp.f32 %v2349_v38 }
 0x2f8   : > { %2769 = vst.msk [vmem:[%s5831_s3 + $0x10] sm:$0xff] %vm2766_vm11, %v2641_v30  ;;  %3499 = vrcp.f32 %v2344_v44 }
 0x2f9   : > { %v3490_v37 = vpop.eup %3489  ;;  %2767 = vst.msk [vmem:[%s5831_s3] sm:$0xff] %vm2766_vm11, %v2637_v0 }
 0x2fa   : > { %v3492_v19 = vpop.eup %3491  ;;  %v2643_v45 = vmul.f32 %v3490_v37, %v5113_v47  ;;  %v2359_v22 = vpop.permute.xlu1 %2358 }
 0x2fb   : > { %v2354_v31 = vpop.permute.xlu0 %2353  ;;  %v2639_v46 = vmul.f32 %v3492_v19, %v5120_v16  ;;  %3501 = vrcp.f32 %v2359_v22 }
 0x2fc   : > { %2770 = vst.msk [vmem:[%s5831_s3 + $0x18] sm:$0xff] %vm2766_vm11, %v2643_v45  ;;  %3503 = vrcp.f32 %v2354_v31 }
 0x2fd   : > { %v3494_v21 = vpop.eup %3493  ;;  %2768 = vst.msk [vmem:[%s5831_s3 + $0x8] sm:$0xff] %vm2766_vm11, %v2639_v46 }
 0x2fe   : > { %v3496_v0 = vpop.eup %3495  ;;  %v2647_v47 = vmul.f32 %v3494_v21, %v5127_v52  ;;  %v2369_v48 = vpop.permute.xlu1 %2368 }
 0x2ff   : > { %v2364_v9 = vpop.permute.xlu0 %2363  ;;  %v2645_v16 = vmul.f32 %v3496_v0, %v5132_v53  ;;  %3505 = vrcp.f32 %v2369_v48 }
 0x300   : > { %2772 = vst.msk [vmem:[%s5831_s3 + $0x28] sm:$0xff] %vm2766_vm11, %v2647_v47  ;;  %3507 = vrcp.f32 %v2364_v9 }
 0x301   : > { %v3498_v44 = vpop.eup %3497  ;;  %2771 = vst.msk [vmem:[%s5831_s3 + $0x20] sm:$0xff] %vm2766_vm11, %v2645_v16 }
 0x302   : > { %v3500_v57 = vpop.eup %3499  ;;  %v2651_v52 = vmul.f32 %v3498_v44, %v5139_v17  ;;  %v2379_v8 = vpop.permute.xlu1 %2378 }
 0x303   : > { %v2374_v30 = vpop.permute.xlu0 %2373  ;;  %v2649_v53 = vmul.f32 %v3500_v57, %v5144_v56  ;;  %3509 = vrcp.f32 %v2379_v8 }
 0x304   : > { %2774 = vst.msk [vmem:[%s5831_s3 + $0x38] sm:$0xff] %vm2766_vm11, %v2651_v52  ;;  %3511 = vrcp.f32 %v2374_v30 }
 0x305   : > { %v3502_v38 = vpop.eup %3501  ;;  %2773 = vst.msk [vmem:[%s5831_s3 + $0x30] sm:$0xff] %vm2766_vm11, %v2649_v53 }
 0x306   : > { %v3504_v37 = vpop.eup %3503  ;;  %v2655_v17 = vmul.f32 %v3502_v38, %v5151_v58  ;;  %v2389_v19 = vpop.permute.xlu1 %2388 }
 0x307   : > { %v2384_v45 = vpop.permute.xlu0 %2383  ;;  %v2653_v56 = vmul.f32 %v3504_v37, %v5156_v59  ;;  %3513 = vrcp.f32 %v2389_v19 }
 0x308   : > { %2776 = vst.msk [vmem:[%s5831_s3 + $0x48] sm:$0xff] %vm2766_vm11, %v2655_v17  ;;  %3515 = vrcp.f32 %v2384_v45 }
 0x309   : > { %v3506_v22 = vpop.eup %3505  ;;  %2775 = vst.msk [vmem:[%s5831_s3 + $0x40] sm:$0xff] %vm2766_vm11, %v2653_v56 }
 0x30a   : > { %v3508_v31 = vpop.eup %3507  ;;  %v2659_v58 = vmul.f32 %v3506_v22, %v5163_v62  ;;  %v2399_v46 = vpop.permute.xlu1 %2398 }
 0x30b   : > { %v2394_v21 = vpop.permute.xlu0 %2393  ;;  %v2657_v59 = vmul.f32 %v3508_v31, %v5168_v63  ;;  %3517 = vrcp.f32 %v2399_v46 }
 0x30c   : > { %2778 = vst.msk [vmem:[%s5831_s3 + $0x58] sm:$0xff] %vm2766_vm11, %v2659_v58  ;;  %3519 = vrcp.f32 %v2394_v21 }
 0x30d   : > { %v3510_v0 = vpop.eup %3509  ;;  %2777 = vst.msk [vmem:[%s5831_s3 + $0x50] sm:$0xff] %vm2766_vm11, %v2657_v59 }
 0x30e   : > { %v3512_v47 = vpop.eup %3511  ;;  %v2663_v62 = vmul.f32 %v3510_v0, %v5175_v1  ;;  %v2409_v48 = vpop.permute.xlu1 %2408 }
 0x30f   : > { %v2404_v9 = vpop.permute.xlu0 %2403  ;;  %v2661_v63 = vmul.f32 %v3512_v47, %v5180_v2  ;;  %3521 = vrcp.f32 %v2409_v48 }
 0x310   : > { %2780 = vst.msk [vmem:[%s5831_s3 + $0x68] sm:$0xff] %vm2766_vm11, %v2663_v62  ;;  %3523 = vrcp.f32 %v2404_v9 }
 0x311   : > { %v3514_v16 = vpop.eup %3513  ;;  %2779 = vst.msk [vmem:[%s5831_s3 + $0x60] sm:$0xff] %vm2766_vm11, %v2661_v63 }
 0x312   : > { %v3516_v44 = vpop.eup %3515  ;;  %v2667_v1 = vmul.f32 %v3514_v16, %v5187_v5  ;;  %v2419_v57 = vpop.permute.xlu1 %2418 }
 0x313   : > { %v2414_v52 = vpop.permute.xlu0 %2413  ;;  %v2665_v2 = vmul.f32 %v3516_v44, %v5192_v7  ;;  %3525 = vrcp.f32 %v2419_v57 }
 0x314   : > { %2782 = vst.msk [vmem:[%s5831_s3 + $0x78] sm:$0xff] %vm2766_vm11, %v2667_v1  ;;  %3527 = vrcp.f32 %v2414_v52 }
 0x315   : > { %v3518_v8 = vpop.eup %3517  ;;  %2781 = vst.msk [vmem:[%s5831_s3 + $0x70] sm:$0xff] %vm2766_vm11, %v2665_v2 }
 0x316   : > { %v3520_v30 = vpop.eup %3519  ;;  %v2671_v5 = vmul.f32 %v3518_v8, %v5199_v10  ;;  %v2429_v53 = vpop.permute.xlu1 %2428 }
 0x317   : > { %v2424_v38 = vpop.permute.xlu0 %2423  ;;  %v2669_v7 = vmul.f32 %v3520_v30, %v5204_v11  ;;  %3529 = vrcp.f32 %v2429_v53 }
 0x318   : > { %2784 = vst.msk [vmem:[%s5831_s3 + $0x88] sm:$0xff] %vm2766_vm11, %v2671_v5  ;;  %3531 = vrcp.f32 %v2424_v38 }
 0x319   : > { %v3522_v37 = vpop.eup %3521  ;;  %2783 = vst.msk [vmem:[%s5831_s3 + $0x80] sm:$0xff] %vm2766_vm11, %v2669_v7 }
 0x31a   : > { %v3524_v17 = vpop.eup %3523  ;;  %v2675_v10 = vmul.f32 %v3522_v37, %v5211_v18  ;;  %v2439_v19 = vpop.permute.xlu1 %2438 }
 0x31b   : > { %v2434_v45 = vpop.permute.xlu0 %2433  ;;  %v2673_v11 = vmul.f32 %v3524_v17, %v5216_v20  ;;  %3533 = vrcp.f32 %v2439_v19 }
 0x31c   : > { %2786 = vst.msk [vmem:[%s5831_s3 + $0x98] sm:$0xff] %vm2766_vm11, %v2675_v10  ;;  %3535 = vrcp.f32 %v2434_v45 }
 0x31d   : > { %v3526_v56 = vpop.eup %3525  ;;  %2785 = vst.msk [vmem:[%s5831_s3 + $0x90] sm:$0xff] %vm2766_vm11, %v2673_v11 }
 0x31e   : > { %v3528_v22 = vpop.eup %3527  ;;  %v2679_v18 = vmul.f32 %v3526_v56, %v5223_v24  ;;  %v2449_v31 = vpop.permute.xlu1 %2448 }
 0x31f   : > { %v2444_v58 = vpop.permute.xlu0 %2443  ;;  %v2677_v20 = vmul.f32 %v3528_v22, %v5228_v25  ;;  %3537 = vrcp.f32 %v2449_v31 }
 0x320   : > { %2788 = vst.msk [vmem:[%s5831_s3 + $0xa8] sm:$0xff] %vm2766_vm11, %v2679_v18  ;;  %3539 = vrcp.f32 %v2444_v58 }
 0x321   : > { %v3530_v46 = vpop.eup %3529  ;;  %2787 = vst.msk [vmem:[%s5831_s3 + $0xa0] sm:$0xff] %vm2766_vm11, %v2677_v20 }
 0x322   : > { %v3532_v21 = vpop.eup %3531  ;;  %v2683_v24 = vmul.f32 %v3530_v46, %v5235_v28  ;;  %v2459_v59 = vpop.permute.xlu1 %2458 }
 0x323   : > { %v2454_v0 = vpop.permute.xlu0 %2453  ;;  %v2681_v25 = vmul.f32 %v3532_v21, %v5240_v29  ;;  %3541 = vrcp.f32 %v2459_v59 }
 0x324   : > { %2790 = vst.msk [vmem:[%s5831_s3 + $0xb8] sm:$0xff] %vm2766_vm11, %v2683_v24  ;;  %3543 = vrcp.f32 %v2454_v0 }
 0x325   : > { %v3534_v47 = vpop.eup %3533  ;;  %2789 = vst.msk [vmem:[%s5831_s3 + $0xb0] sm:$0xff] %vm2766_vm11, %v2681_v25 }
 0x326   : > { %v3536_v62 = vpop.eup %3535  ;;  %v2687_v28 = vmul.f32 %v3534_v47, %v5247_v32  ;;  %v2469_v48 = vpop.permute.xlu1 %2468 }
 0x327   : > { %v2464_v9 = vpop.permute.xlu0 %2463  ;;  %v2685_v29 = vmul.f32 %v3536_v62, %v5252_v33  ;;  %3545 = vrcp.f32 %v2469_v48 }
 0x328   : > { %2792 = vst.msk [vmem:[%s5831_s3 + $0xc8] sm:$0xff] %vm2766_vm11, %v2687_v28  ;;  %3547 = vrcp.f32 %v2464_v9 }
 0x329   : > { %v3538_v63 = vpop.eup %3537  ;;  %2791 = vst.msk [vmem:[%s5831_s3 + $0xc0] sm:$0xff] %vm2766_vm11, %v2685_v29 }
 0x32a   : > { %v3540_v16 = vpop.eup %3539  ;;  %v2691_v32 = vmul.f32 %v3538_v63, %v5259_v36  ;;  %v2479_v44 = vpop.permute.xlu1 %2478 }
 0x32b   : > { %v2474_v1 = vpop.permute.xlu0 %2473  ;;  %v2689_v33 = vmul.f32 %v3540_v16, %v5264_v6  ;;  %3549 = vrcp.f32 %v2479_v44 }
 0x32c   : > { %2794 = vst.msk [vmem:[%s5831_s3 + $0xd8] sm:$0xff] %vm2766_vm11, %v2691_v32  ;;  %3551 = vrcp.f32 %v2474_v1 }
 0x32d   : > { %v3542_v57 = vpop.eup %3541  ;;  %2793 = vst.msk [vmem:[%s5831_s3 + $0xd0] sm:$0xff] %vm2766_vm11, %v2689_v33 }
 0x32e   : > { %v3544_v52 = vpop.eup %3543  ;;  %v2695_v36 = vmul.f32 %v3542_v57, %v5271_v39  ;;  %v2489_v2 = vpop.permute.xlu1 %2488 }
 0x32f   : > { %v2484_v8 = vpop.permute.xlu0 %2483  ;;  %v2693_v6 = vmul.f32 %v3544_v52, %v5276_v40  ;;  %3553 = vrcp.f32 %v2489_v2 }
 0x330   : > { %2796 = vst.msk [vmem:[%s5831_s3 + $0xe8] sm:$0xff] %vm2766_vm11, %v2695_v36  ;;  %3555 = vrcp.f32 %v2484_v8 }
 0x331   : > { %v3546_v30 = vpop.eup %3545  ;;  %2795 = vst.msk [vmem:[%s5831_s3 + $0xe0] sm:$0xff] %vm2766_vm11, %v2693_v6 }
 0x332   : > { %v3548_v5 = vpop.eup %3547  ;;  %v2699_v39 = vmul.f32 %v3546_v30, %v5283_v43  ;;  %v2499_v53 = vpop.permute.xlu1 %2498 }
 0x333   : > { %v2494_v38 = vpop.permute.xlu0 %2493  ;;  %v2697_v40 = vmul.f32 %v3548_v5, %v5288_v14  ;;  %3557 = vrcp.f32 %v2499_v53  ;;  %v5868_v53 = vld [vmem:[#allocation11_spill] sm:$0xff] }
 0x334   : > { %2798 = vst.msk [vmem:[%s5831_s3 + $0xf8] sm:$0xff] %vm2766_vm11, %v2699_v39  ;;  %3559 = vrcp.f32 %v2494_v38 }
 0x335   : > { %v3550_v7 = vpop.eup %3549  ;;  %2797 = vst.msk [vmem:[%s5831_s3 + $0xf0] sm:$0xff] %vm2766_vm11, %v2697_v40 }
 0x336   : > { %v3552_v37 = vpop.eup %3551  ;;  %v2703_v43 = vmul.f32 %v3550_v7, %v5295_v49  ;;  %v2509_v17 = vpop.permute.xlu1 %2508  ;;  %v5869_v7 = vld [vmem:[#allocation12_spill] sm:$0xff] }
 0x337   : > { %v2504_v10 = vpop.permute.xlu0 %2503  ;;  %v2701_v14 = vmul.f32 %v3552_v37, %v5300_v15  ;;  %3561 = vrcp.f32 %v2509_v17  ;;  %v5870_v17 = vld [vmem:[#allocation13_spill] sm:$0xff] }
 0x338   : > { %2800 = vst.msk [vmem:[%s5831_s3 + $0x108] sm:$0xff] %vm2766_vm11, %v2703_v43  ;;  %3563 = vrcp.f32 %v2504_v10 }
 0x339   : > { %v3554_v19 = vpop.eup %3553  ;;  %2799 = vst.msk [vmem:[%s5831_s3 + $0x100] sm:$0xff] %vm2766_vm11, %v2701_v14 }
 0x33a   : > { %v3556_v45 = vpop.eup %3555  ;;  %v2707_v49 = vmul.f32 %v3554_v19, %v5307_v54  ;;  %v2519_v11 = vpop.permute.xlu1 %2518 }
 0x33b   : > { %v2514_v56 = vpop.permute.xlu0 %2513  ;;  %v2705_v15 = vmul.f32 %v3556_v45, %v5312_v55  ;;  %3565 = vrcp.f32 %v2519_v11  ;;  %v5871_v45 = vld [vmem:[#allocation14_spill] sm:$0xff] }
 0x33c   : > { %2802 = vst.msk [vmem:[%s5831_s3 + $0x118] sm:$0xff] %vm2766_vm11, %v2707_v49  ;;  %3567 = vrcp.f32 %v2514_v56 }
 0x33d   : > { %v3558_v22 = vpop.eup %3557  ;;  %2801 = vst.msk [vmem:[%s5831_s3 + $0x110] sm:$0xff] %vm2766_vm11, %v2705_v15  ;;  %v5872_v15 = vld [vmem:[#allocation15_spill] sm:$0xff] }
 0x33e   : > { %v3560_v18 = vpop.eup %3559  ;;  %v2711_v54 = vmul.f32 %v3558_v22, %v5319_v60  ;;  %v2529_v31 = vpop.permute.xlu1 %2528 }
 0x33f   : > { %v2524_v58 = vpop.permute.xlu0 %2523  ;;  %v2709_v55 = vmul.f32 %v3560_v18, %v5324_v61  ;;  %3569 = vrcp.f32 %v2529_v31  ;;  %v5873_v31 = vld [vmem:[#allocation16_spill] sm:$0xff] }
 0x340   : > { %2804 = vst.msk [vmem:[%s5831_s3 + $0x128] sm:$0xff] %vm2766_vm11, %v2711_v54  ;;  %3571 = vrcp.f32 %v2524_v58 }
 0x341   : > { %v3562_v20 = vpop.eup %3561  ;;  %2803 = vst.msk [vmem:[%s5831_s3 + $0x120] sm:$0xff] %vm2766_vm11, %v2709_v55 }
 0x342   : > { %v3564_v46 = vpop.eup %3563  ;;  %v2715_v60 = vmul.f32 %v3562_v20, %v5331_v3  ;;  %v2539_v21 = vpop.permute.xlu1 %2538 }
 0x343   : > { %v2534_v24 = vpop.permute.xlu0 %2533  ;;  %v2713_v61 = vmul.f32 %v3564_v46, %v5336_v4  ;;  %3573 = vrcp.f32 %v2539_v21  ;;  %v5874_v46 = vld [vmem:[#allocation17_spill] sm:$0xff] }
 0x344   : > { %2806 = vst.msk [vmem:[%s5831_s3 + $0x138] sm:$0xff] %vm2766_vm11, %v2715_v60  ;;  %3575 = vrcp.f32 %v2534_v24 }
 0x345   : > { %v3566_v59 = vpop.eup %3565  ;;  %2805 = vst.msk [vmem:[%s5831_s3 + $0x130] sm:$0xff] %vm2766_vm11, %v2713_v61  ;;  %v5875_v61 = vld [vmem:[#allocation18_spill] sm:$0xff] }
 0x346   : > { %v3568_v0 = vpop.eup %3567  ;;  %v2719_v3 = vmul.f32 %v3566_v59, %v5343_v12  ;;  %v2549_v25 = vpop.permute.xlu1 %2548 }
 0x347   : > { %v2544_v47 = vpop.permute.xlu0 %2543  ;;  %v2717_v4 = vmul.f32 %v3568_v0, %v5348_v13  ;;  %3577 = vrcp.f32 %v2549_v25 }
 0x348   : > { %2808 = vst.msk [vmem:[%s5831_s3 + $0x148] sm:$0xff] %vm2766_vm11, %v2719_v3  ;;  %3579 = vrcp.f32 %v2544_v47  ;;  %v5876_v3 = vld [vmem:[#allocation19_spill] sm:$0xff] }
 0x349   : > { %v3570_v62 = vpop.eup %3569  ;;  %2807 = vst.msk [vmem:[%s5831_s3 + $0x140] sm:$0xff] %vm2766_vm11, %v2717_v4 }
 0x34a   : > { %v3572_v28 = vpop.eup %3571  ;;  %v2723_v12 = vmul.f32 %v3570_v62, %v5355_v26  ;;  %v2559_v48 = vpop.permute.xlu1 %2558  ;;  %v5877_v62 = vld [vmem:[#allocation20_spill] sm:$0xff] }
 0x34b   : > { %v2554_v9 = vpop.permute.xlu0 %2553  ;;  %v2721_v13 = vmul.f32 %v3572_v28, %v5360_v27  ;;  %3581 = vrcp.f32 %v2559_v48 }
 0x34c   : > { %2810 = vst.msk [vmem:[%s5831_s3 + $0x158] sm:$0xff] %vm2766_vm11, %v2723_v12  ;;  %3583 = vrcp.f32 %v2554_v9  ;;  %v5878_v12 = vld [vmem:[#allocation21_spill] sm:$0xff] }
 0x34d   : > { %v3574_v29 = vpop.eup %3573  ;;  %2809 = vst.msk [vmem:[%s5831_s3 + $0x150] sm:$0xff] %vm2766_vm11, %v2721_v13 }
 0x34e   : > { %v3576_v63 = vpop.eup %3575  ;;  %v2727_v26 = vmul.f32 %v3574_v29, %v5367_v34  ;;  %v2569_v16 = vpop.permute.xlu1 %2568  ;;  %v5879_v29 = vld [vmem:[#allocation22_spill] sm:$0xff] }
 0x34f   : > { %v2564_v32 = vpop.permute.xlu0 %2563  ;;  %v2725_v27 = vmul.f32 %v3576_v63, %v5372_v35  ;;  %3585 = vrcp.f32 %v2569_v16 }
 0x350   : > { %2812 = vst.msk [vmem:[%s5831_s3 + $0x168] sm:$0xff] %vm2766_vm11, %v2727_v26  ;;  %3587 = vrcp.f32 %v2564_v32  ;;  %v5880_v26 = vld [vmem:[#allocation23_spill] sm:$0xff] }
 0x351   : > { %v3578_v44 = vpop.eup %3577  ;;  %2811 = vst.msk [vmem:[%s5831_s3 + $0x160] sm:$0xff] %vm2766_vm11, %v2725_v27  ;;  %v5881_v27 = vld [vmem:[#allocation24_spill] sm:$0xff] }
 0x352   : > { %v3580_v1 = vpop.eup %3579  ;;  %v2731_v34 = vmul.f32 %v3578_v44, %v5379_v41  ;;  %v2579_v33 = vpop.permute.xlu1 %2578 }
 0x353   : > { %v2574_v57 = vpop.permute.xlu0 %2573  ;;  %v2729_v35 = vmul.f32 %v3580_v1, %v5384_v42  ;;  %3589 = vrcp.f32 %v2579_v33 }
 0x354   : > { %2814 = vst.msk [vmem:[%s5831_s3 + $0x178] sm:$0xff] %vm2766_vm11, %v2731_v34  ;;  %3591 = vrcp.f32 %v2574_v57 }
 0x355   : > { %v3582_v52 = vpop.eup %3581  ;;  %2813 = vst.msk [vmem:[%s5831_s3 + $0x170] sm:$0xff] %vm2766_vm11, %v2729_v35 }
 0x356   : > { %v3584_v36 = vpop.eup %3583  ;;  %v2735_v41 = vmul.f32 %v3582_v52, %v5391_v50  ;;  %v2589_v2 = vpop.permute.xlu1 %2588 }
 0x357   : > { %v2584_v8 = vpop.permute.xlu0 %2583  ;;  %v2733_v42 = vmul.f32 %v3584_v36, %v5396_v51  ;;  %3593 = vrcp.f32 %v2589_v2 }
 0x358   : > { %2816 = vst.msk [vmem:[%s5831_s3 + $0x188] sm:$0xff] %vm2766_vm11, %v2735_v41  ;;  %3595 = vrcp.f32 %v2584_v8 }
 0x359   : > { %v3586_v6 = vpop.eup %3585  ;;  %2815 = vst.msk [vmem:[%s5831_s3 + $0x180] sm:$0xff] %vm2766_vm11, %v2733_v42 }
 0x35a   : > { %v3588_v30 = vpop.eup %3587  ;;  %v2739_v50 = vmul.f32 %v3586_v6, %v5403_v23  ;;  %v2599_v5 = vpop.permute.xlu1 %2598 }
 0x35b   : > { %v2594_v39 = vpop.permute.xlu0 %2593  ;;  %v2737_v51 = vmul.f32 %v3588_v30, %v5868_v53  ;;  %3597 = vrcp.f32 %v2599_v5 }
 0x35c   : > { %2818 = vst.msk [vmem:[%s5831_s3 + $0x198] sm:$0xff] %vm2766_vm11, %v2739_v50  ;;  %3599 = vrcp.f32 %v2594_v39 }
 0x35d   : > { %v3590_v38 = vpop.eup %3589  ;;  %2817 = vst.msk [vmem:[%s5831_s3 + $0x190] sm:$0xff] %vm2766_vm11, %v2737_v51 }
 0x35e   : > { %v3592_v40 = vpop.eup %3591  ;;  %v2743_v23 = vmul.f32 %v3590_v38, %v5869_v7  ;;  %v2609_v37 = vpop.permute.xlu1 %2608 }
 0x35f   : > { %v2604_v43 = vpop.permute.xlu0 %2603  ;;  %v2741_v10 = vmul.f32 %v3592_v40, %v5870_v17  ;;  %3601 = vrcp.f32 %v2609_v37 }
 0x360   : > { %2820 = vst.msk [vmem:[%s5831_s3 + $0x1a8] sm:$0xff] %vm2766_vm11, %v2743_v23  ;;  %3603 = vrcp.f32 %v2604_v43 }
 0x361   : > { %v3594_v14 = vpop.eup %3593  ;;  %2819 = vst.msk [vmem:[%s5831_s3 + $0x1a0] sm:$0xff] %vm2766_vm11, %v2741_v10 }
 0x362   : > { %v3596_v19 = vpop.eup %3595  ;;  %v2747_v49 = vmul.f32 %v3594_v14, %v5871_v45  ;;  %v2619_v11 = vpop.permute.xlu1 %2618 }
 0x363   : > { %v2614_v56 = vpop.permute.xlu0 %2613  ;;  %v2745_v22 = vmul.f32 %v3596_v19, %v5872_v15  ;;  %3605 = vrcp.f32 %v2619_v11 }
 0x364   : > { %2822 = vst.msk [vmem:[%s5831_s3 + $0x1b8] sm:$0xff] %vm2766_vm11, %v2747_v49  ;;  %3607 = vrcp.f32 %v2614_v56 }
 0x365   : > { %v3598_v18 = vpop.eup %3597  ;;  %2821 = vst.msk [vmem:[%s5831_s3 + $0x1b0] sm:$0xff] %vm2766_vm11, %v2745_v22 }
 0x366   : > { %v3600_v54 = vpop.eup %3599  ;;  %v2751_v58 = vmul.f32 %v3598_v18, %v5873_v31  ;;  %v2629_v55 = vpop.permute.xlu1 %2628 }
 0x367   : > { %v2624_v20 = vpop.permute.xlu0 %2623  ;;  %v2749_v60 = vmul.f32 %v3600_v54, %v5874_v46  ;;  %3609 = vrcp.f32 %v2629_v55 }
 0x368   : > { %2824 = vst.msk [vmem:[%s5831_s3 + $0x1c8] sm:$0xff] %vm2766_vm11, %v2751_v58  ;;  %3611 = vrcp.f32 %v2624_v20 }
 0x369   : > { %v3602_v21 = vpop.eup %3601  ;;  %2823 = vst.msk [vmem:[%s5831_s3 + $0x1c0] sm:$0xff] %vm2766_vm11, %v2749_v60 }
 0x36a   : > { %v3604_v24 = vpop.eup %3603  ;;  %v2755_v59 = vmul.f32 %v3602_v21, %v5875_v61 }
 0x36b   : > { %v2634_v0 = vpop.permute.xlu0 %2633  ;;  %v2753_v25 = vmul.f32 %v3604_v24, %v5876_v3 }
 0x36c   : > { %3613 = vrcp.f32 %v2634_v0  ;;  %2826 = vst.msk [vmem:[%s5831_s3 + $0x1d8] sm:$0xff] %vm2766_vm11, %v2755_v59 }
 0x36d   : > { %v3606_v47 = vpop.eup %3605  ;;  %2825 = vst.msk [vmem:[%s5831_s3 + $0x1d0] sm:$0xff] %vm2766_vm11, %v2753_v25 }
 0x36e   : > { %v3608_v4 = vpop.eup %3607  ;;  %v2759_v28 = vmul.f32 %v3606_v47, %v5877_v62 }
 0x36f   : > { %v2757_v48 = vmul.f32 %v3608_v4, %v5878_v12 }
 0x370   : > { %2828 = vst.msk [vmem:[%s5831_s3 + $0x1e8] sm:$0xff] %vm2766_vm11, %v2759_v28 }
 0x371   : > { %v3610_v9 = vpop.eup %3609  ;;  %2827 = vst.msk [vmem:[%s5831_s3 + $0x1e0] sm:$0xff] %vm2766_vm11, %v2757_v48 }
 0x372   : > { %v3612_v13 = vpop.eup %3611  ;;  %v2763_v63 = vmul.f32 %v3610_v9, %v5879_v29 }
 0x373   : > { %v2761_v16 = vmul.f32 %v3612_v13, %v5880_v26 }
 0x374   : > { %2830 = vst.msk [vmem:[%s5831_s3 + $0x1f8] sm:$0xff] %vm2766_vm11, %v2763_v63 }
 0x375   : > { %2829 = vst.msk [vmem:[%s5831_s3 + $0x1f0] sm:$0xff] %vm2766_vm11, %v2761_v16 }
 0x376   : > { %v3614_v32 = vpop.eup %3613 }
 0x377   : > { %v2765_v44 = vmul.f32 %v3614_v32, %v5881_v27 }
 0x379   : > { %2831 = vst.msk [vmem:[%s5831_s3 + $0x200] sm:$0xff] %vm2766_vm11, %v2765_v44 }
 0x37a PF: > { %p20_p8 = scmp.ge.s32.totalorder %s3787_s26, 6   ;;  %s5882_s22 = smov %s3717_s23 }
 0x37b   : > { %s5883_s23 = smov %s3721_s24  ;;  %s5884_s24 = smov %s3797_s29 }
 0x37c   : > { %s5885_s25 = smov %s3787_s26  ;;  %22 = sbr.rel (!%p20_p8) target bundleno = 17 (0x11), region = 86 }
 0x383   :  { %2843 = vsyncpa [#allocation5], 1 }
 0x384   :  { %2845 = vsyncpa [#allocation5 + $0x1], 1 }
 0x385   :  { %2846 = vsyncpa [#allocation7], 1 }
 0x386   :  { %2848 = vsyncpa [#allocation7 + $0x1], 1 }

</bundles_post_ra>
